<compile_context>
chip_gen: v6e
topology: v6e:2x2x1
jax: 0.10.0
libtpu: 0.0.40
codegen_flags: <defaults>
</compile_context>

<pallas_src>
import jax
import jax.numpy as jnp
from jax.experimental import pallas as pl
from jax.experimental.pallas import tpu as pltpu

N_TRACK = 10
N_WAYPOINTS = 3
HIDDEN = 512
LAT_HIDDEN = HIDDEN // 2         # 256
INPUT_DIM = N_TRACK * 4          # 40
FUSED_N = HIDDEN + 128           # 640: [0:512]=lateral Linear+BN1, [512:515]=fc_long, rest zeros
BN_EPS = 1e-5
MAX_TB = 1024                    # batch tile cap (rows per grid step)


def _round_up(v: int, m: int) -> int:
    return ((v + m - 1) // m) * m


def _pick_batch_tile(b: int) -> int:
    """Pick a batch tile giving an even number (>=2) of balanced grid steps.

    v7x has 2 TensorCores and the grid is the only thing sharded across them;
    an even, balanced step count gives up to ~2x there and is harmless on
    v5e/v6e (1 TC). Sublane granularity keeps the tile a multiple of 8.
    """
    steps = pl.cdiv(b, MAX_TB)
    steps = max(2, steps + (steps % 2))          # even, at least 2
    tb = _round_up(pl.cdiv(b, steps), 8)
    return max(8, min(MAX_TB, tb))


def _mlp_planner_kernel(
    x_ref,
    w1_ref, b1_ref,
    w2_ref, b2_ref,
    wf_ref, bf_ref,      # fused [wl1_bnfolded | w_long | 0-pad]: (512, 640), bias (1, 640)
    wl2_ref, bl2_ref,    # BN2 folded in: (512, 256), (1, 256)
    wl3_ref, bl3_ref,    # (256, 3), (1, 3)
    long_ref,            # (TB, 3)
    lat_ref,             # (TB, 3)
):
    x = x_ref[...]

    # trunk: fc1 -> ReLU -> (dropout=id) -> fc2 -> ReLU -> (dropout=id)
    h = jnp.dot(x, w1_ref[...], preferred_element_type=jnp.float32) + b1_ref[...]
    h = jnp.maximum(h, 0.0)
    h = jnp.dot(h, w2_ref[...], preferred_element_type=jnp.float32) + b2_ref[...]
    h = jnp.maximum(h, 0.0)

    # fused matmul: cols [0:512] = lateral Linear+BN1 (folded), [512:515] = fc_long
    fused = jnp.dot(h, wf_ref[...], preferred_element_type=jnp.float32) + bf_ref[...]
    long_ref[...] = fused[:, HIDDEN:HIDDEN + N_WAYPOINTS]

    # lateral head tail: ReLU -> Linear+BN2 (folded) -> ReLU -> Linear
    l = jnp.maximum(fused[:, :HIDDEN], 0.0)
    l = jnp.dot(l, wl2_ref[...], preferred_element_type=jnp.float32) + bl2_ref[...]
    l = jnp.maximum(l, 0.0)
    lat_ref[...] = (
        jnp.dot(l, wl3_ref[...], preferred_element_type=jnp.float32) + bl3_ref[...]
    )


def _pallas_forward(x, weights, b, tb, single_buffer_weights):
    grid = (pl.cdiv(b, tb),)

    x_spec = pl.BlockSpec((tb, INPUT_DIM), lambda i: (i, 0))
    if single_buffer_weights:
        # constant index_map -> the second pipeline buffer is pure waste
        const = lambda arr: pl.BlockSpec(
            arr.shape, lambda i: (0, 0), pipeline_mode=pl.Buffered(1))
    else:
        const = lambda arr: pl.BlockSpec(arr.shape, lambda i: (0, 0))
    out_specs = (
        pl.BlockSpec((tb, N_WAYPOINTS), lambda i: (i, 0)),
        pl.BlockSpec((tb, N_WAYPOINTS), lambda i: (i, 0)),
    )

    weight_bytes = sum(int(w.size) * 4 for w in weights)
    flops = 2 * b * (
        INPUT_DIM * HIDDEN + HIDDEN * HIDDEN + HIDDEN * FUSED_N
        + HIDDEN * LAT_HIDDEN + LAT_HIDDEN * N_WAYPOINTS
    )
    bytes_accessed = b * INPUT_DIM * 4 + weight_bytes + 2 * b * N_WAYPOINTS * 4

    return pl.pallas_call(
        _mlp_planner_kernel,
        out_shape=(
            jax.ShapeDtypeStruct((b, N_WAYPOINTS), jnp.float32),
            jax.ShapeDtypeStruct((b, N_WAYPOINTS), jnp.float32),
        ),
        grid=grid,
        in_specs=[x_spec] + [const(w) for w in weights],
        out_specs=out_specs,
        compiler_params=pltpu.CompilerParams(
            dimension_semantics=("parallel",),
            vmem_limit_bytes=48 * 1024 * 1024,
        ),
        cost_estimate=pl.CostEstimate(
            flops=flops, transcendentals=0, bytes_accessed=bytes_accessed),
    )(x, *weights)


def init_params(key):
    """Deterministic synthetic parameters matching the PyTorch module's shapes."""
    ks = jax.random.split(key, 16)

    def lin(k, fan_in, fan_out):
        bound = 1.0 / jnp.sqrt(fan_in)
        kw, kb = jax.random.split(k)
        w = jax.random.uniform(kw, (fan_in, fan_out), jnp.float32, -bound, bound)
        b = jax.random.uniform(kb, (fan_out,), jnp.float32, -bound, bound)
        return w, b

    p = {}
    p["w1"], p["b1"] = lin(ks[0], INPUT_DIM, HIDDEN)
    p["w2"], p["b2"] = lin(ks[1], HIDDEN, HIDDEN)
    p["w_long"], p["b_long"] = lin(ks[2], HIDDEN, N_WAYPOINTS)
    p["wl1"], p["bl1"] = lin(ks[3], HIDDEN, HIDDEN)
    p["wl2"], p["bl2"] = lin(ks[4], HIDDEN, LAT_HIDDEN)
    p["wl3"], p["bl3"] = lin(ks[5], LAT_HIDDEN, N_WAYPOINTS)
    # BatchNorm1d params (eval mode uses running stats)
    p["bn1_gamma"] = jax.random.uniform(ks[6], (HIDDEN,), jnp.float32, 0.5, 1.5)
    p["bn1_beta"] = jax.random.uniform(ks[7], (HIDDEN,), jnp.float32, -0.5, 0.5)
    p["bn1_mean"] = jax.random.uniform(ks[8], (HIDDEN,), jnp.float32, -0.5, 0.5)
    p["bn1_var"] = jax.random.uniform(ks[9], (HIDDEN,), jnp.float32, 0.5, 1.5)
    p["bn2_gamma"] = jax.random.uniform(ks[10], (LAT_HIDDEN,), jnp.float32, 0.5, 1.5)
    p["bn2_beta"] = jax.random.uniform(ks[11], (LAT_HIDDEN,), jnp.float32, -0.5, 0.5)
    p["bn2_mean"] = jax.random.uniform(ks[12], (LAT_HIDDEN,), jnp.float32, -0.5, 0.5)
    p["bn2_var"] = jax.random.uniform(ks[13], (LAT_HIDDEN,), jnp.float32, 0.5, 1.5)
    return p


def mlp_planner_forward(track_left, track_right, params):
    """track_left/track_right: (b, n_track, 2) -> waypoints (b, n_waypoints, 2)."""
    b = track_left.shape[0]
    # glue: concat along last dim then flatten to (b, n_track*4), exactly like torch
    x = jnp.concatenate([track_left, track_right], axis=2).reshape(b, -1)
    x = x.astype(jnp.float32)

    # glue: fold BatchNorm1d (eval) into the preceding Linear weights/biases (exact)
    s1 = params["bn1_gamma"] / jnp.sqrt(params["bn1_var"] + BN_EPS)
    t1 = params["bn1_beta"] - params["bn1_mean"] * s1
    s2 = params["bn2_gamma"] / jnp.sqrt(params["bn2_var"] + BN_EPS)
    t2 = params["bn2_beta"] - params["bn2_mean"] * s2
    wl1_f = params["wl1"] * s1[None, :]
    bl1_f = params["bl1"] * s1 + t1
    wl2_f = params["wl2"] * s2[None, :]
    bl2_f = params["bl2"] * s2 + t2

    # glue: fuse fc_long into the first lateral-head matmul; zero-pad to a
    # lane-aligned 640-column weight so in-kernel slices sit on 128-lane bounds
    pad = FUSED_N - HIDDEN - N_WAYPOINTS
    w_fused = jnp.concatenate(
        [wl1_f, params["w_long"], jnp.zeros((HIDDEN, pad), jnp.float32)], axis=1)
    b_fused = jnp.concatenate(
        [bl1_f, params["b_long"], jnp.zeros((pad,), jnp.float32)], axis=0)

    row = lambda v: v[None, :]  # present 1-D vectors as (1, n) lane-dense rows
    weights = (
        params["w1"], row(params["b1"]),
        params["w2"], row(params["b2"]),
        w_fused, row(b_fused),
        wl2_f, row(bl2_f),
        params["wl3"], row(params["bl3"]),
    )

    tb = _pick_batch_tile(b)
    try:
        pred_long, pred_lat = _pallas_forward(x, weights, b, tb, True)
    except Exception:
        # pipeline_mode=pl.Buffered(1) unsupported on this jax build:
        # fall back to default (double) buffering for the resident weights.
        pred_long, pred_lat = _pallas_forward(x, weights, b, tb, False)

    # glue: torch.stack((pred_long, pred_lat), dim=2) -> (b, n_waypoints, 2)
    return jnp.stack([pred_long, pred_lat], axis=2)


def _reference_forward(track_left, track_right, params):
    """Pure-JAX reference mirroring the PyTorch forward (eval mode)."""
    b = track_left.shape[0]
    x = jnp.concatenate([track_left, track_right], axis=2).reshape(b, -1)
    h = jax.nn.relu(x @ params["w1"] + params["b1"])
    h = jax.nn.relu(h @ params["w2"] + params["b2"])
    pred_long = h @ params["w_long"] + params["b_long"]
    l = h @ params["wl1"] + params["bl1"]
    l = (l - params["bn1_mean"]) / jnp.sqrt(params["bn1_var"] + BN_EPS)
    l = jax.nn.relu(l * params["bn1_gamma"] + params["bn1_beta"])
    l = l @ params["wl2"] + params["bl2"]
    l = (l - params["bn2_mean"]) / jnp.sqrt(params["bn2_var"] + BN_EPS)
    l = jax.nn.relu(l * params["bn2_gamma"] + params["bn2_beta"])
    pred_lat = l @ params["wl3"] + params["bl3"]
    return jnp.stack([pred_long, pred_lat], axis=2)


if __name__ == "__main__":
    key = jax.random.PRNGKey(0)
    k_params, k_left, k_right = jax.random.split(key, 3)

    batch = 2
    params = init_params(k_params)
    track_left = jax.random.normal(k_left, (batch, N_TRACK, 2), jnp.float32)
    track_right = jax.random.normal(k_right, (batch, N_TRACK, 2), jnp.float32)

    out = jax.block_until_ready(mlp_planner_forward(track_left, track_right, params))
    ref = jax.block_until_ready(_reference_forward(track_left, track_right, params))
    assert out.shape == (batch, N_WAYPOINTS, 2), out.shape
    assert jnp.allclose(out, ref, atol=1e-4, rtol=1e-4), "mismatch vs reference"

    # also exercise a batch that spans multiple (balanced) grid steps
    batch2 = 1037
    kl2, kr2 = jax.random.split(jax.random.PRNGKey(1))
    tl2 = jax.random.normal(kl2, (batch2, N_TRACK, 2), jnp.float32)
    tr2 = jax.random.normal(kr2, (batch2, N_TRACK, 2), jnp.float32)
    out2 = jax.block_until_ready(mlp_planner_forward(tl2, tr2, params))
    ref2 = jax.block_until_ready(_reference_forward(tl2, tr2, params))
    assert out2.shape == (batch2, N_WAYPOINTS, 2), out2.shape
    assert jnp.allclose(out2, ref2, atol=1e-4, rtol=1e-4), "mismatch vs reference (tiled)"

    print("KERNEL_OK")
</pallas_src>

<mosaic_0001>
module attributes {stable_mosaic.version = 11 : i64} {
  func.func @_mlp_planner_kernel(%arg0: i32, %arg1: memref<8x40xf32, #tpu.memory_space<vmem>>, %arg2: memref<40x512xf32, #tpu.memory_space<vmem>>, %arg3: memref<1x512xf32, #tpu.memory_space<vmem>>, %arg4: memref<512x512xf32, #tpu.memory_space<vmem>>, %arg5: memref<1x512xf32, #tpu.memory_space<vmem>>, %arg6: memref<512x640xf32, #tpu.memory_space<vmem>>, %arg7: memref<1x640xf32, #tpu.memory_space<vmem>>, %arg8: memref<512x256xf32, #tpu.memory_space<vmem>>, %arg9: memref<1x256xf32, #tpu.memory_space<vmem>>, %arg10: memref<256x3xf32, #tpu.memory_space<vmem>>, %arg11: memref<1x3xf32, #tpu.memory_space<vmem>>, %arg12: memref<8x3xf32, #tpu.memory_space<vmem>>, %arg13: memref<8x3xf32, #tpu.memory_space<vmem>>) attributes {dimension_semantics = [#tpu.dimension_semantics<parallel>], iteration_bounds = array<i64: 1>, scalar_prefetch = 0 : i64, scratch_operands = 0 : i64, tpu.core_type = #tpu.core_type<tc>, window_params = [{transform_indices = @transform_0, window_bounds = array<i64: 8, 40>}, {pipeline_mode = #tpu.pipeline_mode<synchronous>, transform_indices = @transform_1, window_bounds = array<i64: 40, 512>}, {pipeline_mode = #tpu.pipeline_mode<synchronous>, transform_indices = @transform_2, window_bounds = array<i64: 1, 512>}, {pipeline_mode = #tpu.pipeline_mode<synchronous>, transform_indices = @transform_3, window_bounds = array<i64: 512, 512>}, {pipeline_mode = #tpu.pipeline_mode<synchronous>, transform_indices = @transform_4, window_bounds = array<i64: 1, 512>}, {pipeline_mode = #tpu.pipeline_mode<synchronous>, transform_indices = @transform_5, window_bounds = array<i64: 512, 640>}, {pipeline_mode = #tpu.pipeline_mode<synchronous>, transform_indices = @transform_6, window_bounds = array<i64: 1, 640>}, {pipeline_mode = #tpu.pipeline_mode<synchronous>, transform_indices = @transform_7, window_bounds = array<i64: 512, 256>}, {pipeline_mode = #tpu.pipeline_mode<synchronous>, transform_indices = @transform_8, window_bounds = array<i64: 1, 256>}, {pipeline_mode = #tpu.pipeline_mode<synchronous>, transform_indices = @transform_9, window_bounds = array<i64: 256, 3>}, {pipeline_mode = #tpu.pipeline_mode<synchronous>, transform_indices = @transform_10, window_bounds = array<i64: 1, 3>}, {transform_indices = @transform_11, window_bounds = array<i64: 8, 3>}, {transform_indices = @transform_12, window_bounds = array<i64: 8, 3>}]} {
    %c0 = arith.constant 0 : index
    %c0_0 = arith.constant 0 : index
    %0 = vector.load %arg1[%c0, %c0_0] : memref<8x40xf32, #tpu.memory_space<vmem>>, vector<8x40xf32>
    %c0_1 = arith.constant 0 : index
    %c0_2 = arith.constant 0 : index
    %1 = vector.load %arg2[%c0_1, %c0_2] : memref<40x512xf32, #tpu.memory_space<vmem>>, vector<40x512xf32>
    %cst = arith.constant dense<0.000000e+00> : vector<8x512xf32>
    %2 = tpu.matmul %0, %1, %cst {dimension_numbers = #tpu.dot_dimension_numbers<[1], [0], [0], [1], [0, 0, 1, 1], [], []>} : vector<8x40xf32>, vector<40x512xf32>, vector<8x512xf32> -> vector<8x512xf32>
    %c0_3 = arith.constant 0 : index
    %c0_4 = arith.constant 0 : index
    %3 = vector.load %arg3[%c0_3, %c0_4] : memref<1x512xf32, #tpu.memory_space<vmem>>, vector<1x512xf32>
    %4 = vector.broadcast %3 : vector<1x512xf32> to vector<8x512xf32>
    %5 = arith.addf %2, %4 : vector<8x512xf32>
    %cst_5 = arith.constant 0.000000e+00 : f32
    %6 = vector.broadcast %cst_5 : f32 to vector<8x512xf32>
    %7 = arith.maximumf %5, %6 : vector<8x512xf32>
    %c0_6 = arith.constant 0 : index
    %c0_7 = arith.constant 0 : index
    %8 = vector.load %arg4[%c0_6, %c0_7] : memref<512x512xf32, #tpu.memory_space<vmem>>, vector<512x512xf32>
    %cst_8 = arith.constant dense<0.000000e+00> : vector<8x512xf32>
    %9 = tpu.matmul %7, %8, %cst_8 {dimension_numbers = #tpu.dot_dimension_numbers<[1], [0], [0], [1], [0, 0, 1, 1], [], []>} : vector<8x512xf32>, vector<512x512xf32>, vector<8x512xf32> -> vector<8x512xf32>
    %c0_9 = arith.constant 0 : index
    %c0_10 = arith.constant 0 : index
    %10 = vector.load %arg5[%c0_9, %c0_10] : memref<1x512xf32, #tpu.memory_space<vmem>>, vector<1x512xf32>
    %11 = vector.broadcast %10 : vector<1x512xf32> to vector<8x512xf32>
    %12 = arith.addf %9, %11 : vector<8x512xf32>
    %cst_11 = arith.constant 0.000000e+00 : f32
    %13 = vector.broadcast %cst_11 : f32 to vector<8x512xf32>
    %14 = arith.maximumf %12, %13 : vector<8x512xf32>
    %c0_12 = arith.constant 0 : index
    %c0_13 = arith.constant 0 : index
    %15 = vector.load %arg6[%c0_12, %c0_13] : memref<512x640xf32, #tpu.memory_space<vmem>>, vector<512x640xf32>
    %cst_14 = arith.constant dense<0.000000e+00> : vector<8x640xf32>
    %16 = tpu.matmul %14, %15, %cst_14 {dimension_numbers = #tpu.dot_dimension_numbers<[1], [0], [0], [1], [0, 0, 1, 1], [], []>} : vector<8x512xf32>, vector<512x640xf32>, vector<8x640xf32> -> vector<8x640xf32>
    %c0_15 = arith.constant 0 : index
    %c0_16 = arith.constant 0 : index
    %17 = vector.load %arg7[%c0_15, %c0_16] : memref<1x640xf32, #tpu.memory_space<vmem>>, vector<1x640xf32>
    %18 = vector.broadcast %17 : vector<1x640xf32> to vector<8x640xf32>
    %19 = arith.addf %16, %18 : vector<8x640xf32>
    %20 = vector.extract_strided_slice %19 {offsets = [0, 512], sizes = [8, 3], strides = [1, 1]} : vector<8x640xf32> to vector<8x3xf32>
    %c0_17 = arith.constant 0 : index
    %c0_18 = arith.constant 0 : index
    %21 = vector.load %arg12[%c0_17, %c0_18] : memref<8x3xf32, #tpu.memory_space<vmem>>, vector<8x3xf32>
    tpu.vector_store %arg12[%c0_17, %c0_18], %20 {strides = array<i32>} : memref<8x3xf32, #tpu.memory_space<vmem>>, vector<8x3xf32>,
    %22 = vector.extract_strided_slice %19 {offsets = [0, 0], sizes = [8, 512], strides = [1, 1]} : vector<8x640xf32> to vector<8x512xf32>
    %cst_19 = arith.constant 0.000000e+00 : f32
    %23 = vector.broadcast %cst_19 : f32 to vector<8x512xf32>
    %24 = arith.maximumf %22, %23 : vector<8x512xf32>
    %c0_20 = arith.constant 0 : index
    %c0_21 = arith.constant 0 : index
    %25 = vector.load %arg8[%c0_20, %c0_21] : memref<512x256xf32, #tpu.memory_space<vmem>>, vector<512x256xf32>
    %cst_22 = arith.constant dense<0.000000e+00> : vector<8x256xf32>
    %26 = tpu.matmul %24, %25, %cst_22 {dimension_numbers = #tpu.dot_dimension_numbers<[1], [0], [0], [1], [0, 0, 1, 1], [], []>} : vector<8x512xf32>, vector<512x256xf32>, vector<8x256xf32> -> vector<8x256xf32>
    %c0_23 = arith.constant 0 : index
    %c0_24 = arith.constant 0 : index
    %27 = vector.load %arg9[%c0_23, %c0_24] : memref<1x256xf32, #tpu.memory_space<vmem>>, vector<1x256xf32>
    %28 = vector.broadcast %27 : vector<1x256xf32> to vector<8x256xf32>
    %29 = arith.addf %26, %28 : vector<8x256xf32>
    %cst_25 = arith.constant 0.000000e+00 : f32
    %30 = vector.broadcast %cst_25 : f32 to vector<8x256xf32>
    %31 = arith.maximumf %29, %30 : vector<8x256xf32>
    %c0_26 = arith.constant 0 : index
    %c0_27 = arith.constant 0 : index
    %32 = vector.load %arg10[%c0_26, %c0_27] : memref<256x3xf32, #tpu.memory_space<vmem>>, vector<256x3xf32>
    %cst_28 = arith.constant dense<0.000000e+00> : vector<8x3xf32>
    %33 = tpu.matmul %31, %32, %cst_28 {dimension_numbers = #tpu.dot_dimension_numbers<[1], [0], [0], [1], [0, 0, 1, 1], [], []>} : vector<8x256xf32>, vector<256x3xf32>, vector<8x3xf32> -> vector<8x3xf32>
    %c0_29 = arith.constant 0 : index
    %c0_30 = arith.constant 0 : index
    %34 = vector.load %arg11[%c0_29, %c0_30] : memref<1x3xf32, #tpu.memory_space<vmem>>, vector<1x3xf32>
    %35 = vector.broadcast %34 : vector<1x3xf32> to vector<8x3xf32>
    %36 = arith.addf %33, %35 : vector<8x3xf32>
    %c0_31 = arith.constant 0 : index
    %c0_32 = arith.constant 0 : index
    %37 = vector.load %arg13[%c0_31, %c0_32] : memref<8x3xf32, #tpu.memory_space<vmem>>, vector<8x3xf32>
    tpu.vector_store %arg13[%c0_31, %c0_32], %36 {strides = array<i32>} : memref<8x3xf32, #tpu.memory_space<vmem>>, vector<8x3xf32>,
    return
  }
  func.func @transform_0(%arg0: i32) -> (i32, i32) {
    %c0_i32 = arith.constant 0 : i32
    %c0_i32_0 = arith.constant 0 : i32
    return %arg0, %c0_i32 : i32, i32
  }
  func.func @transform_1(%arg0: i32) -> (i32, i32) {
    %c0_i32 = arith.constant 0 : i32
    %c0_i32_0 = arith.constant 0 : i32
    %c0_i32_1 = arith.constant 0 : i32
    return %c0_i32, %c0_i32_0 : i32, i32
  }
  func.func @transform_2(%arg0: i32) -> (i32, i32) {
    %c0_i32 = arith.constant 0 : i32
    %c0_i32_0 = arith.constant 0 : i32
    %c0_i32_1 = arith.constant 0 : i32
    return %c0_i32, %c0_i32_0 : i32, i32
  }
  func.func @transform_3(%arg0: i32) -> (i32, i32) {
    %c0_i32 = arith.constant 0 : i32
    %c0_i32_0 = arith.constant 0 : i32
    %c0_i32_1 = arith.constant 0 : i32
    return %c0_i32, %c0_i32_0 : i32, i32
  }
  func.func @transform_4(%arg0: i32) -> (i32, i32) {
    %c0_i32 = arith.constant 0 : i32
    %c0_i32_0 = arith.constant 0 : i32
    %c0_i32_1 = arith.constant 0 : i32
    return %c0_i32, %c0_i32_0 : i32, i32
  }
  func.func @transform_5(%arg0: i32) -> (i32, i32) {
    %c0_i32 = arith.constant 0 : i32
    %c0_i32_0 = arith.constant 0 : i32
    %c0_i32_1 = arith.constant 0 : i32
    return %c0_i32, %c0_i32_0 : i32, i32
  }
  func.func @transform_6(%arg0: i32) -> (i32, i32) {
    %c0_i32 = arith.constant 0 : i32
    %c0_i32_0 = arith.constant 0 : i32
    %c0_i32_1 = arith.constant 0 : i32
    return %c0_i32, %c0_i32_0 : i32, i32
  }
  func.func @transform_7(%arg0: i32) -> (i32, i32) {
    %c0_i32 = arith.constant 0 : i32
    %c0_i32_0 = arith.constant 0 : i32
    %c0_i32_1 = arith.constant 0 : i32
    return %c0_i32, %c0_i32_0 : i32, i32
  }
  func.func @transform_8(%arg0: i32) -> (i32, i32) {
    %c0_i32 = arith.constant 0 : i32
    %c0_i32_0 = arith.constant 0 : i32
    %c0_i32_1 = arith.constant 0 : i32
    return %c0_i32, %c0_i32_0 : i32, i32
  }
  func.func @transform_9(%arg0: i32) -> (i32, i32) {
    %c0_i32 = arith.constant 0 : i32
    %c0_i32_0 = arith.constant 0 : i32
    %c0_i32_1 = arith.constant 0 : i32
    return %c0_i32, %c0_i32_0 : i32, i32
  }
  func.func @transform_10(%arg0: i32) -> (i32, i32) {
    %c0_i32 = arith.constant 0 : i32
    %c0_i32_0 = arith.constant 0 : i32
    %c0_i32_1 = arith.constant 0 : i32
    return %c0_i32, %c0_i32_0 : i32, i32
  }
  func.func @transform_11(%arg0: i32) -> (i32, i32) {
    %c0_i32 = arith.constant 0 : i32
    %c0_i32_0 = arith.constant 0 : i32
    return %arg0, %c0_i32 : i32, i32
  }
  func.func @transform_12(%arg0: i32) -> (i32, i32) {
    %c0_i32 = arith.constant 0 : i32
    %c0_i32_0 = arith.constant 0 : i32
    return %arg0, %c0_i32 : i32, i32
  }
}

module attributes {stable_mosaic.version = 11 : i64} {
  func.func @_mlp_planner_kernel(%arg0: i32, %arg1: memref<8x40xf32, #tpu.memory_space<vmem>>, %arg2: memref<40x512xf32, #tpu.memory_space<vmem>>, %arg3: memref<1x512xf32, #tpu.memory_space<vmem>>, %arg4: memref<512x512xf32, #tpu.memory_space<vmem>>, %arg5: memref<1x512xf32, #tpu.memory_space<vmem>>, %arg6: memref<512x640xf32, #tpu.memory_space<vmem>>, %arg7: memref<1x640xf32, #tpu.memory_space<vmem>>, %arg8: memref<512x256xf32, #tpu.memory_space<vmem>>, %arg9: memref<1x256xf32, #tpu.memory_space<vmem>>, %arg10: memref<256x3xf32, #tpu.memory_space<vmem>>, %arg11: memref<1x3xf32, #tpu.memory_space<vmem>>, %arg12: memref<8x3xf32, #tpu.memory_space<vmem>>, %arg13: memref<8x3xf32, #tpu.memory_space<vmem>>) attributes {dimension_semantics = [#tpu.dimension_semantics<parallel>], iteration_bounds = array<i64: 1>, scalar_prefetch = 0 : i64, scratch_operands = 0 : i64, tpu.core_type = #tpu.core_type<tc>, window_params = [{transform_indices = @transform_0, window_bounds = array<i64: 8, 40>}, {pipeline_mode = #tpu.pipeline_mode<synchronous>, transform_indices = @transform_1, window_bounds = array<i64: 40, 512>}, {pipeline_mode = #tpu.pipeline_mode<synchronous>, transform_indices = @transform_2, window_bounds = array<i64: 1, 512>}, {pipeline_mode = #tpu.pipeline_mode<synchronous>, transform_indices = @transform_3, window_bounds = array<i64: 512, 512>}, {pipeline_mode = #tpu.pipeline_mode<synchronous>, transform_indices = @transform_4, window_bounds = array<i64: 1, 512>}, {pipeline_mode = #tpu.pipeline_mode<synchronous>, transform_indices = @transform_5, window_bounds = array<i64: 512, 640>}, {pipeline_mode = #tpu.pipeline_mode<synchronous>, transform_indices = @transform_6, window_bounds = array<i64: 1, 640>}, {pipeline_mode = #tpu.pipeline_mode<synchronous>, transform_indices = @transform_7, window_bounds = array<i64: 512, 256>}, {pipeline_mode = #tpu.pipeline_mode<synchronous>, transform_indices = @transform_8, window_bounds = array<i64: 1, 256>}, {pipeline_mode = #tpu.pipeline_mode<synchronous>, transform_indices = @transform_9, window_bounds = array<i64: 256, 3>}, {pipeline_mode = #tpu.pipeline_mode<synchronous>, transform_indices = @transform_10, window_bounds = array<i64: 1, 3>}, {transform_indices = @transform_11, window_bounds = array<i64: 8, 3>}, {transform_indices = @transform_12, window_bounds = array<i64: 8, 3>}]} {
    %c0 = arith.constant 0 : index
    %c0_0 = arith.constant 0 : index
    %0 = vector.load %arg1[%c0, %c0_0] : memref<8x40xf32, #tpu.memory_space<vmem>>, vector<8x40xf32>
    %c0_1 = arith.constant 0 : index
    %c0_2 = arith.constant 0 : index
    %1 = vector.load %arg2[%c0_1, %c0_2] : memref<40x512xf32, #tpu.memory_space<vmem>>, vector<40x512xf32>
    %cst = arith.constant dense<0.000000e+00> : vector<8x512xf32>
    %2 = tpu.matmul %0, %1, %cst {dimension_numbers = #tpu.dot_dimension_numbers<[1], [0], [0], [1], [0, 0, 1, 1], [], []>} : vector<8x40xf32>, vector<40x512xf32>, vector<8x512xf32> -> vector<8x512xf32>
    %c0_3 = arith.constant 0 : index
    %c0_4 = arith.constant 0 : index
    %3 = vector.load %arg3[%c0_3, %c0_4] : memref<1x512xf32, #tpu.memory_space<vmem>>, vector<1x512xf32>
    %4 = vector.broadcast %3 : vector<1x512xf32> to vector<8x512xf32>
    %5 = arith.addf %2, %4 : vector<8x512xf32>
    %cst_5 = arith.constant 0.000000e+00 : f32
    %6 = vector.broadcast %cst_5 : f32 to vector<8x512xf32>
    %7 = arith.maximumf %5, %6 : vector<8x512xf32>
    %c0_6 = arith.constant 0 : index
    %c0_7 = arith.constant 0 : index
    %8 = vector.load %arg4[%c0_6, %c0_7] : memref<512x512xf32, #tpu.memory_space<vmem>>, vector<512x512xf32>
    %cst_8 = arith.constant dense<0.000000e+00> : vector<8x512xf32>
    %9 = tpu.matmul %7, %8, %cst_8 {dimension_numbers = #tpu.dot_dimension_numbers<[1], [0], [0], [1], [0, 0, 1, 1], [], []>} : vector<8x512xf32>, vector<512x512xf32>, vector<8x512xf32> -> vector<8x512xf32>
    %c0_9 = arith.constant 0 : index
    %c0_10 = arith.constant 0 : index
    %10 = vector.load %arg5[%c0_9, %c0_10] : memref<1x512xf32, #tpu.memory_space<vmem>>, vector<1x512xf32>
    %11 = vector.broadcast %10 : vector<1x512xf32> to vector<8x512xf32>
    %12 = arith.addf %9, %11 : vector<8x512xf32>
    %cst_11 = arith.constant 0.000000e+00 : f32
    %13 = vector.broadcast %cst_11 : f32 to vector<8x512xf32>
    %14 = arith.maximumf %12, %13 : vector<8x512xf32>
    %c0_12 = arith.constant 0 : index
    %c0_13 = arith.constant 0 : index
    %15 = vector.load %arg6[%c0_12, %c0_13] : memref<512x640xf32, #tpu.memory_space<vmem>>, vector<512x640xf32>
    %cst_14 = arith.constant dense<0.000000e+00> : vector<8x640xf32>
    %16 = tpu.matmul %14, %15, %cst_14 {dimension_numbers = #tpu.dot_dimension_numbers<[1], [0], [0], [1], [0, 0, 1, 1], [], []>} : vector<8x512xf32>, vector<512x640xf32>, vector<8x640xf32> -> vector<8x640xf32>
    %c0_15 = arith.constant 0 : index
    %c0_16 = arith.constant 0 : index
    %17 = vector.load %arg7[%c0_15, %c0_16] : memref<1x640xf32, #tpu.memory_space<vmem>>, vector<1x640xf32>
    %18 = vector.broadcast %17 : vector<1x640xf32> to vector<8x640xf32>
    %19 = arith.addf %16, %18 : vector<8x640xf32>
    %20 = vector.extract_strided_slice %19 {offsets = [0, 512], sizes = [8, 3], strides = [1, 1]} : vector<8x640xf32> to vector<8x3xf32>
    %c0_17 = arith.constant 0 : index
    %c0_18 = arith.constant 0 : index
    %21 = vector.load %arg12[%c0_17, %c0_18] : memref<8x3xf32, #tpu.memory_space<vmem>>, vector<8x3xf32>
    tpu.vector_store %arg12[%c0_17, %c0_18], %20 {strides = array<i32>} : memref<8x3xf32, #tpu.memory_space<vmem>>, vector<8x3xf32>,
    %22 = vector.extract_strided_slice %19 {offsets = [0, 0], sizes = [8, 512], strides = [1, 1]} : vector<8x640xf32> to vector<8x512xf32>
    %cst_19 = arith.constant 0.000000e+00 : f32
    %23 = vector.broadcast %cst_19 : f32 to vector<8x512xf32>
    %24 = arith.maximumf %22, %23 : vector<8x512xf32>
    %c0_20 = arith.constant 0 : index
    %c0_21 = arith.constant 0 : index
    %25 = vector.load %arg8[%c0_20, %c0_21] : memref<512x256xf32, #tpu.memory_space<vmem>>, vector<512x256xf32>
    %cst_22 = arith.constant dense<0.000000e+00> : vector<8x256xf32>
    %26 = tpu.matmul %24, %25, %cst_22 {dimension_numbers = #tpu.dot_dimension_numbers<[1], [0], [0], [1], [0, 0, 1, 1], [], []>} : vector<8x512xf32>, vector<512x256xf32>, vector<8x256xf32> -> vector<8x256xf32>
    %c0_23 = arith.constant 0 : index
    %c0_24 = arith.constant 0 : index
    %27 = vector.load %arg9[%c0_23, %c0_24] : memref<1x256xf32, #tpu.memory_space<vmem>>, vector<1x256xf32>
    %28 = vector.broadcast %27 : vector<1x256xf32> to vector<8x256xf32>
    %29 = arith.addf %26, %28 : vector<8x256xf32>
    %cst_25 = arith.constant 0.000000e+00 : f32
    %30 = vector.broadcast %cst_25 : f32 to vector<8x256xf32>
    %31 = arith.maximumf %29, %30 : vector<8x256xf32>
    %c0_26 = arith.constant 0 : index
    %c0_27 = arith.constant 0 : index
    %32 = vector.load %arg10[%c0_26, %c0_27] : memref<256x3xf32, #tpu.memory_space<vmem>>, vector<256x3xf32>
    %cst_28 = arith.constant dense<0.000000e+00> : vector<8x3xf32>
    %33 = tpu.matmul %31, %32, %cst_28 {dimension_numbers = #tpu.dot_dimension_numbers<[1], [0], [0], [1], [0, 0, 1, 1], [], []>} : vector<8x256xf32>, vector<256x3xf32>, vector<8x3xf32> -> vector<8x3xf32>
    %c0_29 = arith.constant 0 : index
    %c0_30 = arith.constant 0 : index
    %34 = vector.load %arg11[%c0_29, %c0_30] : memref<1x3xf32, #tpu.memory_space<vmem>>, vector<1x3xf32>
    %35 = vector.broadcast %34 : vector<1x3xf32> to vector<8x3xf32>
    %36 = arith.addf %33, %35 : vector<8x3xf32>
    %c0_31 = arith.constant 0 : index
    %c0_32 = arith.constant 0 : index
    %37 = vector.load %arg13[%c0_31, %c0_32] : memref<8x3xf32, #tpu.memory_space<vmem>>, vector<8x3xf32>
    tpu.vector_store %arg13[%c0_31, %c0_32], %36 {strides = array<i32>} : memref<8x3xf32, #tpu.memory_space<vmem>>, vector<8x3xf32>,
    return
  }
  func.func @transform_0(%arg0: i32) -> (i32, i32) {
    %c0_i32 = arith.constant 0 : i32
    %c0_i32_0 = arith.constant 0 : i32
    return %arg0, %c0_i32 : i32, i32
  }
  func.func @transform_1(%arg0: i32) -> (i32, i32) {
    %c0_i32 = arith.constant 0 : i32
    %c0_i32_0 = arith.constant 0 : i32
    %c0_i32_1 = arith.constant 0 : i32
    return %c0_i32, %c0_i32_0 : i32, i32
  }
  func.func @transform_2(%arg0: i32) -> (i32, i32) {
    %c0_i32 = arith.constant 0 : i32
    %c0_i32_0 = arith.constant 0 : i32
    %c0_i32_1 = arith.constant 0 : i32
    return %c0_i32, %c0_i32_0 : i32, i32
  }
  func.func @transform_3(%arg0: i32) -> (i32, i32) {
    %c0_i32 = arith.constant 0 : i32
    %c0_i32_0 = arith.constant 0 : i32
    %c0_i32_1 = arith.constant 0 : i32
    return %c0_i32, %c0_i32_0 : i32, i32
  }
  func.func @transform_4(%arg0: i32) -> (i32, i32) {
    %c0_i32 = arith.constant 0 : i32
    %c0_i32_0 = arith.constant 0 : i32
    %c0_i32_1 = arith.constant 0 : i32
    return %c0_i32, %c0_i32_0 : i32, i32
  }
  func.func @transform_5(%arg0: i32) -> (i32, i32) {
    %c0_i32 = arith.constant 0 : i32
    %c0_i32_0 = arith.constant 0 : i32
    %c0_i32_1 = arith.constant 0 : i32
    return %c0_i32, %c0_i32_0 : i32, i32
  }
  func.func @transform_6(%arg0: i32) -> (i32, i32) {
    %c0_i32 = arith.constant 0 : i32
    %c0_i32_0 = arith.constant 0 : i32
    %c0_i32_1 = arith.constant 0 : i32
    return %c0_i32, %c0_i32_0 : i32, i32
  }
  func.func @transform_7(%arg0: i32) -> (i32, i32) {
    %c0_i32 = arith.constant 0 : i32
    %c0_i32_0 = arith.constant 0 : i32
    %c0_i32_1 = arith.constant 0 : i32
    return %c0_i32, %c0_i32_0 : i32, i32
  }
  func.func @transform_8(%arg0: i32) -> (i32, i32) {
    %c0_i32 = arith.constant 0 : i32
    %c0_i32_0 = arith.constant 0 : i32
    %c0_i32_1 = arith.constant 0 : i32
    return %c0_i32, %c0_i32_0 : i32, i32
  }
  func.func @transform_9(%arg0: i32) -> (i32, i32) {
    %c0_i32 = arith.constant 0 : i32
    %c0_i32_0 = arith.constant 0 : i32
    %c0_i32_1 = arith.constant 0 : i32
    return %c0_i32, %c0_i32_0 : i32, i32
  }
  func.func @transform_10(%arg0: i32) -> (i32, i32) {
    %c0_i32 = arith.constant 0 : i32
    %c0_i32_0 = arith.constant 0 : i32
    %c0_i32_1 = arith.constant 0 : i32
    return %c0_i32, %c0_i32_0 : i32, i32
  }
  func.func @transform_11(%arg0: i32) -> (i32, i32) {
    %c0_i32 = arith.constant 0 : i32
    %c0_i32_0 = arith.constant 0 : i32
    return %arg0, %c0_i32 : i32, i32
  }
  func.func @transform_12(%arg0: i32) -> (i32, i32) {
    %c0_i32 = arith.constant 0 : i32
    %c0_i32_0 = arith.constant 0 : i32
    return %arg0, %c0_i32 : i32, i32
  }
}

</mosaic_0001>

<bundles_post_ra>
// kernel: tpu_custom_call.1
= control target key start
LH: loop header
LB: loop body
LE: loop exit
PB: predicated region body
PF: predicated region fallthrough
CT: control target
= control target key end

     0   :  { %18 = vsyncpa [#allocation3], 0  ;;  %s2828_s0 = inlined_call_operand.hbm [shape: f32[2,40], index: 0, kind: input, shape index: {}]   ;;  %s2829_s1 = inlined_call_operand.hbm [shape: f32[40,512], index: 1, kind: input, shape index: {}]   ;;  %s2830_s2 = inlined_call_operand.hbm [shape: f32[1,512], index: 2, kind: input, shape index: {}]   ;;  %s2831_s3 = inlined_call_operand.hbm [shape: f32[512,512], index: 3, kind: input, shape index: {}]   ;;  %s2832_s4 = inlined_call_operand.hbm [shape: f32[1,512], index: 4, kind: input, shape index: {}]   ;;  %s2833_s5 = inlined_call_operand.hbm [shape: f32[512,640], index: 5, kind: input, shape index: {}]   ;;  %s2834_s6 = inlined_call_operand.hbm [shape: f32[1,640], index: 6, kind: input, shape index: {}]   ;;  %s2835_s7 = inlined_call_operand.hbm [shape: f32[512,256], index: 7, kind: input, shape index: {}]   ;;  %s2836_s8 = inlined_call_operand.hbm [shape: f32[1,256], index: 8, kind: input, shape index: {}]   ;;  %s2837_s9 = inlined_call_operand.vmem [shape: f32[256,3], index: 9, kind: input, shape index: {}]   ;;  %s2838_s10 = inlined_call_operand.hbm [shape: f32[1,3], index: 10, kind: input, shape index: {}]   ;;  %s2839_s11 = inlined_call_operand.hbm [shape: f32[2,3], index: 11, kind: output, shape index: {0}]   ;;  %s2840_s12 = inlined_call_operand.hbm [shape: f32[2,3], index: 12, kind: output, shape index: {1}]  }
   0x1   :  { %19 = vsyncpa [#allocation6], 0 }
   0x2   :  { %20 = vsyncpa [#allocation9], 0 }
   0x3   :  { %21 = vsyncpa [#allocation12], 0 }
   0x4   :  { %22 = vsyncpa [#allocation15], 0 }
   0x5   :  { %23 = vsyncpa [#allocation18], 0 }
   0x6   :  { %24 = vsyncpa [#allocation4], 0 }
   0x7   :  { %25 = vsyncpa [#allocation21], 0 }
   0x8   :  { %30 = vsyncadd [#allocation3], 96  ;;  %s2520_s21 = smov [#allocation5]  }
   0x9   :  { %s43_s22 = sshll.u32 %s2520_s21, 4  ;;  %s44_s22 = int_to_ptr.vmem [resolvable:$true] %s43_s22 }
   0xa   :  { %s2272_s23 = scalar_lea.vmem %s44_s22, 2560  ;;  %p2277_p1 = scmp.lt.s32.totalorder %s44_s22, %s44_s22 }
   0xb   :  { %p2273_p0 = scmp.ne.s32.totalorder %s44_s22, %s2272_s23  ;;  %p2278_p2 = scmp.lt.s32.totalorder %s2272_s23, %s2272_s23 }
   0xd   :  { %p2279_p3 = por %p2278_p2, %p2277_p1 }
   0xf   :  { %p2280_p4 = pnand %p2279_p3, %p2273_p0 }
  0x11   :  { %2283 = shalt.err (!%p2280_p4)
}
  0x12   :  { %s2521_s24 = smov 512   ;;  %s2522_s25 = smov 32  }
  0x13   :  { %49 = dma.hbm_to_vmem [thread:$0]  %s2829_s1, 2560, %s44_s22, [#allocation6], %s2521_s24, %s2521_s24, %s2522_s25  }
  0x14   :  { %s2523_s28 = smov [#allocation8]   ;;  %s2524_s30 = smov [#allocation11]  }
  0x15   :  { %s65_s29 = sshll.u32 %s2523_s28, 4  ;;  %s87_s13 = sshll.u32 %s2524_s30, 4  ;;  %s66_s29 = int_to_ptr.vmem [resolvable:$true] %s65_s29  ;;  %s88_s13 = int_to_ptr.vmem [resolvable:$true] %s87_s13 }
  0x16   :  { %s2292_s14 = scalar_lea.vmem %s66_s29, 32768  ;;  %p2297_p6 = scmp.lt.s32.totalorder %s66_s29, %s66_s29 }
  0x17   :  { %p2293_p5 = scmp.ne.s32.totalorder %s66_s29, %s2292_s14  ;;  %p2298_p7 = scmp.lt.s32.totalorder %s2292_s14, %s2292_s14 }
  0x19   :  { %p2299_p8 = por %p2298_p7, %p2297_p6 }
  0x1b   :  { %p2300_p9 = pnand %p2299_p8, %p2293_p5 }
  0x1d   :  { %2303 = shalt.err (!%p2300_p9)
}
  0x1e   :  { %71 = dma.hbm_to_vmem [thread:$0]  %s2831_s3, 32768, %s66_s29, [#allocation9], %s2521_s24, %s2521_s24, %s2522_s25  }
  0x1f   :  { %s2312_s17 = scalar_lea.vmem %s88_s13, 40960  ;;  %p2317_p11 = scmp.lt.s32.totalorder %s88_s13, %s88_s13 }
  0x20   :  { %p2313_p10 = scmp.ne.s32.totalorder %s88_s13, %s2312_s17  ;;  %p2318_p12 = scmp.lt.s32.totalorder %s2312_s17, %s2312_s17 }
  0x22   :  { %p2319_p13 = por %p2318_p12, %p2317_p11 }
  0x24   :  { %p2320_p0 = pnand %p2319_p13, %p2313_p10 }
  0x26   :  { %2323 = shalt.err (!%p2320_p0)
}
  0x27   :  { %s2525_s1 = smov 640   ;;  %s2526_s18 = smov 40  }
  0x28   :  { %93 = dma.hbm_to_vmem [thread:$0]  %s2833_s5, 40960, %s88_s13, [#allocation12], %s2525_s1, %s2525_s1, %s2526_s18  }
  0x29   :  { %s2527_s21 = smov [#allocation14]  }
  0x2a   :  { %s109_s22 = sshll.u32 %s2527_s21, 4  ;;  %s110_s22 = int_to_ptr.vmem [resolvable:$true] %s109_s22 }
  0x2b   :  { %s2332_s23 = scalar_lea.vmem %s110_s22, 16384  ;;  %p2337_p2 = scmp.lt.s32.totalorder %s110_s22, %s110_s22 }
  0x2c   :  { %p2333_p1 = scmp.ne.s32.totalorder %s110_s22, %s2332_s23  ;;  %p2338_p3 = scmp.lt.s32.totalorder %s2332_s23, %s2332_s23 }
  0x2e   :  { %p2339_p4 = por %p2338_p3, %p2337_p2 }
  0x30   :  { %p2340_p5 = pnand %p2339_p4, %p2333_p1 }
  0x32   :  { %2343 = shalt.err (!%p2340_p5)
}
  0x33   :  { %s2528_s3 = smov 256   ;;  %s2529_s24 = smov 16  }
  0x34   :  { %115 = dma.hbm_to_vmem [thread:$0]  %s2835_s7, 16384, %s110_s22, [#allocation15], %s2528_s3, %s2528_s3, %s2529_s24  }
  0x35   :  { %s2530_s28 = smov [#allocation2]   ;;  %s2531_s5 = smov [#allocation7]  }
  0x36   :  { %s31_s29 = sshll.u32 %s2530_s28, 4  ;;  %s56_s30 = sshll.u32 %s2531_s5, 4  ;;  %s32_s29 = int_to_ptr.vmem [resolvable:$true] %s31_s29  ;;  %s57_s30 = int_to_ptr.vmem [resolvable:$true] %s56_s30 }
  0x37   :  { %s2352_s13 = scalar_lea.vmem %s32_s29, 32  ;;  %s2356_s14 = scalar_lea.vmem %s32_s29, 128 }
  0x38   :  { %p2353_p6 = scmp.ne.s32.totalorder %s32_s29, %s2352_s13  ;;  %p2357_p7 = scmp.lt.s32.totalorder %s32_s29, %s32_s29 }
  0x39   :  { %p2358_p8 = scmp.lt.s32.totalorder %s2356_s14, %s2352_s13 }
  0x3b   :  { %p2359_p9 = por %p2358_p8, %p2357_p7 }
  0x3d   :  { %p2360_p10 = pnand %p2359_p9, %p2353_p6 }
  0x3f   :  { %2363 = shalt.err (!%p2360_p10)
}
  0x40   :  { %s2532_s15 = smov 2   ;;  %s2372_s7 = scalar_lea.vmem %s57_s30, 64 }
  0x41   :  { %37 = dma.hbm_to_vmem [thread:$0]  %s2828_s0, 32, %s32_s29, [#allocation3], %s2522_s25, %s2522_s25, %s2532_s15  }
  0x42   :  { %p2373_p11 = scmp.ne.s32.totalorder %s57_s30, %s2372_s7  ;;  %p2377_p12 = scmp.lt.s32.totalorder %s57_s30, %s57_s30 }
  0x43   :  { %p2378_p13 = scmp.lt.s32.totalorder %s2372_s7, %s2372_s7 }
  0x45   :  { %p2379_p0 = por %p2378_p13, %p2377_p12 }
  0x47   :  { %p2380_p1 = pnand %p2379_p0, %p2373_p11 }
  0x49   :  { %2383 = shalt.err (!%p2380_p1)
}
  0x4a   :  { %59 = dma.hbm_to_vmem [thread:$0]  %s2830_s2, 64, %s57_s30, [#allocation6]  }
  0x4b   :  { %s2533_s19 = smov [#allocation10]   ;;  %s2534_s21 = smov [#allocation13]  }
  0x4c   :  { %s78_s20 = sshll.u32 %s2533_s19, 4  ;;  %s100_s22 = sshll.u32 %s2534_s21, 4  ;;  %s79_s20 = int_to_ptr.vmem [resolvable:$true] %s78_s20  ;;  %s101_s22 = int_to_ptr.vmem [resolvable:$true] %s100_s22 }
  0x4d   :  { %s2392_s23 = scalar_lea.vmem %s79_s20, 64  ;;  %p2397_p3 = scmp.lt.s32.totalorder %s79_s20, %s79_s20 }
  0x4e   :  { %p2393_p2 = scmp.ne.s32.totalorder %s79_s20, %s2392_s23  ;;  %p2398_p4 = scmp.lt.s32.totalorder %s2392_s23, %s2392_s23 }
  0x50   :  { %p2399_p5 = por %p2398_p4, %p2397_p3 }
  0x52   :  { %p2400_p6 = pnand %p2399_p5, %p2393_p2 }
  0x54   :  { %2403 = shalt.err (!%p2400_p6)
}
  0x55   :  { %81 = dma.hbm_to_vmem [thread:$0]  %s2832_s4, 64, %s79_s20, [#allocation9]  }
  0x56   :  { %s2412_s24 = scalar_lea.vmem %s101_s22, 80  ;;  %s2416_s2 = scalar_lea.vmem %s101_s22, 96 }
  0x57   :  { %p2413_p7 = scmp.ne.s32.totalorder %s101_s22, %s2412_s24  ;;  %p2417_p8 = scmp.lt.s32.totalorder %s101_s22, %s101_s22 }
  0x58   :  { %p2418_p9 = scmp.lt.s32.totalorder %s2416_s2, %s2412_s24 }
  0x5a   :  { %p2419_p10 = por %p2418_p9, %p2417_p8 }
  0x5c   :  { %p2420_p11 = pnand %p2419_p10, %p2413_p7 }
  0x5e   :  { %2423 = shalt.err (!%p2420_p11)
}
  0x5f   :  { %103 = dma.hbm_to_vmem [thread:$0]  %s2834_s6, 80, %s101_s22, [#allocation12]  }
  0x60   :  { %s2535_s28 = smov [#allocation16]   ;;  %s2536_s5 = smov [#allocation17]  }
  0x61   :  { %s122_s29 = sshll.u32 %s2535_s28, 4  ;;  %s134_s30 = sshll.u32 %s2536_s5, 4  ;;  %s123_s29 = int_to_ptr.vmem [resolvable:$true] %s122_s29  ;;  %s135_s30 = int_to_ptr.vmem [resolvable:$true] %s134_s30 }
  0x62   :  { %s2432_s13 = scalar_lea.vmem %s123_s29, 32  ;;  %p2437_p13 = scmp.lt.s32.totalorder %s123_s29, %s123_s29 }
  0x63   :  { %p2433_p12 = scmp.ne.s32.totalorder %s123_s29, %s2432_s13  ;;  %p2438_p0 = scmp.lt.s32.totalorder %s2432_s13, %s2432_s13 }
  0x65   :  { %p2439_p1 = por %p2438_p0, %p2437_p13 }
  0x67   :  { %p2440_p2 = pnand %p2439_p1, %p2433_p12 }
  0x69   :  { %2443 = shalt.err (!%p2440_p2)
}
  0x6a   :  { %125 = dma.hbm_to_vmem [thread:$0]  %s2836_s8, 32, %s123_s29, [#allocation15]  }
  0x6b   :  { %s2452_s16 = scalar_lea.vmem %s135_s30, 16  ;;  %s2456_s6 = scalar_lea.vmem %s135_s30, 32 }
  0x6c   :  { %p2453_p3 = scmp.ne.s32.totalorder %s135_s30, %s2452_s16  ;;  %p2457_p4 = scmp.lt.s32.totalorder %s135_s30, %s135_s30 }
  0x6d   :  { %p2458_p5 = scmp.lt.s32.totalorder %s2456_s6, %s2452_s16 }
  0x6f   :  { %p2459_p6 = por %p2458_p5, %p2457_p4 }
  0x71   :  { %p2460_p7 = pnand %p2459_p6, %p2453_p3 }
  0x73   :  { %2463 = shalt.err (!%p2460_p7)
}
  0x74   :  { %137 = dma.hbm_to_vmem [thread:$0]  %s2838_s10, 16, %s135_s30, [#allocation18]  }
  0x75   :  { %2504 = dma.done.wait [#allocation3], 128  }
  0x76   :  { %2505 = vsyncadd [#allocation3], 4294967168 }
  0x77   :  { %2506 = dma.done.wait [#allocation6], 2624  }
  0x78   :  { %2507 = vsyncadd [#allocation6], 4294964672 }
  0x79   :  { %2508 = dma.done.wait [#allocation9], 32832  }
  0x7a   :  { %2509 = vsyncadd [#allocation9], 4294934464 }
  0x7b   :  { %2510 = dma.done.wait [#allocation12], 41040  }
  0x7c   :  { %2511 = vsyncadd [#allocation12], 4294926256 }
  0x7d   :  { %2512 = dma.done.wait [#allocation15], 16416  }
  0x7e   :  { %2513 = vsyncadd [#allocation15], 4294950880 }
  0x7f   :  { %2514 = dma.done.wait [#allocation18], 16  }
  0x80   :  { %2515 = vsyncadd [#allocation18], 4294967280  ;;  %v2537_v0 = vmov 0.0   ;;  %v186_v1 = vld [vmem:[#allocation5 + $0x88] sm:$0xff]  ;;  %v185_v2 = vld [vmem:[#allocation5 + $0x80] sm:$0xff]  ;;  %vm211_vm0 = vcmask 326656  }
  0x81   :  { %279 = vmatprep.mubr.f32.mxu1 %v2537_v0  ;;  %v182_v3 = vld [vmem:[#allocation5 + $0x68] sm:$0xff]  ;;  %237 = vmatprep.subr.mxu1 %v186_v1  ;;  %v181_v4 = vld [vmem:[#allocation5 + $0x60] sm:$0xff]  ;;  %v168_v14 = vld [vmem:[#allocation2] sm:$0xff]  ;;  %vm1698_vm1 = vcmask 23552  }
  0x82   :  { %238 = vmatpush1.msra.mxu1 %v185_v2  ;;  %v178_v5 = vld [vmem:[#allocation5 + $0x48] sm:$0xff]  ;;  %v177_v6 = vld [vmem:[#allocation5 + $0x40] sm:$0xff]  ;;  %v188_v15 = vld [vmem:[#allocation5 + $0x98] sm:$0xff] }
  0x83   :  { %239 = vmatprep.subr.mxu1 %v182_v3  ;;  %v174_v7 = vld [vmem:[#allocation5 + $0x28] sm:$0xff]  ;;  %v173_v8 = vld [vmem:[#allocation5 + $0x20] sm:$0xff]  ;;  %v187_v16 = vld [vmem:[#allocation5 + $0x90] sm:$0xff] }
  0x84   :  { %240 = vmatpush1.msra.mxu1 %v181_v4  ;;  %v170_v9 = vld [vmem:[#allocation5 + $0x8] sm:$0xff]  ;;  %v169_v10 = vld [vmem:[#allocation5] sm:$0xff]  ;;  %v184_v17 = vld [vmem:[#allocation5 + $0x78] sm:$0xff] }
  0x85   :  { %241 = vmatprep.subr.mxu1 %v178_v5  ;;  %v422_v11 = vld [vmem:[#allocation8 + $0x1e8] sm:$0xff]  ;;  %v421_v12 = vld [vmem:[#allocation8 + $0x1e0] sm:$0xff]  ;;  %v180_v21 = vld [vmem:[#allocation5 + $0x58] sm:$0xff] }
  0x86   :  { %242 = vmatpush1.msra.mxu1 %v177_v6  ;;  %v418_v13 = vld [vmem:[#allocation8 + $0x1c8] sm:$0xff]  ;;  %639 = vmatprep.subr.mxu0 %v422_v11  ;;  %v417_v18 = vld [vmem:[#allocation8 + $0x1c0] sm:$0xff]  ;;  %v176_v25 = vld [vmem:[#allocation5 + $0x38] sm:$0xff] }
  0x87   :  { %243 = vmatprep.subr.mxu1 %v174_v7  ;;  %640 = vmatpush1.msra.mxu0 %v421_v12  ;;  %v183_v19 = vld [vmem:[#allocation5 + $0x70] sm:$0xff]  ;;  %v413_v22 = vld [vmem:[#allocation8 + $0x1a0] sm:$0xff]  ;;  %v172_v29 = vld [vmem:[#allocation5 + $0x18] sm:$0xff] }
  0x88   :  { %244 = vmatpush1.msra.mxu1 %v173_v8  ;;  %641 = vmatprep.subr.mxu0 %v418_v13  ;;  %v414_v20 = vld [vmem:[#allocation8 + $0x1a8] sm:$0xff]  ;;  %v409_v26 = vld [vmem:[#allocation8 + $0x180] sm:$0xff] }
  0x89   :  { %245 = vmatprep.subr.mxu1 %v170_v9  ;;  %v179_v23 = vld [vmem:[#allocation5 + $0x50] sm:$0xff]  ;;  %642 = vmatpush1.msra.mxu0 %v417_v18  ;;  %v405_v30 = vld [vmem:[#allocation8 + $0x160] sm:$0xff] }
  0x8a   :  { %246 = vmatpush1.msra.mxu1 %v169_v10  ;;  %v410_v24 = vld [vmem:[#allocation8 + $0x188] sm:$0xff]  ;;  %643 = vmatprep.subr.mxu0 %v414_v20  ;;  %v401_v34 = vld [vmem:[#allocation8 + $0x140] sm:$0xff] }
  0x8b   :  { %2136 = vmatmul.mubr.msk.f32.vlgmr.msra.gmra.mxu1 %vm211_vm0, %v168_v14  ;;  %308 = vmatprep.subr.mxu1 %v188_v15  ;;  %v175_v27 = vld [vmem:[#allocation5 + $0x30] sm:$0xff]  ;;  %v549_v35 = vld [vmem:[#allocation8 + $0x5e0] sm:$0xff] }
  0x8c   :  { %309 = vmatpush1.msra.mxu1 %v187_v16  ;;  %350 = vmatprep.mubr.f32.mxu1 %v2537_v0  ;;  %v406_v28 = vld [vmem:[#allocation8 + $0x168] sm:$0xff]  ;;  %v397_v38 = vld [vmem:[#allocation8 + $0x120] sm:$0xff] }
  0x8d   :  { %310 = vmatprep.subr.mxu1 %v184_v17  ;;  %644 = vmatpush1.msra.mxu0 %v413_v22  ;;  %v171_v31 = vld [vmem:[#allocation5 + $0x10] sm:$0xff]  ;;  %v545_v39 = vld [vmem:[#allocation8 + $0x5c0] sm:$0xff] }
  0x8e   :  { %311 = vmatpush1.msra.mxu1 %v183_v19  ;;  %645 = vmatprep.subr.mxu0 %v410_v24  ;;  %v402_v32 = vld [vmem:[#allocation8 + $0x148] sm:$0xff]  ;;  %v393_v42 = vld [vmem:[#allocation8 + $0x100] sm:$0xff] }
  0x8f   :  { %312 = vmatprep.subr.mxu1 %v180_v21  ;;  %646 = vmatpush1.msra.mxu0 %v409_v26  ;;  %v550_v33 = vld [vmem:[#allocation8 + $0x5e8] sm:$0xff]  ;;  %v541_v43 = vld [vmem:[#allocation8 + $0x5a0] sm:$0xff] }
  0x90   :  { %313 = vmatpush1.msra.mxu1 %v179_v23  ;;  %647 = vmatprep.subr.mxu0 %v406_v28  ;;  %v398_v36 = vld [vmem:[#allocation8 + $0x128] sm:$0xff]  ;;  %v389_v46 = vld [vmem:[#allocation8 + $0xe0] sm:$0xff] }
  0x91   :  { %314 = vmatprep.subr.mxu1 %v176_v25  ;;  %648 = vmatpush1.msra.mxu0 %v405_v30  ;;  %v546_v37 = vld [vmem:[#allocation8 + $0x5c8] sm:$0xff]  ;;  %v537_v47 = vld [vmem:[#allocation8 + $0x580] sm:$0xff] }
  0x92   :  { %315 = vmatpush1.msra.mxu1 %v175_v27  ;;  %649 = vmatprep.subr.mxu0 %v402_v32  ;;  %v394_v40 = vld [vmem:[#allocation8 + $0x108] sm:$0xff]  ;;  %v385_v50 = vld [vmem:[#allocation8 + $0xc0] sm:$0xff] }
  0x93   :  { %316 = vmatprep.subr.mxu1 %v172_v29  ;;  %650 = vmatpush1.msra.mxu0 %v401_v34  ;;  %v542_v41 = vld [vmem:[#allocation8 + $0x5a8] sm:$0xff]  ;;  %v533_v51 = vld [vmem:[#allocation8 + $0x560] sm:$0xff] }
  0x94   :  { %317 = vmatpush1.msra.mxu1 %v171_v31  ;;  %651 = vmatprep.subr.mxu0 %v398_v36  ;;  %v390_v44 = vld [vmem:[#allocation8 + $0xe8] sm:$0xff]  ;;  %v381_v54 = vld [vmem:[#allocation8 + $0xa0] sm:$0xff] }
  0x95   :  { %2137 = vmatmul.mubr.msk.f32.vlgmr.msra.gmra.mxu1 %vm211_vm0, %v168_v14  ;;  %710 = vmatprep.subr.mxu1 %v550_v33  ;;  %v538_v45 = vld [vmem:[#allocation8 + $0x588] sm:$0xff]  ;;  %v529_v55 = vld [vmem:[#allocation8 + $0x540] sm:$0xff] }
  0x96   :  { %711 = vmatpush1.msra.mxu1 %v549_v35  ;;  %652 = vmatpush1.msra.mxu0 %v397_v38  ;;  %v386_v48 = vld [vmem:[#allocation8 + $0xc8] sm:$0xff]  ;;  %v377_v58 = vld [vmem:[#allocation8 + $0x80] sm:$0xff] }
  0x97   :  { %712 = vmatprep.subr.mxu1 %v546_v37  ;;  %653 = vmatprep.subr.mxu0 %v394_v40  ;;  %v534_v49 = vld [vmem:[#allocation8 + $0x568] sm:$0xff]  ;;  %v525_v59 = vld [vmem:[#allocation8 + $0x520] sm:$0xff] }
  0x98   :  { %713 = vmatpush1.msra.mxu1 %v545_v39  ;;  %654 = vmatpush1.msra.mxu0 %v393_v42  ;;  %v382_v52 = vld [vmem:[#allocation8 + $0xa8] sm:$0xff]  ;;  %v373_v62 = vld [vmem:[#allocation8 + $0x60] sm:$0xff] }
  0x99   :  { %714 = vmatprep.subr.mxu1 %v542_v41  ;;  %655 = vmatprep.subr.mxu0 %v390_v44  ;;  %v530_v53 = vld [vmem:[#allocation8 + $0x548] sm:$0xff]  ;;  %v521_v63 = vld [vmem:[#allocation8 + $0x500] sm:$0xff] }
  0x9a   :  { %715 = vmatpush1.msra.mxu1 %v541_v43  ;;  %656 = vmatpush1.msra.mxu0 %v389_v46  ;;  %v378_v56 = vld [vmem:[#allocation8 + $0x88] sm:$0xff]  ;;  %v369_v2 = vld [vmem:[#allocation8 + $0x40] sm:$0xff] }
  0x9b   :  { %716 = vmatprep.subr.mxu1 %v538_v45  ;;  %657 = vmatprep.subr.mxu0 %v386_v48  ;;  %v526_v57 = vld [vmem:[#allocation8 + $0x528] sm:$0xff]  ;;  %v517_v3 = vld [vmem:[#allocation8 + $0x4e0] sm:$0xff] }
  0x9c   :  { %717 = vmatpush1.msra.mxu1 %v537_v47  ;;  %658 = vmatpush1.msra.mxu0 %v385_v50  ;;  %v374_v60 = vld [vmem:[#allocation8 + $0x68] sm:$0xff]  ;;  %v365_v6 = vld [vmem:[#allocation8 + $0x20] sm:$0xff] }
  0x9d   :  { %718 = vmatprep.subr.mxu1 %v534_v49  ;;  %659 = vmatprep.subr.mxu0 %v382_v52  ;;  %v522_v61 = vld [vmem:[#allocation8 + $0x508] sm:$0xff]  ;;  %v513_v7 = vld [vmem:[#allocation8 + $0x4c0] sm:$0xff] }
  0x9e   :  { %719 = vmatpush1.msra.mxu1 %v533_v51  ;;  %660 = vmatpush1.msra.mxu0 %v381_v54  ;;  %v370_v0 = vld [vmem:[#allocation8 + $0x48] sm:$0xff]  ;;  %v361_v10 = vld [vmem:[#allocation8] sm:$0xff] }
  0x9f   :  { %720 = vmatprep.subr.mxu1 %v530_v53  ;;  %661 = vmatprep.subr.mxu0 %v378_v56  ;;  %v518_v1 = vld [vmem:[#allocation8 + $0x4e8] sm:$0xff]  ;;  %v509_v11 = vld [vmem:[#allocation8 + $0x4a0] sm:$0xff] }
  0xa0   :  { %721 = vmatpush1.msra.mxu1 %v529_v55  ;;  %662 = vmatpush1.msra.mxu0 %v377_v58  ;;  %v366_v4 = vld [vmem:[#allocation8 + $0x28] sm:$0xff]  ;;  %v485_v14 = vld [vmem:[#allocation8 + $0x3e0] sm:$0xff] }
  0xa1   :  { %722 = vmatprep.subr.mxu1 %v526_v57  ;;  %663 = vmatprep.subr.mxu0 %v374_v60  ;;  %v514_v5 = vld [vmem:[#allocation8 + $0x4c8] sm:$0xff]  ;;  %v505_v15 = vld [vmem:[#allocation8 + $0x480] sm:$0xff] }
  0xa2   :  { %723 = vmatpush1.msra.mxu1 %v525_v59  ;;  %664 = vmatpush1.msra.mxu0 %v373_v62  ;;  %v362_v8 = vld [vmem:[#allocation8 + $0x8] sm:$0xff]  ;;  %v481_v18 = vld [vmem:[#allocation8 + $0x3c0] sm:$0xff] }
  0xa3   :  { %724 = vmatprep.subr.mxu1 %v522_v61  ;;  %665 = vmatprep.subr.mxu0 %v370_v0  ;;  %v510_v9 = vld [vmem:[#allocation8 + $0x4a8] sm:$0xff]  ;;  %v501_v19 = vld [vmem:[#allocation8 + $0x460] sm:$0xff] }
  0xa4   :  { %725 = vmatpush1.msra.mxu1 %v521_v63  ;;  %666 = vmatpush1.msra.mxu0 %v369_v2  ;;  %v486_v12 = vld [vmem:[#allocation8 + $0x3e8] sm:$0xff]  ;;  %v477_v22 = vld [vmem:[#allocation8 + $0x3a0] sm:$0xff] }
  0xa5   :  { %726 = vmatprep.subr.mxu1 %v518_v1  ;;  %667 = vmatprep.subr.mxu0 %v366_v4  ;;  %v506_v13 = vld [vmem:[#allocation8 + $0x488] sm:$0xff]  ;;  %v497_v23 = vld [vmem:[#allocation8 + $0x440] sm:$0xff] }
  0xa6   :  { %727 = vmatpush1.msra.mxu1 %v517_v3  ;;  %668 = vmatpush1.msra.mxu0 %v365_v6  ;;  %v482_v16 = vld [vmem:[#allocation8 + $0x3c8] sm:$0xff]  ;;  %v473_v26 = vld [vmem:[#allocation8 + $0x380] sm:$0xff] }
  0xa7   :  { %728 = vmatprep.subr.mxu1 %v514_v5  ;;  %669 = vmatprep.subr.mxu0 %v362_v8  ;;  %v502_v17 = vld [vmem:[#allocation8 + $0x468] sm:$0xff]  ;;  %v493_v27 = vld [vmem:[#allocation8 + $0x420] sm:$0xff] }
  0xa8   :  { %729 = vmatpush1.msra.mxu1 %v513_v7  ;;  %670 = vmatpush1.msra.mxu0 %v361_v10  ;;  %v478_v20 = vld [vmem:[#allocation8 + $0x3a8] sm:$0xff]  ;;  %v469_v30 = vld [vmem:[#allocation8 + $0x360] sm:$0xff] }
  0xa9   :  { %730 = vmatprep.subr.mxu1 %v510_v9  ;;  %671 = vmatprep.subr.mxu0 %v486_v12  ;;  %v498_v21 = vld [vmem:[#allocation8 + $0x448] sm:$0xff]  ;;  %v489_v31 = vld [vmem:[#allocation8 + $0x400] sm:$0xff] }
  0xaa   :  { %731 = vmatpush1.msra.mxu1 %v509_v11  ;;  %672 = vmatpush2.msra.mxu0 %v485_v14  ;;  %v474_v24 = vld [vmem:[#allocation8 + $0x388] sm:$0xff]  ;;  %v465_v34 = vld [vmem:[#allocation8 + $0x340] sm:$0xff] }
  0xab   :  { %732 = vmatprep.subr.mxu1 %v506_v13  ;;  %673 = vmatprep.subr.mxu0 %v482_v16  ;;  %v494_v25 = vld [vmem:[#allocation8 + $0x428] sm:$0xff]  ;;  %v613_v35 = vld [vmem:[#allocation8 + $0x7e0] sm:$0xff]  ;;  %v424_v13 = vld [vmem:[#allocation8 + $0x1f8] sm:$0xff] }
  0xac   :  { %733 = vmatpush1.msra.mxu1 %v505_v15  ;;  %674 = vmatpush2.msra.mxu0 %v481_v18  ;;  %v470_v28 = vld [vmem:[#allocation8 + $0x368] sm:$0xff]  ;;  %v461_v38 = vld [vmem:[#allocation8 + $0x320] sm:$0xff] }
  0xad   :  { %734 = vmatprep.subr.mxu1 %v502_v17  ;;  %675 = vmatprep.subr.mxu0 %v478_v20  ;;  %v490_v29 = vld [vmem:[#allocation8 + $0x408] sm:$0xff]  ;;  %v609_v39 = vld [vmem:[#allocation8 + $0x7c0] sm:$0xff] }
  0xae   :  { %735 = vmatpush1.msra.mxu1 %v501_v19  ;;  %676 = vmatpush2.msra.mxu0 %v477_v22  ;;  %v466_v32 = vld [vmem:[#allocation8 + $0x348] sm:$0xff]  ;;  %v457_v42 = vld [vmem:[#allocation8 + $0x300] sm:$0xff] }
  0xaf   :  { %736 = vmatprep.subr.mxu1 %v498_v21  ;;  %677 = vmatprep.subr.mxu0 %v474_v24  ;;  %v614_v33 = vld [vmem:[#allocation8 + $0x7e8] sm:$0xff]  ;;  %v605_v43 = vld [vmem:[#allocation8 + $0x7a0] sm:$0xff]  ;;  %v191_v24 = vlaneseq }
  0xb0   :  { %737 = vmatpush1.msra.mxu1 %v497_v23  ;;  %678 = vmatpush2.msra.mxu0 %v473_v26  ;;  %v462_v36 = vld [vmem:[#allocation8 + $0x328] sm:$0xff]  ;;  %v453_v46 = vld [vmem:[#allocation8 + $0x2e0] sm:$0xff]  ;;  %v552_v23 = vld [vmem:[#allocation8 + $0x5f8] sm:$0xff] }
  0xb1   :  { %738 = vmatprep.subr.mxu1 %v494_v25  ;;  %679 = vmatprep.subr.mxu0 %v470_v28  ;;  %v610_v37 = vld [vmem:[#allocation8 + $0x7c8] sm:$0xff]  ;;  %v601_v47 = vld [vmem:[#allocation8 + $0x780] sm:$0xff]  ;;  %v2642_v25 = vshrl.u32 %v191_v24, 7  ;;  %v520_v24 = vld [vmem:[#allocation8 + $0x4f8] sm:$0xff] }
  0xb2   :  { %739 = vmatpush1.msra.mxu1 %v493_v27  ;;  %680 = vmatpush2.msra.mxu0 %v469_v30  ;;  %v458_v40 = vld [vmem:[#allocation8 + $0x308] sm:$0xff]  ;;  %v449_v50 = vld [vmem:[#allocation8 + $0x2c0] sm:$0xff]  ;;  %v189_v27 = vld [vmem:[#allocation7] sm:$0xf] }
  0xb3   :  { %740 = vmatprep.subr.mxu1 %v490_v29  ;;  %681 = vmatprep.subr.mxu0 %v466_v32  ;;  %v606_v41 = vld [vmem:[#allocation8 + $0x7a8] sm:$0xff]  ;;  %v597_v51 = vld [vmem:[#allocation8 + $0x760] sm:$0xff]  ;;  %v2645_v26 = vsub.s32 0, %v2642_v25  ;;  %v2648_v28 = vsub.s32 1, %v2642_v25 }
  0xb4   :  { %741 = vmatpush1.msra.mxu1 %v489_v31  ;;  %682 = vmatpush2.msra.mxu0 %v465_v34  ;;  %v454_v44 = vld [vmem:[#allocation8 + $0x2e8] sm:$0xff]  ;;  %v445_v54 = vld [vmem:[#allocation8 + $0x2a0] sm:$0xff] }
  0xb5   :  { %742 = vmatprep.subr.mxu1 %v614_v33  ;;  %683 = vmatprep.subr.mxu0 %v462_v36  ;;  %v602_v45 = vld [vmem:[#allocation8 + $0x788] sm:$0xff]  ;;  %v593_v55 = vld [vmem:[#allocation8 + $0x740] sm:$0xff]  ;;  %v194_v29 = vrot.slane %v189_v27, %v2645_v26  ;;  %v198_v30 = vrot.slane %v189_v27, %v2648_v28 }
  0xb6   :  { %743 = vmatpush2.msra.mxu1 %v613_v35  ;;  %684 = vmatpush2.msra.mxu0 %v461_v38  ;;  %v450_v48 = vld [vmem:[#allocation8 + $0x2c8] sm:$0xff]  ;;  %v441_v58 = vld [vmem:[#allocation8 + $0x280] sm:$0xff]  ;;  %v2655_v35 = vsub.s32 2, %v2642_v25 }
  0xb7   :  { %744 = vmatprep.subr.mxu1 %v610_v37  ;;  %685 = vmatprep.subr.mxu0 %v458_v40  ;;  %v598_v49 = vld [vmem:[#allocation8 + $0x768] sm:$0xff]  ;;  %v589_v59 = vld [vmem:[#allocation8 + $0x720] sm:$0xff]  ;;  %v2658_v37 = vsub.s32 3, %v2642_v25  ;;  %v420_v40 = vld [vmem:[#allocation8 + $0x1d8] sm:$0xff] }
  0xb8   :  { %745 = vmatpush2.msra.mxu1 %v609_v39  ;;  %686 = vmatpush2.msra.mxu0 %v457_v42  ;;  %v446_v52 = vld [vmem:[#allocation8 + $0x2a8] sm:$0xff]  ;;  %v437_v62 = vld [vmem:[#allocation8 + $0x260] sm:$0xff]  ;;  %v423_v39 = vld [vmem:[#allocation8 + $0x1f0] sm:$0xff] }
  0xb9   :  { %746 = vmatprep.subr.mxu1 %v606_v41  ;;  %687 = vmatprep.subr.mxu0 %v454_v44  ;;  %v594_v53 = vld [vmem:[#allocation8 + $0x748] sm:$0xff]  ;;  %v585_v63 = vld [vmem:[#allocation8 + $0x700] sm:$0xff]  ;;  %v202_v41 = vrot.slane %v189_v27, %v2655_v35  ;;  %v419_v42 = vld [vmem:[#allocation8 + $0x1d0] sm:$0xff]  ;;  %v206_v44 = vrot.slane %v189_v27, %v2658_v37 }
  0xba   :  { %747 = vmatpush2.msra.mxu1 %v605_v43  ;;  %688 = vmatpush2.msra.mxu0 %v453_v46  ;;  %v442_v56 = vld [vmem:[#allocation8 + $0x288] sm:$0xff]  ;;  %v433_v2 = vld [vmem:[#allocation8 + $0x240] sm:$0xff]  ;;  %v416_v43 = vld [vmem:[#allocation8 + $0x1b8] sm:$0xff] }
  0xbb   :  { %748 = vmatprep.subr.mxu1 %v602_v45  ;;  %689 = vmatprep.subr.mxu0 %v450_v48  ;;  %v590_v57 = vld [vmem:[#allocation8 + $0x728] sm:$0xff]  ;;  %v581_v3 = vld [vmem:[#allocation8 + $0x6e0] sm:$0xff]  ;;  %v415_v46 = vld [vmem:[#allocation8 + $0x1b0] sm:$0xff] }
  0xbc   :  { %749 = vmatpush2.msra.mxu1 %v601_v47  ;;  %690 = vmatpush2.msra.mxu0 %v449_v50  ;;  %v438_v60 = vld [vmem:[#allocation8 + $0x268] sm:$0xff]  ;;  %v429_v6 = vld [vmem:[#allocation8 + $0x220] sm:$0xff]  ;;  %v412_v47 = vld [vmem:[#allocation8 + $0x198] sm:$0xff] }
  0xbd   :  { %750 = vmatprep.subr.mxu1 %v598_v49  ;;  %691 = vmatprep.subr.mxu0 %v446_v52  ;;  %v586_v61 = vld [vmem:[#allocation8 + $0x708] sm:$0xff]  ;;  %v577_v7 = vld [vmem:[#allocation8 + $0x6c0] sm:$0xff]  ;;  %v411_v50 = vld [vmem:[#allocation8 + $0x190] sm:$0xff] }
  0xbe   :  { %751 = vmatpush2.msra.mxu1 %v597_v51  ;;  %692 = vmatpush2.msra.mxu0 %v445_v54  ;;  %v434_v0 = vld [vmem:[#allocation8 + $0x248] sm:$0xff]  ;;  %v425_v10 = vld [vmem:[#allocation8 + $0x200] sm:$0xff]  ;;  %v408_v52 = vld [vmem:[#allocation8 + $0x178] sm:$0xff] }
  0xbf   :  { %752 = vmatprep.subr.mxu1 %v594_v53  ;;  %693 = vmatprep.subr.mxu0 %v442_v56  ;;  %v582_v1 = vld [vmem:[#allocation8 + $0x6e8] sm:$0xff]  ;;  %v573_v11 = vld [vmem:[#allocation8 + $0x6a0] sm:$0xff]  ;;  %v407_v53 = vld [vmem:[#allocation8 + $0x170] sm:$0xff] }
  0xc0   :  { %753 = vmatpush2.msra.mxu1 %v593_v55  ;;  %694 = vmatpush2.msra.mxu0 %v441_v58  ;;  %v430_v4 = vld [vmem:[#allocation8 + $0x228] sm:$0xff]  ;;  %v569_v14 = vld [vmem:[#allocation8 + $0x680] sm:$0xff]  ;;  %v404_v55 = vld [vmem:[#allocation8 + $0x158] sm:$0xff] }
  0xc1   :  { %754 = vmatprep.subr.mxu1 %v590_v57  ;;  %695 = vmatprep.subr.mxu0 %v438_v60  ;;  %v578_v5 = vld [vmem:[#allocation8 + $0x6c8] sm:$0xff]  ;;  %v565_v16 = vld [vmem:[#allocation8 + $0x660] sm:$0xff]  ;;  %v403_v57 = vld [vmem:[#allocation8 + $0x150] sm:$0xff] }
  0xc2   :  { %755 = vmatpush2.msra.mxu1 %v589_v59  ;;  %696 = vmatpush2.msra.mxu0 %v437_v62  ;;  %v426_v8 = vld [vmem:[#allocation8 + $0x208] sm:$0xff]  ;;  %v561_v18 = vld [vmem:[#allocation8 + $0x640] sm:$0xff]  ;;  %v551_v58 = vld [vmem:[#allocation8 + $0x5f0] sm:$0xff] }
  0xc3   :  { %756 = vmatprep.subr.mxu1 %v586_v61  ;;  %697 = vmatprep.subr.mxu0 %v434_v0  ;;  %v574_v9 = vld [vmem:[#allocation8 + $0x6a8] sm:$0xff]  ;;  %v557_v20 = vld [vmem:[#allocation8 + $0x620] sm:$0xff]  ;;  %v400_v59 = vld [vmem:[#allocation8 + $0x138] sm:$0xff] }
  0xc4   :  { %757 = vmatpush2.msra.mxu1 %v585_v63  ;;  %698 = vmatpush2.msra.mxu0 %v433_v2  ;;  %v570_v12 = vld [vmem:[#allocation8 + $0x688] sm:$0xff]  ;;  %v553_v22 = vld [vmem:[#allocation8 + $0x600] sm:$0xff]  ;;  %v548_v60 = vld [vmem:[#allocation8 + $0x5d8] sm:$0xff] }
  0xc5   :  { %758 = vmatprep.subr.mxu1 %v582_v1  ;;  %699 = vmatprep.subr.mxu0 %v430_v4  ;;  %v566_v15 = vld [vmem:[#allocation8 + $0x668] sm:$0xff]  ;;  %v399_v61 = vld [vmem:[#allocation8 + $0x130] sm:$0xff]  ;;  %v396_v63 = vld [vmem:[#allocation8 + $0x118] sm:$0xff] }
  0xc6   :  { %759 = vmatpush2.msra.mxu1 %v581_v3  ;;  %700 = vmatpush2.msra.mxu0 %v429_v6  ;;  %v562_v17 = vld [vmem:[#allocation8 + $0x648] sm:$0xff]  ;;  %v547_v62 = vld [vmem:[#allocation8 + $0x5d0] sm:$0xff]  ;;  %v544_v0 = vld [vmem:[#allocation8 + $0x5b8] sm:$0xff] }
  0xc7   :  { %760 = vmatprep.subr.mxu1 %v578_v5  ;;  %701 = vmatprep.subr.mxu0 %v426_v8  ;;  %v558_v19 = vld [vmem:[#allocation8 + $0x628] sm:$0xff]  ;;  %v395_v1 = vld [vmem:[#allocation8 + $0x110] sm:$0xff]  ;;  %v392_v3 = vld [vmem:[#allocation8 + $0xf8] sm:$0xff] }
  0xc8   :  { %761 = vmatpush2.msra.mxu1 %v577_v7  ;;  %702 = vmatpush2.msra.mxu0 %v425_v10  ;;  %v554_v21 = vld [vmem:[#allocation8 + $0x608] sm:$0xff]  ;;  %v543_v2 = vld [vmem:[#allocation8 + $0x5b0] sm:$0xff]  ;;  %v540_v4 = vld [vmem:[#allocation8 + $0x598] sm:$0xff] }
  0xc9   :  { %762 = vmatprep.subr.mxu1 %v574_v9  ;;  %781 = vmatprep.subr.mxu0 %v424_v13  ;;  %v391_v5 = vld [vmem:[#allocation8 + $0xf0] sm:$0xff]  ;;  %v388_v7 = vld [vmem:[#allocation8 + $0xd8] sm:$0xff] }
  0xca   :  { %763 = vmatpush2.msra.mxu1 %v573_v11  ;;  %v539_v6 = vld [vmem:[#allocation8 + $0x590] sm:$0xff]  ;;  %v536_v8 = vld [vmem:[#allocation8 + $0x578] sm:$0xff] }
  0xcb   :  { %764 = vmatprep.subr.mxu1 %v570_v12  ;;  %v387_v9 = vld [vmem:[#allocation8 + $0xd0] sm:$0xff]  ;;  %v384_v11 = vld [vmem:[#allocation8 + $0xb8] sm:$0xff] }
  0xcc   :  { %765 = vmatpush2.msra.mxu1 %v569_v14  ;;  %v535_v10 = vld [vmem:[#allocation8 + $0x570] sm:$0xff]  ;;  %v532_v12 = vld [vmem:[#allocation8 + $0x558] sm:$0xff] }
  0xcd   :  { %766 = vmatprep.subr.mxu1 %v566_v15  ;;  %v383_v13 = vld [vmem:[#allocation8 + $0xb0] sm:$0xff]  ;;  %v380_v15 = vld [vmem:[#allocation8 + $0x98] sm:$0xff] }
  0xce   :  { %767 = vmatpush2.msra.mxu1 %v565_v16  ;;  %v531_v14 = vld [vmem:[#allocation8 + $0x550] sm:$0xff]  ;;  %v528_v16 = vld [vmem:[#allocation8 + $0x538] sm:$0xff] }
  0xcf   :  { %768 = vmatprep.subr.mxu1 %v562_v17  ;;  %v379_v17 = vld [vmem:[#allocation8 + $0x90] sm:$0xff] }
  0xd0   :  { %769 = vmatpush2.msra.mxu1 %v561_v18  ;;  %v527_v18 = vld [vmem:[#allocation8 + $0x530] sm:$0xff] }
  0xd1   :  { %770 = vmatprep.subr.mxu1 %v558_v19  ;;  %v376_v19 = vld [vmem:[#allocation8 + $0x78] sm:$0xff]  ;;  %v371_v27 = vld [vmem:[#allocation8 + $0x50] sm:$0xff] }
  0xd2   :  { %771 = vmatpush2.msra.mxu1 %v557_v20  ;;  %v524_v20 = vld [vmem:[#allocation8 + $0x518] sm:$0xff] }
  0xd3   :  { %772 = vmatprep.subr.mxu1 %v554_v21  ;;  %v375_v21 = vld [vmem:[#allocation8 + $0x70] sm:$0xff] }
  0xd4   :  { %773 = vmatpush2.msra.mxu1 %v553_v22  ;;  %v523_v22 = vld [vmem:[#allocation8 + $0x510] sm:$0xff] }
  0xd5   :  { %852 = vmatprep.subr.mxu1 %v552_v23  ;;  %v372_v23 = vld [vmem:[#allocation8 + $0x58] sm:$0xff] }
 0x14b   :  { %v281_v31 = vpop.f32.mrf.mxu1 }
 0x14c   :  { %v2652_v32 = vadd.f32 %v281_v31, %v194_v29  ;;  %v519_v29 = vld [vmem:[#allocation8 + $0x4f0] sm:$0xff]  ;;  %v516_v31 = vld [vmem:[#allocation8 + $0x4d8] sm:$0xff] }
 0x14d   :  { %v283_v33 = vpop.f32.mrf.mxu1 }
 0x14e   :  { %v284_v34 = vadd.f32 %v283_v33, %v198_v30  ;;  %v357_v38 = vmax.f32 %v2652_v32, 0.0  ;;  %v368_v30 = vld [vmem:[#allocation8 + $0x38] sm:$0xff]  ;;  %v367_v33 = vld [vmem:[#allocation8 + $0x30] sm:$0xff] }
 0x14f   :  { %v559_v32 = vld [vmem:[#allocation8 + $0x630] sm:$0xff] }
 0x150   :  { %v358_v36 = vmax.f32 %v284_v34, 0.0  ;;  %v515_v34 = vld [vmem:[#allocation8 + $0x4d0] sm:$0xff] }
 0x152   :  { %703 = vmatprep.mubr.f32.mxu0 %v358_v36 }
 0x153   :  { %704 = vmatmul.mubr.f32.vlgmr.msra.gmra.mxu0 %v357_v38 }
 0x154   :  { %782 = vmatpush1.msra.mxu0 %v423_v39  ;;  %845 = vmatprep.mubr.f32.mxu0 %v358_v36  ;;  %v364_v36 = vld [vmem:[#allocation8 + $0x18] sm:$0xff] }
 0x155   :  { %783 = vmatprep.subr.mxu0 %v420_v40  ;;  %v352_v45 = vpop.f32.mrf.mxu1  ;;  %v512_v39 = vld [vmem:[#allocation8 + $0x4b8] sm:$0xff]  ;;  %v363_v40 = vld [vmem:[#allocation8 + $0x10] sm:$0xff] }
 0x156   :  { %784 = vmatpush1.msra.mxu0 %v419_v42  ;;  %v2665_v48 = vadd.f32 %v352_v45, %v202_v41  ;;  %v511_v41 = vld [vmem:[#allocation8 + $0x4b0] sm:$0xff]  ;;  %v488_v42 = vld [vmem:[#allocation8 + $0x3f8] sm:$0xff] }
 0x157   :  { %785 = vmatprep.subr.mxu0 %v416_v43  ;;  %v354_v49 = vpop.f32.mrf.mxu1  ;;  %v508_v43 = vld [vmem:[#allocation8 + $0x498] sm:$0xff]  ;;  %v507_v45 = vld [vmem:[#allocation8 + $0x490] sm:$0xff] }
 0x158   :  { %v355_v51 = vadd.f32 %v354_v49, %v206_v44  ;;  %786 = vmatpush1.msra.mxu0 %v415_v46  ;;  %v359_v56 = vmax.f32 %v2665_v48, 0.0  ;;  %v487_v44 = vld [vmem:[#allocation8 + $0x3f0] sm:$0xff]  ;;  %v484_v46 = vld [vmem:[#allocation8 + $0x3d8] sm:$0xff] }
 0x159   :  { %787 = vmatprep.subr.mxu0 %v412_v47  ;;  %v504_v47 = vld [vmem:[#allocation8 + $0x478] sm:$0xff]  ;;  %v483_v49 = vld [vmem:[#allocation8 + $0x3d0] sm:$0xff] }
 0x15a   :  { %v360_v54 = vmax.f32 %v355_v51, 0.0  ;;  %788 = vmatpush1.msra.mxu0 %v411_v50  ;;  %v503_v50 = vld [vmem:[#allocation8 + $0x470] sm:$0xff]  ;;  %v480_v51 = vld [vmem:[#allocation8 + $0x3b8] sm:$0xff] }
 0x15b   :  { %789 = vmatprep.subr.mxu0 %v408_v52  ;;  %v500_v52 = vld [vmem:[#allocation8 + $0x458] sm:$0xff] }
 0x15c   :  { %790 = vmatpush1.msra.mxu0 %v407_v53  ;;  %774 = vmatprep.mubr.f32.mxu1 %v360_v54  ;;  %v479_v53 = vld [vmem:[#allocation8 + $0x3b0] sm:$0xff] }
 0x15d   :  { %791 = vmatprep.subr.mxu0 %v404_v55  ;;  %775 = vmatmul.mubr.f32.vlgmr.msra.gmra.mxu1 %v359_v56  ;;  %v476_v55 = vld [vmem:[#allocation8 + $0x398] sm:$0xff] }
 0x15e   :  { %792 = vmatpush1.msra.mxu0 %v403_v57  ;;  %853 = vmatpush1.msra.mxu1 %v551_v58  ;;  %v496_v57 = vld [vmem:[#allocation8 + $0x438] sm:$0xff]  ;;  %v475_v58 = vld [vmem:[#allocation8 + $0x390] sm:$0xff] }
 0x15f   :  { %793 = vmatprep.subr.mxu0 %v400_v59  ;;  %854 = vmatprep.subr.mxu1 %v548_v60  ;;  %v495_v59 = vld [vmem:[#allocation8 + $0x430] sm:$0xff]  ;;  %v472_v60 = vld [vmem:[#allocation8 + $0x378] sm:$0xff] }
 0x160   :  { %916 = vmatprep.mubr.f32.mxu1 %v360_v54  ;;  %794 = vmatpush1.msra.mxu0 %v399_v61  ;;  %v499_v54 = vld [vmem:[#allocation8 + $0x450] sm:$0xff]  ;;  %v492_v61 = vld [vmem:[#allocation8 + $0x418] sm:$0xff] }
 0x161   :  { %855 = vmatpush1.msra.mxu1 %v547_v62  ;;  %795 = vmatprep.subr.mxu0 %v396_v63  ;;  %v471_v62 = vld [vmem:[#allocation8 + $0x370] sm:$0xff] }
 0x162   :  { %856 = vmatprep.subr.mxu1 %v544_v0  ;;  %796 = vmatpush1.msra.mxu0 %v395_v1  ;;  %v491_v63 = vld [vmem:[#allocation8 + $0x410] sm:$0xff]  ;;  %v468_v0 = vld [vmem:[#allocation8 + $0x358] sm:$0xff] }
 0x163   :  { %857 = vmatpush1.msra.mxu1 %v543_v2  ;;  %797 = vmatprep.subr.mxu0 %v392_v3  ;;  %v616_v1 = vld [vmem:[#allocation8 + $0x7f8] sm:$0xff]  ;;  %v467_v2 = vld [vmem:[#allocation8 + $0x350] sm:$0xff] }
 0x164   :  { %858 = vmatprep.subr.mxu1 %v540_v4  ;;  %798 = vmatpush1.msra.mxu0 %v391_v5  ;;  %v615_v3 = vld [vmem:[#allocation8 + $0x7f0] sm:$0xff]  ;;  %v464_v4 = vld [vmem:[#allocation8 + $0x338] sm:$0xff] }
 0x165   :  { %859 = vmatpush1.msra.mxu1 %v539_v6  ;;  %799 = vmatprep.subr.mxu0 %v388_v7  ;;  %v612_v5 = vld [vmem:[#allocation8 + $0x7d8] sm:$0xff]  ;;  %v463_v6 = vld [vmem:[#allocation8 + $0x330] sm:$0xff] }
 0x166   :  { %860 = vmatprep.subr.mxu1 %v536_v8  ;;  %800 = vmatpush1.msra.mxu0 %v387_v9  ;;  %v611_v7 = vld [vmem:[#allocation8 + $0x7d0] sm:$0xff]  ;;  %v460_v8 = vld [vmem:[#allocation8 + $0x318] sm:$0xff] }
 0x167   :  { %861 = vmatpush1.msra.mxu1 %v535_v10  ;;  %801 = vmatprep.subr.mxu0 %v384_v11  ;;  %v608_v9 = vld [vmem:[#allocation8 + $0x7b8] sm:$0xff]  ;;  %v459_v10 = vld [vmem:[#allocation8 + $0x310] sm:$0xff] }
 0x168   :  { %862 = vmatprep.subr.mxu1 %v532_v12  ;;  %802 = vmatpush1.msra.mxu0 %v383_v13  ;;  %v607_v11 = vld [vmem:[#allocation8 + $0x7b0] sm:$0xff]  ;;  %v456_v12 = vld [vmem:[#allocation8 + $0x2f8] sm:$0xff] }
 0x169   :  { %863 = vmatpush1.msra.mxu1 %v531_v14  ;;  %803 = vmatprep.subr.mxu0 %v380_v15  ;;  %v604_v13 = vld [vmem:[#allocation8 + $0x798] sm:$0xff]  ;;  %v455_v14 = vld [vmem:[#allocation8 + $0x2f0] sm:$0xff] }
 0x16a   :  { %864 = vmatprep.subr.mxu1 %v528_v16  ;;  %804 = vmatpush1.msra.mxu0 %v379_v17  ;;  %v603_v15 = vld [vmem:[#allocation8 + $0x790] sm:$0xff]  ;;  %v452_v16 = vld [vmem:[#allocation8 + $0x2d8] sm:$0xff] }
 0x16b   :  { %865 = vmatpush1.msra.mxu1 %v527_v18  ;;  %805 = vmatprep.subr.mxu0 %v376_v19  ;;  %v600_v17 = vld [vmem:[#allocation8 + $0x778] sm:$0xff]  ;;  %v451_v18 = vld [vmem:[#allocation8 + $0x2d0] sm:$0xff] }
 0x16c   :  { %866 = vmatprep.subr.mxu1 %v524_v20  ;;  %806 = vmatpush1.msra.mxu0 %v375_v21  ;;  %v599_v19 = vld [vmem:[#allocation8 + $0x770] sm:$0xff]  ;;  %v448_v20 = vld [vmem:[#allocation8 + $0x2b8] sm:$0xff] }
 0x16d   :  { %867 = vmatpush1.msra.mxu1 %v523_v22  ;;  %807 = vmatprep.subr.mxu0 %v372_v23  ;;  %v596_v21 = vld [vmem:[#allocation8 + $0x758] sm:$0xff]  ;;  %v447_v22 = vld [vmem:[#allocation8 + $0x2b0] sm:$0xff] }
 0x16e   :  { %868 = vmatprep.subr.mxu1 %v520_v24  ;;  %808 = vmatpush1.msra.mxu0 %v371_v27  ;;  %v595_v23 = vld [vmem:[#allocation8 + $0x750] sm:$0xff]  ;;  %v444_v24 = vld [vmem:[#allocation8 + $0x298] sm:$0xff] }
 0x16f   :  { %869 = vmatpush1.msra.mxu1 %v519_v29  ;;  %809 = vmatprep.subr.mxu0 %v368_v30  ;;  %v592_v27 = vld [vmem:[#allocation8 + $0x738] sm:$0xff]  ;;  %v443_v29 = vld [vmem:[#allocation8 + $0x290] sm:$0xff] }
 0x170   :  { %870 = vmatprep.subr.mxu1 %v516_v31  ;;  %810 = vmatpush1.msra.mxu0 %v367_v33  ;;  %v591_v30 = vld [vmem:[#allocation8 + $0x730] sm:$0xff]  ;;  %v440_v31 = vld [vmem:[#allocation8 + $0x278] sm:$0xff] }
 0x171   :  { %871 = vmatpush1.msra.mxu1 %v515_v34  ;;  %811 = vmatprep.subr.mxu0 %v364_v36  ;;  %v588_v33 = vld [vmem:[#allocation8 + $0x718] sm:$0xff]  ;;  %v439_v34 = vld [vmem:[#allocation8 + $0x270] sm:$0xff] }
 0x172   :  { %872 = vmatprep.subr.mxu1 %v512_v39  ;;  %812 = vmatpush1.msra.mxu0 %v363_v40  ;;  %v587_v36 = vld [vmem:[#allocation8 + $0x710] sm:$0xff]  ;;  %v436_v39 = vld [vmem:[#allocation8 + $0x258] sm:$0xff] }
 0x173   :  { %873 = vmatpush1.msra.mxu1 %v511_v41  ;;  %813 = vmatprep.subr.mxu0 %v488_v42  ;;  %v584_v40 = vld [vmem:[#allocation8 + $0x6f8] sm:$0xff]  ;;  %v435_v41 = vld [vmem:[#allocation8 + $0x250] sm:$0xff] }
 0x174   :  { %874 = vmatprep.subr.mxu1 %v508_v43  ;;  %814 = vmatpush2.msra.mxu0 %v487_v44  ;;  %v583_v42 = vld [vmem:[#allocation8 + $0x6f0] sm:$0xff]  ;;  %v432_v43 = vld [vmem:[#allocation8 + $0x238] sm:$0xff] }
 0x175   :  { %875 = vmatpush1.msra.mxu1 %v507_v45  ;;  %815 = vmatprep.subr.mxu0 %v484_v46  ;;  %v580_v44 = vld [vmem:[#allocation8 + $0x6d8] sm:$0xff]  ;;  %v431_v45 = vld [vmem:[#allocation8 + $0x230] sm:$0xff] }
 0x176   :  { %876 = vmatprep.subr.mxu1 %v504_v47  ;;  %816 = vmatpush2.msra.mxu0 %v483_v49  ;;  %v579_v46 = vld [vmem:[#allocation8 + $0x6d0] sm:$0xff]  ;;  %v428_v47 = vld [vmem:[#allocation8 + $0x218] sm:$0xff] }
 0x177   :  { %877 = vmatpush1.msra.mxu1 %v503_v50  ;;  %817 = vmatprep.subr.mxu0 %v480_v51  ;;  %v576_v49 = vld [vmem:[#allocation8 + $0x6b8] sm:$0xff]  ;;  %v427_v50 = vld [vmem:[#allocation8 + $0x210] sm:$0xff] }
 0x178   :  { %878 = vmatprep.subr.mxu1 %v500_v52  ;;  %818 = vmatpush2.msra.mxu0 %v479_v53  ;;  %v575_v51 = vld [vmem:[#allocation8 + $0x6b0] sm:$0xff]  ;;  %v572_v52 = vld [vmem:[#allocation8 + $0x698] sm:$0xff]  ;;  %v1003_v53 = vld [vmem:[#allocation11 + $0x260] sm:$0xff] }
 0x179   :  { %879 = vmatpush1.msra.mxu1 %v499_v54  ;;  %819 = vmatprep.subr.mxu0 %v476_v55  ;;  %v571_v54 = vld [vmem:[#allocation8 + $0x690] sm:$0xff]  ;;  %v1002_v55 = vld [vmem:[#allocation11 + $0x258] sm:$0xff] }
 0x17a   :  { %880 = vmatprep.subr.mxu1 %v496_v57  ;;  %820 = vmatpush2.msra.mxu0 %v475_v58  ;;  %v568_v57 = vld [vmem:[#allocation8 + $0x678] sm:$0xff] }
 0x17b   :  { %881 = vmatpush1.msra.mxu1 %v495_v59  ;;  %821 = vmatprep.subr.mxu0 %v472_v60  ;;  %v998_v58 = vld [vmem:[#allocation11 + $0x238] sm:$0xff]  ;;  %v567_v59 = vld [vmem:[#allocation8 + $0x670] sm:$0xff] }
 0x17c   :  { %882 = vmatprep.subr.mxu1 %v492_v61  ;;  %822 = vmatpush2.msra.mxu0 %v471_v62  ;;  %v997_v60 = vld [vmem:[#allocation11 + $0x230] sm:$0xff] }
 0x17d   :  { %883 = vmatpush1.msra.mxu1 %v491_v63  ;;  %823 = vmatprep.subr.mxu0 %v468_v0  ;;  %v564_v61 = vld [vmem:[#allocation8 + $0x658] sm:$0xff]  ;;  %v563_v63 = vld [vmem:[#allocation8 + $0x650] sm:$0xff] }
 0x17e   :  { %884 = vmatprep.subr.mxu1 %v616_v1  ;;  %824 = vmatpush2.msra.mxu0 %v467_v2  ;;  %v993_v62 = vld [vmem:[#allocation11 + $0x210] sm:$0xff]  ;;  %v992_v0 = vld [vmem:[#allocation11 + $0x208] sm:$0xff] }
 0x17f   :  { %885 = vmatpush2.msra.mxu1 %v615_v3  ;;  %825 = vmatprep.subr.mxu0 %v464_v4  ;;  %v560_v1 = vld [vmem:[#allocation8 + $0x638] sm:$0xff]  ;;  %v988_v2 = vld [vmem:[#allocation11 + $0x1e8] sm:$0xff]  ;;  %v983_v4 = vld [vmem:[#allocation11 + $0x1c0] sm:$0xff] }
 0x180   :  { %886 = vmatprep.subr.mxu1 %v612_v5  ;;  %826 = vmatpush2.msra.mxu0 %v463_v6  ;;  %v556_v3 = vld [vmem:[#allocation8 + $0x618] sm:$0xff]  ;;  %v555_v5 = vld [vmem:[#allocation8 + $0x610] sm:$0xff] }
 0x181   :  { %887 = vmatpush2.msra.mxu1 %v611_v7  ;;  %827 = vmatprep.subr.mxu0 %v460_v8  ;;  %v982_v6 = vld [vmem:[#allocation11 + $0x1b8] sm:$0xff]  ;;  %v977_v8 = vld [vmem:[#allocation11 + $0x190] sm:$0xff] }
 0x182   :  { %888 = vmatprep.subr.mxu1 %v608_v9  ;;  %828 = vmatpush2.msra.mxu0 %v459_v10  ;;  %v978_v7 = vld [vmem:[#allocation11 + $0x198] sm:$0xff]  ;;  %v973_v9 = vld [vmem:[#allocation11 + $0x170] sm:$0xff]  ;;  %v972_v10 = vld [vmem:[#allocation11 + $0x168] sm:$0xff] }
 0x183   :  { %889 = vmatpush2.msra.mxu1 %v607_v11  ;;  %829 = vmatprep.subr.mxu0 %v456_v12  ;;  %v968_v11 = vld [vmem:[#allocation11 + $0x148] sm:$0xff]  ;;  %v967_v12 = vld [vmem:[#allocation11 + $0x140] sm:$0xff]  ;;  %v953_v48 = vld [vmem:[#allocation11 + $0xd0] sm:$0xff] }
 0x184   :  { %890 = vmatprep.subr.mxu1 %v604_v13  ;;  %830 = vmatpush2.msra.mxu0 %v455_v14  ;;  %v963_v13 = vld [vmem:[#allocation11 + $0x120] sm:$0xff]  ;;  %v962_v14 = vld [vmem:[#allocation11 + $0x118] sm:$0xff] }
 0x185   :  { %891 = vmatpush2.msra.mxu1 %v603_v15  ;;  %831 = vmatprep.subr.mxu0 %v452_v16  ;;  %v958_v15 = vld [vmem:[#allocation11 + $0xf8] sm:$0xff]  ;;  %v1163_v16 = vld [vmem:[#allocation11 + $0x760] sm:$0xff] }
 0x186   :  { %892 = vmatprep.subr.mxu1 %v600_v17  ;;  %832 = vmatpush2.msra.mxu0 %v451_v18  ;;  %v957_v17 = vld [vmem:[#allocation11 + $0xf0] sm:$0xff]  ;;  %v1162_v18 = vld [vmem:[#allocation11 + $0x758] sm:$0xff] }
 0x187   :  { %893 = vmatpush2.msra.mxu1 %v599_v19  ;;  %833 = vmatprep.subr.mxu0 %v448_v20  ;;  %v952_v19 = vld [vmem:[#allocation11 + $0xc8] sm:$0xff]  ;;  %v1157_v20 = vld [vmem:[#allocation11 + $0x730] sm:$0xff] }
 0x188   :  { %894 = vmatprep.subr.mxu1 %v596_v21  ;;  %834 = vmatpush2.msra.mxu0 %v447_v22  ;;  %v948_v21 = vld [vmem:[#allocation11 + $0xa8] sm:$0xff]  ;;  %v1153_v22 = vld [vmem:[#allocation11 + $0x710] sm:$0xff] }
 0x189   :  { %895 = vmatpush2.msra.mxu1 %v595_v23  ;;  %835 = vmatprep.subr.mxu0 %v444_v24  ;;  %v947_v23 = vld [vmem:[#allocation11 + $0xa0] sm:$0xff]  ;;  %v1152_v24 = vld [vmem:[#allocation11 + $0x708] sm:$0xff] }
 0x18a   :  { %896 = vmatprep.subr.mxu1 %v592_v27  ;;  %836 = vmatpush2.msra.mxu0 %v443_v29  ;;  %v943_v27 = vld [vmem:[#allocation11 + $0x80] sm:$0xff]  ;;  %v1148_v29 = vld [vmem:[#allocation11 + $0x6e8] sm:$0xff] }
 0x18b   :  { %897 = vmatpush2.msra.mxu1 %v591_v30  ;;  %837 = vmatprep.subr.mxu0 %v440_v31  ;;  %v942_v30 = vld [vmem:[#allocation11 + $0x78] sm:$0xff]  ;;  %v1147_v31 = vld [vmem:[#allocation11 + $0x6e0] sm:$0xff] }
 0x18c   :  { %898 = vmatprep.subr.mxu1 %v588_v33  ;;  %838 = vmatpush2.msra.mxu0 %v439_v34  ;;  %v938_v33 = vld [vmem:[#allocation11 + $0x58] sm:$0xff]  ;;  %v1143_v34 = vld [vmem:[#allocation11 + $0x6c0] sm:$0xff] }
 0x18d   :  { %899 = vmatpush2.msra.mxu1 %v587_v36  ;;  %839 = vmatprep.subr.mxu0 %v436_v39  ;;  %v937_v36 = vld [vmem:[#allocation11 + $0x50] sm:$0xff]  ;;  %v1142_v39 = vld [vmem:[#allocation11 + $0x6b8] sm:$0xff] }
 0x18e   :  { %900 = vmatprep.subr.mxu1 %v584_v40  ;;  %840 = vmatpush2.msra.mxu0 %v435_v41  ;;  %v933_v40 = vld [vmem:[#allocation11 + $0x30] sm:$0xff]  ;;  %v1138_v41 = vld [vmem:[#allocation11 + $0x698] sm:$0xff] }
 0x18f   :  { %901 = vmatpush2.msra.mxu1 %v583_v42  ;;  %841 = vmatprep.subr.mxu0 %v432_v43  ;;  %v932_v42 = vld [vmem:[#allocation11 + $0x28] sm:$0xff]  ;;  %v1137_v43 = vld [vmem:[#allocation11 + $0x690] sm:$0xff] }
 0x190   :  { %902 = vmatprep.subr.mxu1 %v580_v44  ;;  %842 = vmatpush2.msra.mxu0 %v431_v45  ;;  %v928_v44 = vld [vmem:[#allocation11 + $0x8] sm:$0xff]  ;;  %v1133_v45 = vld [vmem:[#allocation11 + $0x670] sm:$0xff] }
 0x191   :  { %903 = vmatpush2.msra.mxu1 %v579_v46  ;;  %843 = vmatprep.subr.mxu0 %v428_v47  ;;  %v927_v46 = vld [vmem:[#allocation11] sm:$0xff]  ;;  %v1132_v47 = vld [vmem:[#allocation11 + $0x668] sm:$0xff] }
 0x192   :  { %904 = vmatprep.subr.mxu1 %v576_v49  ;;  %844 = vmatpush2.msra.mxu0 %v427_v50  ;;  %v1083_v49 = vld [vmem:[#allocation11 + $0x4e0] sm:$0xff]  ;;  %v1128_v50 = vld [vmem:[#allocation11 + $0x648] sm:$0xff] }
 0x193   :  { %905 = vmatpush2.msra.mxu1 %v575_v51  ;;  %846 = vmatmul.mubr.f32.vlgmr.msra.gmra.mxu0 %v357_v38  ;;  %v987_v38 = vld [vmem:[#allocation11 + $0x1e0] sm:$0xff]  ;;  %v1082_v51 = vld [vmem:[#allocation11 + $0x4d8] sm:$0xff] }
 0x194   :  { %906 = vmatprep.subr.mxu1 %v572_v52  ;;  %1274 = vmatprep.subr.mxu0 %v1003_v53  ;;  %v1127_v52 = vld [vmem:[#allocation11 + $0x640] sm:$0xff]  ;;  %v1078_v53 = vld [vmem:[#allocation11 + $0x4b8] sm:$0xff] }
 0x195   :  { %907 = vmatpush2.msra.mxu1 %v571_v54  ;;  %1275 = vmatpush1.msra.mxu0 %v1002_v55  ;;  %v1123_v54 = vld [vmem:[#allocation11 + $0x620] sm:$0xff]  ;;  %v1077_v55 = vld [vmem:[#allocation11 + $0x4b0] sm:$0xff] }
 0x196   :  { %908 = vmatprep.subr.mxu1 %v568_v57  ;;  %1276 = vmatprep.subr.mxu0 %v998_v58  ;;  %v1122_v57 = vld [vmem:[#allocation11 + $0x618] sm:$0xff]  ;;  %v1073_v58 = vld [vmem:[#allocation11 + $0x490] sm:$0xff] }
 0x197   :  { %909 = vmatpush2.msra.mxu1 %v567_v59  ;;  %1277 = vmatpush1.msra.mxu0 %v997_v60  ;;  %v1118_v59 = vld [vmem:[#allocation11 + $0x5f8] sm:$0xff]  ;;  %v1072_v60 = vld [vmem:[#allocation11 + $0x488] sm:$0xff] }
 0x198   :  { %910 = vmatprep.subr.mxu1 %v564_v61  ;;  %1278 = vmatprep.subr.mxu0 %v993_v62  ;;  %v1117_v61 = vld [vmem:[#allocation11 + $0x5f0] sm:$0xff]  ;;  %v1068_v62 = vld [vmem:[#allocation11 + $0x468] sm:$0xff] }
 0x199   :  { %911 = vmatpush2.msra.mxu1 %v563_v63  ;;  %1279 = vmatpush1.msra.mxu0 %v992_v0  ;;  %v1113_v63 = vld [vmem:[#allocation11 + $0x5d0] sm:$0xff]  ;;  %v1067_v0 = vld [vmem:[#allocation11 + $0x460] sm:$0xff] }
 0x19a   :  { %912 = vmatprep.subr.mxu1 %v560_v1  ;;  %1280 = vmatprep.subr.mxu0 %v988_v2  ;;  %v1112_v1 = vld [vmem:[#allocation11 + $0x5c8] sm:$0xff]  ;;  %v1063_v2 = vld [vmem:[#allocation11 + $0x440] sm:$0xff] }
 0x19b   :  { %913 = vmatpush2.msra.mxu1 %v559_v32  ;;  %1281 = vmatpush1.msra.mxu0 %v987_v38  ;;  %v1108_v32 = vld [vmem:[#allocation11 + $0x5a8] sm:$0xff]  ;;  %v1062_v38 = vld [vmem:[#allocation11 + $0x438] sm:$0xff] }
 0x19c   :  { %914 = vmatprep.subr.mxu1 %v556_v3  ;;  %1282 = vmatprep.subr.mxu0 %v983_v4  ;;  %v1107_v3 = vld [vmem:[#allocation11 + $0x5a0] sm:$0xff]  ;;  %v1058_v4 = vld [vmem:[#allocation11 + $0x418] sm:$0xff] }
 0x19d   :  { %915 = vmatpush2.msra.mxu1 %v555_v5  ;;  %1283 = vmatpush1.msra.mxu0 %v982_v6  ;;  %v1103_v5 = vld [vmem:[#allocation11 + $0x580] sm:$0xff]  ;;  %v1057_v6 = vld [vmem:[#allocation11 + $0x410] sm:$0xff] }
 0x19e   :  { %917 = vmatmul.mubr.f32.vlgmr.msra.gmra.mxu1 %v359_v56  ;;  %1284 = vmatprep.subr.mxu0 %v978_v7  ;;  %v1158_v56 = vld [vmem:[#allocation11 + $0x738] sm:$0xff] }
 0x19f   :  { %1285 = vmatpush1.msra.mxu0 %v977_v8  ;;  %1345 = vmatprep.subr.mxu1 %v1163_v16  ;;  %v1102_v7 = vld [vmem:[#allocation11 + $0x578] sm:$0xff]  ;;  %v1053_v8 = vld [vmem:[#allocation11 + $0x3f0] sm:$0xff]  ;;  %v1043_v16 = vld [vmem:[#allocation11 + $0x3a0] sm:$0xff] }
 0x1a0   :  { %1286 = vmatprep.subr.mxu0 %v973_v9  ;;  %1346 = vmatpush1.msra.mxu1 %v1162_v18  ;;  %v1098_v9 = vld [vmem:[#allocation11 + $0x558] sm:$0xff] }
 0x1a1   :  { %1287 = vmatpush1.msra.mxu0 %v972_v10  ;;  %1347 = vmatprep.subr.mxu1 %v1158_v56  ;;  %v1052_v10 = vld [vmem:[#allocation11 + $0x3e8] sm:$0xff]  ;;  %v1042_v18 = vld [vmem:[#allocation11 + $0x398] sm:$0xff] }
 0x1a2   :  { %1288 = vmatprep.subr.mxu0 %v968_v11  ;;  %1348 = vmatpush1.msra.mxu1 %v1157_v20  ;;  %v1097_v11 = vld [vmem:[#allocation11 + $0x550] sm:$0xff]  ;;  %v1038_v56 = vld [vmem:[#allocation11 + $0x378] sm:$0xff] }
 0x1a3   :  { %1289 = vmatpush1.msra.mxu0 %v967_v12  ;;  %1349 = vmatprep.subr.mxu1 %v1153_v22  ;;  %v1048_v12 = vld [vmem:[#allocation11 + $0x3c8] sm:$0xff]  ;;  %v1037_v20 = vld [vmem:[#allocation11 + $0x370] sm:$0xff] }
 0x1a4   :  { %1290 = vmatprep.subr.mxu0 %v963_v13  ;;  %1350 = vmatpush1.msra.mxu1 %v1152_v24  ;;  %v1093_v13 = vld [vmem:[#allocation11 + $0x530] sm:$0xff]  ;;  %v1032_v24 = vld [vmem:[#allocation11 + $0x348] sm:$0xff] }
 0x1a5   :  { %1291 = vmatpush1.msra.mxu0 %v962_v14  ;;  %1351 = vmatprep.subr.mxu1 %v1148_v29  ;;  %v1047_v14 = vld [vmem:[#allocation11 + $0x3c0] sm:$0xff]  ;;  %v1033_v22 = vld [vmem:[#allocation11 + $0x350] sm:$0xff]  ;;  %v1028_v29 = vld [vmem:[#allocation11 + $0x328] sm:$0xff] }
 0x1a6   :  { %1292 = vmatprep.subr.mxu0 %v958_v15  ;;  %1352 = vmatpush1.msra.mxu1 %v1147_v31  ;;  %v1092_v15 = vld [vmem:[#allocation11 + $0x528] sm:$0xff]  ;;  %v1027_v31 = vld [vmem:[#allocation11 + $0x320] sm:$0xff] }
 0x1a7   :  { %1293 = vmatpush1.msra.mxu0 %v957_v17  ;;  %1353 = vmatprep.subr.mxu1 %v1143_v34  ;;  %v1088_v17 = vld [vmem:[#allocation11 + $0x508] sm:$0xff]  ;;  %v1023_v34 = vld [vmem:[#allocation11 + $0x300] sm:$0xff] }
 0x1a8   :  { %1294 = vmatprep.subr.mxu0 %v953_v48  ;;  %1354 = vmatpush1.msra.mxu1 %v1142_v39  ;;  %v1087_v48 = vld [vmem:[#allocation11 + $0x500] sm:$0xff]  ;;  %v1022_v39 = vld [vmem:[#allocation11 + $0x2f8] sm:$0xff] }
 0x1a9   :  { %1295 = vmatpush1.msra.mxu0 %v952_v19  ;;  %1355 = vmatprep.subr.mxu1 %v1138_v41  ;;  %v1243_v19 = vld [vmem:[#allocation11 + $0x9e0] sm:$0xff]  ;;  %v1018_v41 = vld [vmem:[#allocation11 + $0x2d8] sm:$0xff] }
 0x1aa   :  { %1296 = vmatprep.subr.mxu0 %v948_v21  ;;  %1356 = vmatpush1.msra.mxu1 %v1137_v43  ;;  %v1242_v21 = vld [vmem:[#allocation11 + $0x9d8] sm:$0xff]  ;;  %v1017_v43 = vld [vmem:[#allocation11 + $0x2d0] sm:$0xff] }
 0x1ab   :  { %1297 = vmatpush1.msra.mxu0 %v947_v23  ;;  %1357 = vmatprep.subr.mxu1 %v1133_v45  ;;  %v1238_v23 = vld [vmem:[#allocation11 + $0x9b8] sm:$0xff]  ;;  %v1013_v45 = vld [vmem:[#allocation11 + $0x2b0] sm:$0xff] }
 0x1ac   :  { %1298 = vmatprep.subr.mxu0 %v943_v27  ;;  %1358 = vmatpush1.msra.mxu1 %v1132_v47  ;;  %v1237_v27 = vld [vmem:[#allocation11 + $0x9b0] sm:$0xff]  ;;  %v1012_v47 = vld [vmem:[#allocation11 + $0x2a8] sm:$0xff] }
 0x1ad   :  { %1299 = vmatpush1.msra.mxu0 %v942_v30  ;;  %1359 = vmatprep.subr.mxu1 %v1128_v50  ;;  %v1233_v30 = vld [vmem:[#allocation11 + $0x990] sm:$0xff]  ;;  %v1008_v50 = vld [vmem:[#allocation11 + $0x288] sm:$0xff] }
 0x1ae   :  { %1300 = vmatprep.subr.mxu0 %v938_v33  ;;  %1360 = vmatpush1.msra.mxu1 %v1127_v52  ;;  %v1232_v33 = vld [vmem:[#allocation11 + $0x988] sm:$0xff]  ;;  %v1007_v52 = vld [vmem:[#allocation11 + $0x280] sm:$0xff] }
 0x1af   :  { %1301 = vmatpush1.msra.mxu0 %v937_v36  ;;  %1361 = vmatprep.subr.mxu1 %v1123_v54  ;;  %v1228_v36 = vld [vmem:[#allocation11 + $0x968] sm:$0xff]  ;;  %v1005_v54 = vld [vmem:[#allocation11 + $0x270] sm:$0xff] }
 0x1b0   :  { %1302 = vmatprep.subr.mxu0 %v933_v40  ;;  %1362 = vmatpush1.msra.mxu1 %v1122_v57  ;;  %v1227_v40 = vld [vmem:[#allocation11 + $0x960] sm:$0xff] }
 0x1b1   :  { %1303 = vmatpush1.msra.mxu0 %v932_v42  ;;  %1363 = vmatprep.subr.mxu1 %v1118_v59  ;;  %v1223_v42 = vld [vmem:[#allocation11 + $0x940] sm:$0xff]  ;;  %v1202_v59 = vld [vmem:[#allocation11 + $0x898] sm:$0xff] }
 0x1b2   :  { %1304 = vmatprep.subr.mxu0 %v928_v44  ;;  %1364 = vmatpush1.msra.mxu1 %v1117_v61  ;;  %v1222_v44 = vld [vmem:[#allocation11 + $0x938] sm:$0xff]  ;;  %v1207_v57 = vld [vmem:[#allocation11 + $0x8c0] sm:$0xff]  ;;  %v1197_v61 = vld [vmem:[#allocation11 + $0x870] sm:$0xff] }
 0x1b3   :  { %1305 = vmatpush1.msra.mxu0 %v927_v46  ;;  %1365 = vmatprep.subr.mxu1 %v1113_v63  ;;  %v1218_v46 = vld [vmem:[#allocation11 + $0x918] sm:$0xff]  ;;  %v1192_v63 = vld [vmem:[#allocation11 + $0x848] sm:$0xff] }
 0x1b4   :  { %1306 = vmatprep.subr.mxu0 %v1083_v49  ;;  %1366 = vmatpush1.msra.mxu1 %v1112_v1  ;;  %v1217_v49 = vld [vmem:[#allocation11 + $0x910] sm:$0xff]  ;;  %v1187_v1 = vld [vmem:[#allocation11 + $0x820] sm:$0xff] }
 0x1b5   :  { %1307 = vmatpush2.msra.mxu0 %v1082_v51  ;;  %1367 = vmatprep.subr.mxu1 %v1108_v32  ;;  %v1213_v51 = vld [vmem:[#allocation11 + $0x8f0] sm:$0xff]  ;;  %v1182_v32 = vld [vmem:[#allocation11 + $0x7f8] sm:$0xff] }
 0x1b6   :  { %1308 = vmatprep.subr.mxu0 %v1078_v53  ;;  %1368 = vmatpush1.msra.mxu1 %v1107_v3  ;;  %v1212_v53 = vld [vmem:[#allocation11 + $0x8e8] sm:$0xff]  ;;  %v1177_v3 = vld [vmem:[#allocation11 + $0x7d0] sm:$0xff] }
 0x1b7   :  { %1309 = vmatpush2.msra.mxu0 %v1077_v55  ;;  %1369 = vmatprep.subr.mxu1 %v1103_v5  ;;  %v1208_v55 = vld [vmem:[#allocation11 + $0x8c8] sm:$0xff] }
 0x1b8   :  { %1310 = vmatprep.subr.mxu0 %v1073_v58  ;;  %1370 = vmatpush1.msra.mxu1 %v1102_v7  ;;  %v1203_v58 = vld [vmem:[#allocation11 + $0x8a0] sm:$0xff]  ;;  %v1172_v5 = vld [vmem:[#allocation11 + $0x7a8] sm:$0xff] }
 0x1b9   :  { %1311 = vmatpush2.msra.mxu0 %v1072_v60  ;;  %1371 = vmatprep.subr.mxu1 %v1098_v9  ;;  %v1198_v60 = vld [vmem:[#allocation11 + $0x878] sm:$0xff]  ;;  %v1167_v7 = vld [vmem:[#allocation11 + $0x780] sm:$0xff] }
 0x1ba   :  { %1312 = vmatprep.subr.mxu0 %v1068_v62  ;;  %1372 = vmatpush1.msra.mxu1 %v1097_v11  ;;  %v1193_v62 = vld [vmem:[#allocation11 + $0x850] sm:$0xff]  ;;  %v2674_v9 = vld [vmem:[#allocation10] sm:$0xf] }
 0x1bb   :  { %1313 = vmatpush2.msra.mxu0 %v1067_v0  ;;  %1373 = vmatprep.subr.mxu1 %v1093_v13  ;;  %v1188_v0 = vld [vmem:[#allocation11 + $0x828] sm:$0xff]  ;;  %v622_v11 = vrot.slane %v2674_v9, %v2645_v26 }
 0x1bc   :  { %1314 = vmatprep.subr.mxu0 %v1063_v2  ;;  %1374 = vmatpush1.msra.mxu1 %v1092_v15  ;;  %v1183_v2 = vld [vmem:[#allocation11 + $0x800] sm:$0xff] }
 0x1bd   :  { %1315 = vmatpush2.msra.mxu0 %v1062_v38  ;;  %1375 = vmatprep.subr.mxu1 %v1088_v17  ;;  %v1178_v38 = vld [vmem:[#allocation11 + $0x7d8] sm:$0xff] }
 0x1be   :  { %1316 = vmatprep.subr.mxu0 %v1058_v4  ;;  %1376 = vmatpush1.msra.mxu1 %v1087_v48  ;;  %v1173_v4 = vld [vmem:[#allocation11 + $0x7b0] sm:$0xff] }
 0x1bf   :  { %1317 = vmatpush2.msra.mxu0 %v1057_v6  ;;  %1377 = vmatprep.subr.mxu1 %v1243_v19  ;;  %v1168_v6 = vld [vmem:[#allocation11 + $0x788] sm:$0xff] }
 0x1c0   :  { %1318 = vmatprep.subr.mxu0 %v1053_v8  ;;  %1378 = vmatpush2.msra.mxu1 %v1242_v21  ;;  %v1165_v8 = vld [vmem:[#allocation11 + $0x770] sm:$0xff]  ;;  %v1000_v21 = vld [vmem:[#allocation11 + $0x248] sm:$0xff] }
 0x1c1   :  { %1319 = vmatpush2.msra.mxu0 %v1052_v10  ;;  %1379 = vmatprep.subr.mxu1 %v1238_v23  ;;  %v995_v23 = vld [vmem:[#allocation11 + $0x220] sm:$0xff] }
 0x1c2   :  { %1320 = vmatprep.subr.mxu0 %v1048_v12  ;;  %1380 = vmatpush2.msra.mxu1 %v1237_v27  ;;  %v626_v12 = vrot.slane %v2674_v9, %v2648_v28  ;;  %v990_v27 = vld [vmem:[#allocation11 + $0x1f8] sm:$0xff] }
 0x1c3   :  { %1321 = vmatpush2.msra.mxu0 %v1047_v14  ;;  %1381 = vmatprep.subr.mxu1 %v1233_v30  ;;  %v985_v30 = vld [vmem:[#allocation11 + $0x1d0] sm:$0xff] }
 0x1c4   :  { %1322 = vmatprep.subr.mxu0 %v1043_v16  ;;  %1382 = vmatpush2.msra.mxu1 %v1232_v33  ;;  %v980_v33 = vld [vmem:[#allocation11 + $0x1a8] sm:$0xff] }
 0x1c5   :  { %1323 = vmatpush2.msra.mxu0 %v1042_v18  ;;  %1383 = vmatprep.subr.mxu1 %v1228_v36  ;;  %v975_v36 = vld [vmem:[#allocation11 + $0x180] sm:$0xff] }
 0x1c6   :  { %1324 = vmatprep.subr.mxu0 %v1038_v56  ;;  %1384 = vmatpush2.msra.mxu1 %v1227_v40  ;;  %v970_v40 = vld [vmem:[#allocation11 + $0x158] sm:$0xff] }
 0x1c7   :  { %1325 = vmatpush2.msra.mxu0 %v1037_v20  ;;  %1385 = vmatprep.subr.mxu1 %v1223_v42  ;;  %v1004_v20 = vld [vmem:[#allocation11 + $0x268] sm:$0xff]  ;;  %v965_v42 = vld [vmem:[#allocation11 + $0x130] sm:$0xff] }
 0x1c8   :  { %1326 = vmatprep.subr.mxu0 %v1033_v22  ;;  %1386 = vmatpush2.msra.mxu1 %v1222_v44  ;;  %v999_v22 = vld [vmem:[#allocation11 + $0x240] sm:$0xff]  ;;  %v960_v44 = vld [vmem:[#allocation11 + $0x108] sm:$0xff] }
 0x1c9   :  { %1327 = vmatpush2.msra.mxu0 %v1032_v24  ;;  %1387 = vmatprep.subr.mxu1 %v1218_v46  ;;  %v994_v24 = vld [vmem:[#allocation11 + $0x218] sm:$0xff]  ;;  %v955_v46 = vld [vmem:[#allocation11 + $0xe0] sm:$0xff] }
 0x1ca   :  { %1328 = vmatprep.subr.mxu0 %v1028_v29  ;;  %1388 = vmatpush2.msra.mxu1 %v1217_v49  ;;  %v989_v29 = vld [vmem:[#allocation11 + $0x1f0] sm:$0xff]  ;;  %v950_v49 = vld [vmem:[#allocation11 + $0xb8] sm:$0xff] }
 0x1cb   :  { %1329 = vmatpush2.msra.mxu0 %v1027_v31  ;;  %1389 = vmatprep.subr.mxu1 %v1213_v51  ;;  %v984_v31 = vld [vmem:[#allocation11 + $0x1c8] sm:$0xff]  ;;  %v945_v51 = vld [vmem:[#allocation11 + $0x90] sm:$0xff] }
 0x1cc   :  { %1330 = vmatprep.subr.mxu0 %v1023_v34  ;;  %1390 = vmatpush2.msra.mxu1 %v1212_v53  ;;  %v979_v34 = vld [vmem:[#allocation11 + $0x1a0] sm:$0xff]  ;;  %v940_v53 = vld [vmem:[#allocation11 + $0x68] sm:$0xff] }
 0x1cd   :  { %1331 = vmatpush2.msra.mxu0 %v1022_v39  ;;  %1391 = vmatprep.subr.mxu1 %v1208_v55  ;;  %v974_v39 = vld [vmem:[#allocation11 + $0x178] sm:$0xff]  ;;  %v935_v55 = vld [vmem:[#allocation11 + $0x40] sm:$0xff] }
 0x1ce   :  { %1332 = vmatprep.subr.mxu0 %v1018_v41  ;;  %1392 = vmatpush2.msra.mxu1 %v1207_v57  ;;  %v969_v41 = vld [vmem:[#allocation11 + $0x150] sm:$0xff]  ;;  %v934_v57 = vld [vmem:[#allocation11 + $0x38] sm:$0xff] }
 0x1cf   :  { %1333 = vmatpush2.msra.mxu0 %v1017_v43  ;;  %1393 = vmatprep.subr.mxu1 %v1203_v58  ;;  %v964_v43 = vld [vmem:[#allocation11 + $0x128] sm:$0xff]  ;;  %v930_v58 = vld [vmem:[#allocation11 + $0x18] sm:$0xff] }
 0x1d0   :  { %1334 = vmatprep.subr.mxu0 %v1013_v45  ;;  %1394 = vmatpush2.msra.mxu1 %v1202_v59  ;;  %v959_v45 = vld [vmem:[#allocation11 + $0x100] sm:$0xff]  ;;  %v929_v59 = vld [vmem:[#allocation11 + $0x10] sm:$0xff] }
 0x1d1   :  { %1335 = vmatpush2.msra.mxu0 %v1012_v47  ;;  %1395 = vmatprep.subr.mxu1 %v1198_v60  ;;  %v954_v47 = vld [vmem:[#allocation11 + $0xd8] sm:$0xff]  ;;  %v1085_v60 = vld [vmem:[#allocation11 + $0x4f0] sm:$0xff] }
 0x1d2   :  { %1336 = vmatprep.subr.mxu0 %v1008_v50  ;;  %1396 = vmatpush2.msra.mxu1 %v1197_v61  ;;  %v949_v50 = vld [vmem:[#allocation11 + $0xb0] sm:$0xff]  ;;  %v1084_v61 = vld [vmem:[#allocation11 + $0x4e8] sm:$0xff] }
 0x1d3   :  { %1337 = vmatpush2.msra.mxu0 %v1007_v52  ;;  %1397 = vmatprep.subr.mxu1 %v1193_v62  ;;  %v944_v52 = vld [vmem:[#allocation11 + $0x88] sm:$0xff] }
 0x1d4   :  { %1416 = vmatprep.subr.mxu0 %v1005_v54  ;;  %1398 = vmatpush2.msra.mxu1 %v1192_v63  ;;  %v939_v54 = vld [vmem:[#allocation11 + $0x60] sm:$0xff]  ;;  %v1080_v62 = vld [vmem:[#allocation11 + $0x4c8] sm:$0xff] }
 0x1d5   :  { %1399 = vmatprep.subr.mxu1 %v1188_v0  ;;  %v1079_v63 = vld [vmem:[#allocation11 + $0x4c0] sm:$0xff] }
 0x1d6   :  { %1400 = vmatpush2.msra.mxu1 %v1187_v1  ;;  %v1075_v0 = vld [vmem:[#allocation11 + $0x4a0] sm:$0xff]  ;;  %v1074_v1 = vld [vmem:[#allocation11 + $0x498] sm:$0xff] }
 0x1d7   :  { %1401 = vmatprep.subr.mxu1 %v1183_v2  ;;  %v1070_v2 = vld [vmem:[#allocation11 + $0x478] sm:$0xff] }
 0x1d8   :  { %1402 = vmatpush2.msra.mxu1 %v1182_v32  ;;  %v1069_v32 = vld [vmem:[#allocation11 + $0x470] sm:$0xff] }
 0x1d9   :  { %1403 = vmatprep.subr.mxu1 %v1178_v38  ;;  %v1065_v38 = vld [vmem:[#allocation11 + $0x450] sm:$0xff] }
 0x1da   :  { %1404 = vmatpush2.msra.mxu1 %v1177_v3  ;;  %v1064_v3 = vld [vmem:[#allocation11 + $0x448] sm:$0xff] }
 0x1db   :  { %1405 = vmatprep.subr.mxu1 %v1173_v4  ;;  %v1060_v4 = vld [vmem:[#allocation11 + $0x428] sm:$0xff] }
 0x1dc   :  { %1406 = vmatpush2.msra.mxu1 %v1172_v5  ;;  %v1059_v5 = vld [vmem:[#allocation11 + $0x420] sm:$0xff] }
 0x1dd   :  { %1407 = vmatprep.subr.mxu1 %v1168_v6  ;;  %v1055_v6 = vld [vmem:[#allocation11 + $0x400] sm:$0xff] }
 0x1de   :  { %1408 = vmatpush2.msra.mxu1 %v1167_v7  ;;  %v1054_v7 = vld [vmem:[#allocation11 + $0x3f8] sm:$0xff] }
 0x1df   :  { %1487 = vmatprep.subr.mxu1 %v1165_v8  ;;  %v1050_v8 = vld [vmem:[#allocation11 + $0x3d8] sm:$0xff] }
 0x213   :  { %v705_v10 = vpop.f32.mrf.mxu0 }
 0x214   :  { %v706_v14 = vadd.f32 %v705_v10, %v622_v11  ;;  %v1049_v10 = vld [vmem:[#allocation11 + $0x3d0] sm:$0xff] }
 0x215   :  { %v707_v13 = vpop.f32.mrf.mxu0  ;;  %v1045_v11 = vld [vmem:[#allocation11 + $0x3b0] sm:$0xff] }
 0x216   :  { %v708_v16 = vadd.f32 %v707_v13, %v626_v12  ;;  %v1044_v12 = vld [vmem:[#allocation11 + $0x3a8] sm:$0xff] }
 0x217   :  { %v1040_v13 = vld [vmem:[#allocation11 + $0x388] sm:$0xff] }
 0x21d   :  { %v776_v15 = vpop.f32.mrf.mxu1 }
 0x21e   :  { %v777_v17 = vadd.f32 %v776_v15, %v706_v14  ;;  %v1039_v14 = vld [vmem:[#allocation11 + $0x380] sm:$0xff] }
 0x21f   :  { %v778_v18 = vpop.f32.mrf.mxu1  ;;  %v1035_v15 = vld [vmem:[#allocation11 + $0x360] sm:$0xff] }
 0x220   :  { %v779_v48 = vadd.f32 %v778_v18, %v708_v16  ;;  %v2682_v19 = vmax.f32 %v777_v17, 0.0  ;;  %v1034_v16 = vld [vmem:[#allocation11 + $0x358] sm:$0xff] }
 0x221   :  { %v1030_v18 = vld [vmem:[#allocation11 + $0x338] sm:$0xff] }
 0x222   :  { %v2680_v56 = vmax.f32 %v779_v48, 0.0  ;;  %v1029_v48 = vld [vmem:[#allocation11 + $0x330] sm:$0xff] }
 0x224   :  { %1338 = vmatprep.mubr.f32.mxu0 %v2680_v56 }
 0x225   :  { %1339 = vmatmul.mubr.f32.vlgmr.msra.gmra.mxu0 %v2682_v19 }
 0x226   :  { %1417 = vmatpush1.msra.mxu0 %v1004_v20  ;;  %1480 = vmatprep.mubr.f32.mxu0 %v2680_v56  ;;  %v630_v20 = vrot.slane %v2674_v9, %v2655_v35 }
 0x227   :  { %1418 = vmatprep.subr.mxu0 %v1000_v21  ;;  %v1025_v21 = vld [vmem:[#allocation11 + $0x310] sm:$0xff] }
 0x228   :  { %1419 = vmatpush1.msra.mxu0 %v999_v22  ;;  %v634_v22 = vrot.slane %v2674_v9, %v2658_v37  ;;  %v1009_v9 = vld [vmem:[#allocation11 + $0x290] sm:$0xff] }
 0x229   :  { %1420 = vmatprep.subr.mxu0 %v995_v23  ;;  %v1024_v23 = vld [vmem:[#allocation11 + $0x308] sm:$0xff] }
 0x22a   :  { %1421 = vmatpush1.msra.mxu0 %v994_v24 }
 0x22b   :  { %1422 = vmatprep.subr.mxu0 %v990_v27  ;;  %v1020_v27 = vld [vmem:[#allocation11 + $0x2e8] sm:$0xff] }
 0x22c   :  { %1423 = vmatpush1.msra.mxu0 %v989_v29  ;;  %v1019_v29 = vld [vmem:[#allocation11 + $0x2e0] sm:$0xff] }
 0x22d   :  { %1424 = vmatprep.subr.mxu0 %v985_v30 }
 0x22e   :  { %1425 = vmatpush1.msra.mxu0 %v984_v31 }
 0x22f   :  { %1426 = vmatprep.subr.mxu0 %v980_v33  ;;  %v1015_v33 = vld [vmem:[#allocation11 + $0x2c0] sm:$0xff] }
 0x230   :  { %1427 = vmatpush1.msra.mxu0 %v979_v34 }
 0x231   :  { %1428 = vmatprep.subr.mxu0 %v975_v36  ;;  %v1014_v36 = vld [vmem:[#allocation11 + $0x2b8] sm:$0xff] }
 0x232   :  { %1429 = vmatpush1.msra.mxu0 %v974_v39 }
 0x233   :  { %1430 = vmatprep.subr.mxu0 %v970_v40 }
 0x234   :  { %1431 = vmatpush1.msra.mxu0 %v969_v41  ;;  %v1010_v41 = vld [vmem:[#allocation11 + $0x298] sm:$0xff] }
 0x235   :  { %1432 = vmatprep.subr.mxu0 %v965_v42 }
 0x236   :  { %1433 = vmatpush1.msra.mxu0 %v964_v43 }
 0x237   :  { %1434 = vmatprep.subr.mxu0 %v960_v44  ;;  %v1086_v44 = vld [vmem:[#allocation11 + $0x4f8] sm:$0xff] }
 0x238   :  { %1435 = vmatpush1.msra.mxu0 %v959_v45 }
 0x239   :  { %1436 = vmatprep.subr.mxu0 %v955_v46  ;;  %v1164_v46 = vld [vmem:[#allocation11 + $0x768] sm:$0xff] }
 0x23a   :  { %1437 = vmatpush1.msra.mxu0 %v954_v47  ;;  %v1160_v47 = vld [vmem:[#allocation11 + $0x748] sm:$0xff] }
 0x23b   :  { %1438 = vmatprep.subr.mxu0 %v950_v49  ;;  %v1006_v49 = vld [vmem:[#allocation11 + $0x278] sm:$0xff] }
 0x23c   :  { %1439 = vmatpush1.msra.mxu0 %v949_v50  ;;  %v1159_v50 = vld [vmem:[#allocation11 + $0x740] sm:$0xff] }
 0x23d   :  { %1440 = vmatprep.subr.mxu0 %v945_v51  ;;  %v1081_v51 = vld [vmem:[#allocation11 + $0x4d0] sm:$0xff] }
 0x23e   :  { %1441 = vmatpush1.msra.mxu0 %v944_v52  ;;  %v1155_v52 = vld [vmem:[#allocation11 + $0x720] sm:$0xff] }
 0x23f   :  { %1442 = vmatprep.subr.mxu0 %v940_v53  ;;  %v1001_v53 = vld [vmem:[#allocation11 + $0x250] sm:$0xff] }
 0x240   :  { %1443 = vmatpush1.msra.mxu0 %v939_v54  ;;  %v1154_v54 = vld [vmem:[#allocation11 + $0x718] sm:$0xff] }
 0x241   :  { %1444 = vmatprep.subr.mxu0 %v935_v55  ;;  %v1076_v55 = vld [vmem:[#allocation11 + $0x4a8] sm:$0xff] }
 0x242   :  { %1445 = vmatpush1.msra.mxu0 %v934_v57  ;;  %v1150_v57 = vld [vmem:[#allocation11 + $0x6f8] sm:$0xff] }
 0x243   :  { %1446 = vmatprep.subr.mxu0 %v930_v58  ;;  %v996_v58 = vld [vmem:[#allocation11 + $0x228] sm:$0xff] }
 0x244   :  { %1447 = vmatpush1.msra.mxu0 %v929_v59  ;;  %v1149_v59 = vld [vmem:[#allocation11 + $0x6f0] sm:$0xff] }
 0x245   :  { %1448 = vmatprep.subr.mxu0 %v1085_v60  ;;  %v1071_v60 = vld [vmem:[#allocation11 + $0x480] sm:$0xff] }
 0x246   :  { %1449 = vmatpush2.msra.mxu0 %v1084_v61  ;;  %v1145_v61 = vld [vmem:[#allocation11 + $0x6d0] sm:$0xff] }
 0x247   :  { %1450 = vmatprep.subr.mxu0 %v1080_v62  ;;  %v991_v62 = vld [vmem:[#allocation11 + $0x200] sm:$0xff] }
 0x248   :  { %1451 = vmatpush2.msra.mxu0 %v1079_v63  ;;  %v1144_v63 = vld [vmem:[#allocation11 + $0x6c8] sm:$0xff] }
 0x249   :  { %1452 = vmatprep.subr.mxu0 %v1075_v0  ;;  %v1066_v0 = vld [vmem:[#allocation11 + $0x458] sm:$0xff] }
 0x24a   :  { %1453 = vmatpush2.msra.mxu0 %v1074_v1  ;;  %v1140_v1 = vld [vmem:[#allocation11 + $0x6a8] sm:$0xff] }
 0x24b   :  { %1454 = vmatprep.subr.mxu0 %v1070_v2  ;;  %v1139_v2 = vld [vmem:[#allocation11 + $0x6a0] sm:$0xff] }
 0x24c   :  { %1455 = vmatpush2.msra.mxu0 %v1069_v32  ;;  %v1061_v32 = vld [vmem:[#allocation11 + $0x430] sm:$0xff] }
 0x24d   :  { %1456 = vmatprep.subr.mxu0 %v1065_v38  ;;  %v1135_v38 = vld [vmem:[#allocation11 + $0x680] sm:$0xff] }
 0x24e   :  { %1457 = vmatpush2.msra.mxu0 %v1064_v3  ;;  %v981_v3 = vld [vmem:[#allocation11 + $0x1b0] sm:$0xff] }
 0x24f   :  { %1458 = vmatprep.subr.mxu0 %v1060_v4  ;;  %v1134_v4 = vld [vmem:[#allocation11 + $0x678] sm:$0xff] }
 0x250   :  { %1459 = vmatpush2.msra.mxu0 %v1059_v5  ;;  %v1056_v5 = vld [vmem:[#allocation11 + $0x408] sm:$0xff] }
 0x251   :  { %1460 = vmatprep.subr.mxu0 %v1055_v6  ;;  %v1130_v6 = vld [vmem:[#allocation11 + $0x658] sm:$0xff] }
 0x252   :  { %1461 = vmatpush2.msra.mxu0 %v1054_v7  ;;  %v976_v7 = vld [vmem:[#allocation11 + $0x188] sm:$0xff] }
 0x253   :  { %1462 = vmatprep.subr.mxu0 %v1050_v8  ;;  %v847_v17 = vpop.f32.mrf.mxu0  ;;  %v1129_v8 = vld [vmem:[#allocation11 + $0x650] sm:$0xff] }
 0x254   :  { %1463 = vmatpush2.msra.mxu0 %v1049_v10  ;;  %v848_v30 = vadd.f32 %v847_v17, %v630_v20  ;;  %v1051_v10 = vld [vmem:[#allocation11 + $0x3e0] sm:$0xff]  ;;  %v961_v20 = vld [vmem:[#allocation11 + $0x110] sm:$0xff] }
 0x255   :  { %1464 = vmatprep.subr.mxu0 %v1045_v11  ;;  %v849_v24 = vpop.f32.mrf.mxu0  ;;  %v1125_v11 = vld [vmem:[#allocation11 + $0x630] sm:$0xff]  ;;  %v1119_v17 = vld [vmem:[#allocation11 + $0x600] sm:$0xff] }
 0x256   :  { %1465 = vmatpush2.msra.mxu0 %v1044_v12  ;;  %v850_v34 = vadd.f32 %v849_v24, %v634_v22  ;;  %v971_v12 = vld [vmem:[#allocation11 + $0x160] sm:$0xff]  ;;  %v1036_v22 = vld [vmem:[#allocation11 + $0x368] sm:$0xff] }
 0x257   :  { %1466 = vmatprep.subr.mxu0 %v1040_v13  ;;  %v1124_v13 = vld [vmem:[#allocation11 + $0x628] sm:$0xff] }
 0x258   :  { %1467 = vmatpush2.msra.mxu0 %v1039_v14  ;;  %v1046_v14 = vld [vmem:[#allocation11 + $0x3b8] sm:$0xff]  ;;  %v956_v24 = vld [vmem:[#allocation11 + $0xe8] sm:$0xff] }
 0x259   :  { %1468 = vmatprep.subr.mxu0 %v1035_v15  ;;  %v1120_v15 = vld [vmem:[#allocation11 + $0x608] sm:$0xff] }
 0x25a   :  { %1469 = vmatpush2.msra.mxu0 %v1034_v16  ;;  %v966_v16 = vld [vmem:[#allocation11 + $0x138] sm:$0xff] }
 0x25b   :  { %1470 = vmatprep.subr.mxu0 %v1030_v18  ;;  %v1041_v18 = vld [vmem:[#allocation11 + $0x390] sm:$0xff] }
 0x25c   :  { %1471 = vmatpush2.msra.mxu0 %v1029_v48  ;;  %v1115_v48 = vld [vmem:[#allocation11 + $0x5e0] sm:$0xff] }
 0x25d   :  { %1472 = vmatprep.subr.mxu0 %v1025_v21  ;;  %v1114_v21 = vld [vmem:[#allocation11 + $0x5d8] sm:$0xff] }
 0x25e   :  { %v918_v31 = vpop.f32.mrf.mxu1  ;;  %1473 = vmatpush2.msra.mxu0 %v1024_v23  ;;  %v1110_v23 = vld [vmem:[#allocation11 + $0x5b8] sm:$0xff] }
 0x25f   :  { %1474 = vmatprep.subr.mxu0 %v1020_v27  ;;  %v919_v39 = vadd.f32 %v918_v31, %v848_v30  ;;  %v1109_v27 = vld [vmem:[#allocation11 + $0x5b0] sm:$0xff]  ;;  %v951_v31 = vld [vmem:[#allocation11 + $0xc0] sm:$0xff] }
 0x260   :  { %v920_v40 = vpop.f32.mrf.mxu1  ;;  %1475 = vmatpush2.msra.mxu0 %v1019_v29  ;;  %v1031_v29 = vld [vmem:[#allocation11 + $0x340] sm:$0xff]  ;;  %v1105_v30 = vld [vmem:[#allocation11 + $0x590] sm:$0xff] }
 0x261   :  { %v921_v42 = vadd.f32 %v920_v40, %v850_v34  ;;  %1476 = vmatprep.subr.mxu0 %v1015_v33  ;;  %v2693_v45 = vmax.f32 %v919_v39, 0.0  ;;  %v1104_v33 = vld [vmem:[#allocation11 + $0x588] sm:$0xff]  ;;  %v1026_v34 = vld [vmem:[#allocation11 + $0x318] sm:$0xff]  ;;  %v1099_v40 = vld [vmem:[#allocation11 + $0x560] sm:$0xff] }
 0x262   :  { %1477 = vmatpush2.msra.mxu0 %v1014_v36  ;;  %v1100_v36 = vld [vmem:[#allocation11 + $0x568] sm:$0xff]  ;;  %v946_v39 = vld [vmem:[#allocation11 + $0x98] sm:$0xff] }
 0x263   :  { %v2691_v43 = vmax.f32 %v921_v42, 0.0  ;;  %1478 = vmatprep.subr.mxu0 %v1010_v41  ;;  %v1021_v41 = vld [vmem:[#allocation11 + $0x2f0] sm:$0xff]  ;;  %v1095_v42 = vld [vmem:[#allocation11 + $0x540] sm:$0xff] }
 0x264   :  { %1479 = vmatpush2.msra.mxu0 %v1009_v9  ;;  %v941_v9 = vld [vmem:[#allocation11 + $0x70] sm:$0xff] }
 0x265   :  { %1409 = vmatprep.mubr.f32.mxu1 %v2691_v43  ;;  %1481 = vmatmul.mubr.f32.vlgmr.msra.gmra.mxu0 %v2682_v19 }
 0x266   :  { %1410 = vmatmul.mubr.f32.vlgmr.msra.gmra.mxu1 %v2693_v45  ;;  %2139 = vmatprep.subr.mxu0 %v1086_v44  ;;  %v1094_v44 = vld [vmem:[#allocation11 + $0x538] sm:$0xff] }
 0x267   :  { %1488 = vmatpush1.msra.mxu1 %v1164_v46  ;;  %1551 = vmatprep.mubr.f32.mxu1 %v2691_v43  ;;  %v1016_v46 = vld [vmem:[#allocation11 + $0x2c8] sm:$0xff] }
 0x268   :  { %1489 = vmatprep.subr.mxu1 %v1160_v47  ;;  %2140 = vmatpush3.msra.mxu0 %v1006_v49  ;;  %v1090_v47 = vld [vmem:[#allocation11 + $0x518] sm:$0xff]  ;;  %v936_v49 = vld [vmem:[#allocation11 + $0x48] sm:$0xff] }
 0x269   :  { %1622 = vmatprep.mubr.f32.mxu0 %v2680_v56  ;;  %1490 = vmatpush1.msra.mxu1 %v1159_v50  ;;  %v986_v56 = vld [vmem:[#allocation11 + $0x1d8] sm:$0xff]  ;;  %v1089_v50 = vld [vmem:[#allocation11 + $0x510] sm:$0xff] }
 0x26a   :  { %2141 = vmatprep.subr.mxu0 %v1081_v51  ;;  %1491 = vmatprep.subr.mxu1 %v1155_v52  ;;  %v1011_v51 = vld [vmem:[#allocation11 + $0x2a0] sm:$0xff]  ;;  %v1245_v52 = vld [vmem:[#allocation11 + $0x9f0] sm:$0xff] }
 0x26b   :  { %2142 = vmatpush3.msra.mxu0 %v1001_v53  ;;  %1492 = vmatpush1.msra.mxu1 %v1154_v54  ;;  %v931_v53 = vld [vmem:[#allocation11 + $0x20] sm:$0xff]  ;;  %v1244_v54 = vld [vmem:[#allocation11 + $0x9e8] sm:$0xff] }
 0x26c   :  { %2143 = vmatprep.subr.mxu0 %v1076_v55  ;;  %1493 = vmatprep.subr.mxu1 %v1150_v57  ;;  %v1240_v55 = vld [vmem:[#allocation11 + $0x9c8] sm:$0xff]  ;;  %v1239_v57 = vld [vmem:[#allocation11 + $0x9c0] sm:$0xff] }
 0x26d   :  { %2144 = vmatpush3.msra.mxu0 %v996_v58  ;;  %1494 = vmatpush1.msra.mxu1 %v1149_v59  ;;  %v1735_v58 = vld [vmem:[#allocation14 + $0xf8] sm:$0xff] }
 0x26e   :  { %2145 = vmatprep.subr.mxu0 %v1071_v60  ;;  %1495 = vmatprep.subr.mxu1 %v1145_v61  ;;  %v1235_v59 = vld [vmem:[#allocation11 + $0x9a0] sm:$0xff]  ;;  %v1734_v60 = vld [vmem:[#allocation14 + $0xf0] sm:$0xff] }
 0x26f   :  { %2146 = vmatpush3.msra.mxu0 %v991_v62  ;;  %1496 = vmatpush1.msra.mxu1 %v1144_v63  ;;  %v1234_v61 = vld [vmem:[#allocation11 + $0x998] sm:$0xff]  ;;  %v1733_v62 = vld [vmem:[#allocation14 + $0xe8] sm:$0xff] }
 0x270   :  { %2147 = vmatprep.subr.mxu0 %v1066_v0  ;;  %1497 = vmatprep.subr.mxu1 %v1140_v1  ;;  %v1230_v63 = vld [vmem:[#allocation11 + $0x978] sm:$0xff]  ;;  %v1732_v0 = vld [vmem:[#allocation14 + $0xe0] sm:$0xff]  ;;  %v1229_v1 = vld [vmem:[#allocation11 + $0x970] sm:$0xff] }
 0x271   :  { %2148 = vmatpush3.msra.mxu0 %v986_v56  ;;  %1498 = vmatpush1.msra.mxu1 %v1139_v2  ;;  %v1731_v56 = vld [vmem:[#allocation14 + $0xd8] sm:$0xff]  ;;  %v1225_v2 = vld [vmem:[#allocation11 + $0x950] sm:$0xff] }
 0x272   :  { %2149 = vmatprep.subr.mxu0 %v1061_v32  ;;  %1499 = vmatprep.subr.mxu1 %v1135_v38  ;;  %v1730_v32 = vld [vmem:[#allocation14 + $0xd0] sm:$0xff]  ;;  %v1224_v38 = vld [vmem:[#allocation11 + $0x948] sm:$0xff] }
 0x273   :  { %2150 = vmatpush3.msra.mxu0 %v981_v3  ;;  %1500 = vmatpush1.msra.mxu1 %v1134_v4  ;;  %v1729_v3 = vld [vmem:[#allocation14 + $0xc8] sm:$0xff]  ;;  %v1728_v4 = vld [vmem:[#allocation14 + $0xc0] sm:$0xff] }
 0x274   :  { %2151 = vmatprep.subr.mxu0 %v1056_v5  ;;  %1501 = vmatprep.subr.mxu1 %v1130_v6  ;;  %v1219_v5 = vld [vmem:[#allocation11 + $0x920] sm:$0xff] }
 0x275   :  { %2152 = vmatpush3.msra.mxu0 %v976_v7  ;;  %1502 = vmatpush1.msra.mxu1 %v1129_v8  ;;  %v1727_v6 = vld [vmem:[#allocation14 + $0xb8] sm:$0xff]  ;;  %v1726_v8 = vld [vmem:[#allocation14 + $0xb0] sm:$0xff] }
 0x276   :  { %2153 = vmatprep.subr.mxu0 %v1051_v10  ;;  %1503 = vmatprep.subr.mxu1 %v1125_v11  ;;  %v1215_v7 = vld [vmem:[#allocation11 + $0x900] sm:$0xff]  ;;  %v1214_v10 = vld [vmem:[#allocation11 + $0x8f8] sm:$0xff]  ;;  %v1725_v11 = vld [vmem:[#allocation14 + $0xa8] sm:$0xff] }
 0x277   :  { %2154 = vmatpush3.msra.mxu0 %v971_v12  ;;  %1504 = vmatpush1.msra.mxu1 %v1124_v13  ;;  %v1210_v12 = vld [vmem:[#allocation11 + $0x8d8] sm:$0xff]  ;;  %v1724_v13 = vld [vmem:[#allocation14 + $0xa0] sm:$0xff] }
 0x278   :  { %2155 = vmatprep.subr.mxu0 %v1046_v14  ;;  %1505 = vmatprep.subr.mxu1 %v1120_v15  ;;  %v1209_v14 = vld [vmem:[#allocation11 + $0x8d0] sm:$0xff]  ;;  %v1723_v15 = vld [vmem:[#allocation14 + $0x98] sm:$0xff] }
 0x279   :  { %2156 = vmatpush3.msra.mxu0 %v966_v16  ;;  %1506 = vmatpush1.msra.mxu1 %v1119_v17  ;;  %v1205_v16 = vld [vmem:[#allocation11 + $0x8b0] sm:$0xff] }
 0x27a   :  { %2157 = vmatprep.subr.mxu0 %v1041_v18  ;;  %1507 = vmatprep.subr.mxu1 %v1115_v48  ;;  %v1722_v17 = vld [vmem:[#allocation14 + $0x90] sm:$0xff]  ;;  %v1204_v18 = vld [vmem:[#allocation11 + $0x8a8] sm:$0xff] }
 0x27b   :  { %2158 = vmatpush3.msra.mxu0 %v961_v20  ;;  %1508 = vmatpush1.msra.mxu1 %v1114_v21  ;;  %v1721_v48 = vld [vmem:[#allocation14 + $0x88] sm:$0xff]  ;;  %v1720_v21 = vld [vmem:[#allocation14 + $0x80] sm:$0xff] }
 0x27c   :  { %2159 = vmatprep.subr.mxu0 %v1036_v22  ;;  %1509 = vmatprep.subr.mxu1 %v1110_v23  ;;  %v1200_v20 = vld [vmem:[#allocation11 + $0x888] sm:$0xff]  ;;  %v1199_v22 = vld [vmem:[#allocation11 + $0x880] sm:$0xff] }
 0x27d   :  { %2160 = vmatpush3.msra.mxu0 %v956_v24  ;;  %1510 = vmatpush1.msra.mxu1 %v1109_v27  ;;  %v1719_v23 = vld [vmem:[#allocation14 + $0x78] sm:$0xff]  ;;  %v1718_v27 = vld [vmem:[#allocation14 + $0x70] sm:$0xff] }
 0x27e   :  { %2161 = vmatprep.subr.mxu0 %v1031_v29  ;;  %1511 = vmatprep.subr.mxu1 %v1105_v30  ;;  %v1195_v24 = vld [vmem:[#allocation11 + $0x860] sm:$0xff]  ;;  %v1194_v29 = vld [vmem:[#allocation11 + $0x858] sm:$0xff]  ;;  %v1717_v30 = vld [vmem:[#allocation14 + $0x68] sm:$0xff] }
 0x27f   :  { %2162 = vmatpush3.msra.mxu0 %v951_v31  ;;  %1512 = vmatpush1.msra.mxu1 %v1104_v33  ;;  %v1190_v31 = vld [vmem:[#allocation11 + $0x838] sm:$0xff]  ;;  %v1716_v33 = vld [vmem:[#allocation14 + $0x60] sm:$0xff] }
 0x280   :  { %2163 = vmatprep.subr.mxu0 %v1026_v34  ;;  %1513 = vmatprep.subr.mxu1 %v1100_v36  ;;  %v1189_v34 = vld [vmem:[#allocation11 + $0x830] sm:$0xff]  ;;  %v1715_v36 = vld [vmem:[#allocation14 + $0x58] sm:$0xff] }
 0x281   :  { %2164 = vmatpush3.msra.mxu0 %v946_v39  ;;  %1514 = vmatpush1.msra.mxu1 %v1099_v40  ;;  %v1185_v39 = vld [vmem:[#allocation11 + $0x810] sm:$0xff] }
 0x282   :  { %2165 = vmatprep.subr.mxu0 %v1021_v41  ;;  %1515 = vmatprep.subr.mxu1 %v1095_v42  ;;  %v1714_v40 = vld [vmem:[#allocation14 + $0x50] sm:$0xff]  ;;  %v1184_v41 = vld [vmem:[#allocation11 + $0x808] sm:$0xff] }
 0x283   :  { %2166 = vmatpush3.msra.mxu0 %v941_v9  ;;  %1516 = vmatpush1.msra.mxu1 %v1094_v44  ;;  %v1713_v42 = vld [vmem:[#allocation14 + $0x48] sm:$0xff]  ;;  %v1712_v44 = vld [vmem:[#allocation14 + $0x40] sm:$0xff] }
 0x284   :  { %2167 = vmatprep.subr.mxu0 %v1016_v46  ;;  %1517 = vmatprep.subr.mxu1 %v1090_v47  ;;  %v1180_v9 = vld [vmem:[#allocation11 + $0x7e8] sm:$0xff]  ;;  %v1179_v46 = vld [vmem:[#allocation11 + $0x7e0] sm:$0xff] }
 0x285   :  { %2168 = vmatpush3.msra.mxu0 %v936_v49  ;;  %1518 = vmatpush1.msra.mxu1 %v1089_v50  ;;  %v1711_v47 = vld [vmem:[#allocation14 + $0x38] sm:$0xff]  ;;  %v1710_v50 = vld [vmem:[#allocation14 + $0x30] sm:$0xff] }
 0x286   :  { %2169 = vmatprep.subr.mxu0 %v1011_v51  ;;  %1519 = vmatprep.subr.mxu1 %v1245_v52  ;;  %v1175_v49 = vld [vmem:[#allocation11 + $0x7c0] sm:$0xff]  ;;  %v1174_v51 = vld [vmem:[#allocation11 + $0x7b8] sm:$0xff]  ;;  %v1709_v52 = vld [vmem:[#allocation14 + $0x28] sm:$0xff] }
 0x287   :  { %2170 = vmatpush3.msra.mxu0 %v931_v53  ;;  %1520 = vmatpush2.msra.mxu1 %v1244_v54  ;;  %v1170_v53 = vld [vmem:[#allocation11 + $0x798] sm:$0xff]  ;;  %v1708_v54 = vld [vmem:[#allocation14 + $0x20] sm:$0xff] }
 0x288   :  { %1623 = vmatmul.mubr.f32.vlgmr.msra.gmra.mxu0 %v2682_v19  ;;  %1521 = vmatprep.subr.mxu1 %v1240_v55  ;;  %v1220_v19 = vld [vmem:[#allocation11 + $0x928] sm:$0xff]  ;;  %v1169_v55 = vld [vmem:[#allocation11 + $0x790] sm:$0xff] }
 0x289   :  { %1522 = vmatpush2.msra.mxu1 %v1239_v57  ;;  %1844 = vmatprep.subr.mxu0 %v1735_v58  ;;  %v1707_v57 = vld [vmem:[#allocation14 + $0x18] sm:$0xff] }
 0x28a   :  { %1523 = vmatprep.subr.mxu1 %v1235_v59  ;;  %1845 = vmatpush1.msra.mxu0 %v1734_v60  ;;  %v1246_v58 = vld [vmem:[#allocation11 + $0x9f8] sm:$0xff]  ;;  %v1241_v60 = vld [vmem:[#allocation11 + $0x9d0] sm:$0xff] }
 0x28b   :  { %1524 = vmatpush2.msra.mxu1 %v1234_v61  ;;  %1846 = vmatprep.subr.mxu0 %v1733_v62  ;;  %v1166_v59 = vld [vmem:[#allocation11 + $0x778] sm:$0xff]  ;;  %v1161_v62 = vld [vmem:[#allocation11 + $0x750] sm:$0xff] }
 0x28c   :  { %1525 = vmatprep.subr.mxu1 %v1230_v63  ;;  %1847 = vmatpush1.msra.mxu0 %v1732_v0  ;;  %v1706_v61 = vld [vmem:[#allocation14 + $0x10] sm:$0xff]  ;;  %v1705_v63 = vld [vmem:[#allocation14 + $0x8] sm:$0xff] }
 0x28d   :  { %1526 = vmatpush2.msra.mxu1 %v1229_v1  ;;  %1848 = vmatprep.subr.mxu0 %v1731_v56  ;;  %v1236_v0 = vld [vmem:[#allocation11 + $0x9a8] sm:$0xff] }
 0x28e   :  { %1527 = vmatprep.subr.mxu1 %v1225_v2  ;;  %1849 = vmatpush1.msra.mxu0 %v1730_v32  ;;  %v1704_v1 = vld [vmem:[#allocation14] sm:$0xff]  ;;  %v1767_v2 = vld [vmem:[#allocation14 + $0x1f8] sm:$0xff] }
 0x28f   :  { %1528 = vmatpush2.msra.mxu1 %v1224_v38  ;;  %1850 = vmatprep.subr.mxu0 %v1729_v3  ;;  %v1156_v56 = vld [vmem:[#allocation11 + $0x728] sm:$0xff]  ;;  %v1231_v32 = vld [vmem:[#allocation11 + $0x980] sm:$0xff]  ;;  %v1766_v38 = vld [vmem:[#allocation14 + $0x1f0] sm:$0xff] }
 0x290   :  { %1529 = vmatprep.subr.mxu1 %v1220_v19  ;;  %1851 = vmatpush1.msra.mxu0 %v1728_v4  ;;  %v1151_v3 = vld [vmem:[#allocation11 + $0x700] sm:$0xff]  ;;  %v1765_v19 = vld [vmem:[#allocation14 + $0x1e8] sm:$0xff]  ;;  %v1226_v4 = vld [vmem:[#allocation11 + $0x958] sm:$0xff] }
 0x291   :  { %1530 = vmatpush2.msra.mxu1 %v1219_v5  ;;  %1852 = vmatprep.subr.mxu0 %v1727_v6  ;;  %v1764_v5 = vld [vmem:[#allocation14 + $0x1e0] sm:$0xff]  ;;  %v1763_v6 = vld [vmem:[#allocation14 + $0x1d8] sm:$0xff] }
 0x292   :  { %1531 = vmatprep.subr.mxu1 %v1215_v7  ;;  %1853 = vmatpush1.msra.mxu0 %v1726_v8  ;;  %v1221_v7 = vld [vmem:[#allocation11 + $0x930] sm:$0xff] }
 0x293   :  { %1532 = vmatpush2.msra.mxu1 %v1214_v10  ;;  %1854 = vmatprep.subr.mxu0 %v1725_v11  ;;  %v1762_v8 = vld [vmem:[#allocation14 + $0x1d0] sm:$0xff]  ;;  %v1761_v11 = vld [vmem:[#allocation14 + $0x1c8] sm:$0xff] }
 0x294   :  { %1533 = vmatprep.subr.mxu1 %v1210_v12  ;;  %1855 = vmatpush1.msra.mxu0 %v1724_v13  ;;  %v1141_v10 = vld [vmem:[#allocation11 + $0x6b0] sm:$0xff]  ;;  %v1216_v12 = vld [vmem:[#allocation11 + $0x908] sm:$0xff] }
 0x295   :  { %1534 = vmatpush2.msra.mxu1 %v1209_v14  ;;  %1856 = vmatprep.subr.mxu0 %v1723_v15  ;;  %v1760_v13 = vld [vmem:[#allocation14 + $0x1c0] sm:$0xff]  ;;  %v1759_v15 = vld [vmem:[#allocation14 + $0x1b8] sm:$0xff] }
 0x296   :  { %1535 = vmatprep.subr.mxu1 %v1205_v16  ;;  %1857 = vmatpush1.msra.mxu0 %v1722_v17  ;;  %v1136_v14 = vld [vmem:[#allocation11 + $0x688] sm:$0xff]  ;;  %v1211_v16 = vld [vmem:[#allocation11 + $0x8e0] sm:$0xff]  ;;  %v1758_v17 = vld [vmem:[#allocation14 + $0x1b0] sm:$0xff] }
 0x297   :  { %1536 = vmatpush2.msra.mxu1 %v1204_v18  ;;  %1858 = vmatprep.subr.mxu0 %v1721_v48  ;;  %v1131_v18 = vld [vmem:[#allocation11 + $0x660] sm:$0xff]  ;;  %v1757_v48 = vld [vmem:[#allocation14 + $0x1a8] sm:$0xff] }
 0x298   :  { %1537 = vmatprep.subr.mxu1 %v1200_v20  ;;  %1859 = vmatpush1.msra.mxu0 %v1720_v21  ;;  %v1206_v20 = vld [vmem:[#allocation11 + $0x8b8] sm:$0xff]  ;;  %v1756_v21 = vld [vmem:[#allocation14 + $0x1a0] sm:$0xff] }
 0x299   :  { %1538 = vmatpush2.msra.mxu1 %v1199_v22  ;;  %1860 = vmatprep.subr.mxu0 %v1719_v23  ;;  %v1126_v22 = vld [vmem:[#allocation11 + $0x638] sm:$0xff] }
 0x29a   :  { %1539 = vmatprep.subr.mxu1 %v1195_v24  ;;  %1861 = vmatpush1.msra.mxu0 %v1718_v27  ;;  %v1755_v23 = vld [vmem:[#allocation14 + $0x198] sm:$0xff]  ;;  %v1201_v24 = vld [vmem:[#allocation11 + $0x890] sm:$0xff] }
 0x29b   :  { %1540 = vmatpush2.msra.mxu1 %v1194_v29  ;;  %1862 = vmatprep.subr.mxu0 %v1717_v30  ;;  %v1754_v27 = vld [vmem:[#allocation14 + $0x190] sm:$0xff]  ;;  %v1753_v30 = vld [vmem:[#allocation14 + $0x188] sm:$0xff] }
 0x29c   :  { %1541 = vmatprep.subr.mxu1 %v1190_v31  ;;  %1863 = vmatpush1.msra.mxu0 %v1716_v33  ;;  %v1121_v29 = vld [vmem:[#allocation11 + $0x610] sm:$0xff]  ;;  %v1196_v31 = vld [vmem:[#allocation11 + $0x868] sm:$0xff] }
 0x29d   :  { %1542 = vmatpush2.msra.mxu1 %v1189_v34  ;;  %1864 = vmatprep.subr.mxu0 %v1715_v36  ;;  %v1752_v33 = vld [vmem:[#allocation14 + $0x180] sm:$0xff]  ;;  %v1751_v36 = vld [vmem:[#allocation14 + $0x178] sm:$0xff] }
 0x29e   :  { %1543 = vmatprep.subr.mxu1 %v1185_v39  ;;  %1865 = vmatpush1.msra.mxu0 %v1714_v40  ;;  %v1116_v34 = vld [vmem:[#allocation11 + $0x5e8] sm:$0xff]  ;;  %v1191_v39 = vld [vmem:[#allocation11 + $0x840] sm:$0xff]  ;;  %v1750_v40 = vld [vmem:[#allocation14 + $0x170] sm:$0xff] }
 0x29f   :  { %1544 = vmatpush2.msra.mxu1 %v1184_v41  ;;  %1866 = vmatprep.subr.mxu0 %v1713_v42  ;;  %v1111_v41 = vld [vmem:[#allocation11 + $0x5c0] sm:$0xff]  ;;  %v1749_v42 = vld [vmem:[#allocation14 + $0x168] sm:$0xff] }
 0x2a0   :  { %1545 = vmatprep.subr.mxu1 %v1180_v9  ;;  %1867 = vmatpush1.msra.mxu0 %v1712_v44  ;;  %v1186_v9 = vld [vmem:[#allocation11 + $0x818] sm:$0xff]  ;;  %v1748_v44 = vld [vmem:[#allocation14 + $0x160] sm:$0xff] }
 0x2a1   :  { %1546 = vmatpush2.msra.mxu1 %v1179_v46  ;;  %1868 = vmatprep.subr.mxu0 %v1711_v47  ;;  %v1106_v46 = vld [vmem:[#allocation11 + $0x598] sm:$0xff] }
 0x2a2   :  { %1547 = vmatprep.subr.mxu1 %v1175_v49  ;;  %1869 = vmatpush1.msra.mxu0 %v1710_v50  ;;  %v1747_v47 = vld [vmem:[#allocation14 + $0x158] sm:$0xff]  ;;  %v1181_v49 = vld [vmem:[#allocation11 + $0x7f0] sm:$0xff] }
 0x2a3   :  { %1548 = vmatpush2.msra.mxu1 %v1174_v51  ;;  %1870 = vmatprep.subr.mxu0 %v1709_v52  ;;  %v1746_v50 = vld [vmem:[#allocation14 + $0x150] sm:$0xff]  ;;  %v1745_v52 = vld [vmem:[#allocation14 + $0x148] sm:$0xff] }
 0x2a4   :  { %1549 = vmatprep.subr.mxu1 %v1170_v53  ;;  %1871 = vmatpush1.msra.mxu0 %v1708_v54  ;;  %v1101_v51 = vld [vmem:[#allocation11 + $0x570] sm:$0xff]  ;;  %v1176_v53 = vld [vmem:[#allocation11 + $0x7c8] sm:$0xff] }
 0x2a5   :  { %1550 = vmatpush2.msra.mxu1 %v1169_v55  ;;  %1872 = vmatprep.subr.mxu0 %v1707_v57  ;;  %v1744_v54 = vld [vmem:[#allocation14 + $0x140] sm:$0xff]  ;;  %v1743_v57 = vld [vmem:[#allocation14 + $0x138] sm:$0xff] }
 0x2a6   :  { %1552 = vmatmul.mubr.f32.vlgmr.msra.gmra.mxu1 %v2693_v45  ;;  %2174 = vmatprep.subr.mxu1 %v1246_v58  ;;  %v1096_v55 = vld [vmem:[#allocation11 + $0x548] sm:$0xff]  ;;  %v1171_v58 = vld [vmem:[#allocation11 + $0x7a0] sm:$0xff] }
 0x2a7   :  { %2175 = vmatpush3.msra.mxu1 %v1166_v59  ;;  %1692 = vmatprep.mubr.f32.mxu1 %v2691_v43  ;;  %v1146_v43 = vld [vmem:[#allocation11 + $0x6d8] sm:$0xff] }
 0x2a8   :  { %2176 = vmatprep.subr.mxu1 %v1241_v60  ;;  %1873 = vmatpush1.msra.mxu0 %v1706_v61  ;;  %v1742_v59 = vld [vmem:[#allocation14 + $0x130] sm:$0xff]  ;;  %v1091_v60 = vld [vmem:[#allocation11 + $0x520] sm:$0xff]  ;;  %v1741_v61 = vld [vmem:[#allocation14 + $0x128] sm:$0xff] }
 0x2a9   :  { %2177 = vmatpush3.msra.mxu1 %v1161_v62  ;;  %1874 = vmatprep.subr.mxu0 %v1705_v63  ;;  %v1740_v62 = vld [vmem:[#allocation14 + $0x120] sm:$0xff]  ;;  %v1739_v63 = vld [vmem:[#allocation14 + $0x118] sm:$0xff] }
 0x2aa   :  { %2178 = vmatprep.subr.mxu1 %v1236_v0  ;;  %1875 = vmatpush1.msra.mxu0 %v1704_v1  ;;  %v1799_v0 = vld [vmem:[#allocation14 + $0x2f8] sm:$0xff]  ;;  %v1738_v1 = vld [vmem:[#allocation14 + $0x110] sm:$0xff] }
 0x2ab   :  { %2179 = vmatpush3.msra.mxu1 %v1156_v56  ;;  %1876 = vmatprep.subr.mxu0 %v1767_v2  ;;  %v1798_v56 = vld [vmem:[#allocation14 + $0x2f0] sm:$0xff]  ;;  %v1737_v2 = vld [vmem:[#allocation14 + $0x108] sm:$0xff] }
 0x2ac   :  { %2180 = vmatprep.subr.mxu1 %v1231_v32  ;;  %1877 = vmatpush2.msra.mxu0 %v1766_v38  ;;  %v1797_v32 = vld [vmem:[#allocation14 + $0x2e8] sm:$0xff]  ;;  %v1736_v38 = vld [vmem:[#allocation14 + $0x100] sm:$0xff] }
 0x2ad   :  { %2181 = vmatpush3.msra.mxu1 %v1151_v3  ;;  %1878 = vmatprep.subr.mxu0 %v1765_v19  ;;  %v1796_v3 = vld [vmem:[#allocation14 + $0x2e0] sm:$0xff]  ;;  %v1795_v19 = vld [vmem:[#allocation14 + $0x2d8] sm:$0xff] }
 0x2ae   :  { %2182 = vmatprep.subr.mxu1 %v1226_v4  ;;  %1879 = vmatpush2.msra.mxu0 %v1764_v5  ;;  %v1794_v4 = vld [vmem:[#allocation14 + $0x2d0] sm:$0xff]  ;;  %v1793_v5 = vld [vmem:[#allocation14 + $0x2c8] sm:$0xff] }
 0x2af   :  { %2183 = vmatpush3.msra.mxu1 %v1146_v43  ;;  %1880 = vmatprep.subr.mxu0 %v1763_v6  ;;  %v1792_v43 = vld [vmem:[#allocation14 + $0x2c0] sm:$0xff]  ;;  %v1790_v6 = vld [vmem:[#allocation14 + $0x2b0] sm:$0xff] }
 0x2b0   :  { %2184 = vmatprep.subr.mxu1 %v1221_v7  ;;  %1881 = vmatpush2.msra.mxu0 %v1762_v8  ;;  %v1789_v7 = vld [vmem:[#allocation14 + $0x2a8] sm:$0xff]  ;;  %v1788_v8 = vld [vmem:[#allocation14 + $0x2a0] sm:$0xff] }
 0x2b1   :  { %2185 = vmatpush3.msra.mxu1 %v1141_v10  ;;  %1882 = vmatprep.subr.mxu0 %v1761_v11  ;;  %v1787_v10 = vld [vmem:[#allocation14 + $0x298] sm:$0xff]  ;;  %v1786_v11 = vld [vmem:[#allocation14 + $0x290] sm:$0xff] }
 0x2b2   :  { %2186 = vmatprep.subr.mxu1 %v1216_v12  ;;  %1883 = vmatpush2.msra.mxu0 %v1760_v13  ;;  %v1785_v12 = vld [vmem:[#allocation14 + $0x288] sm:$0xff]  ;;  %v1784_v13 = vld [vmem:[#allocation14 + $0x280] sm:$0xff] }
 0x2b3   :  { %2187 = vmatpush3.msra.mxu1 %v1136_v14  ;;  %1884 = vmatprep.subr.mxu0 %v1759_v15  ;;  %v1783_v14 = vld [vmem:[#allocation14 + $0x278] sm:$0xff]  ;;  %v1782_v15 = vld [vmem:[#allocation14 + $0x270] sm:$0xff] }
 0x2b4   :  { %2188 = vmatprep.subr.mxu1 %v1211_v16  ;;  %1885 = vmatpush2.msra.mxu0 %v1758_v17  ;;  %v1781_v16 = vld [vmem:[#allocation14 + $0x268] sm:$0xff]  ;;  %v1780_v17 = vld [vmem:[#allocation14 + $0x260] sm:$0xff] }
 0x2b5   :  { %2189 = vmatpush3.msra.mxu1 %v1131_v18  ;;  %1886 = vmatprep.subr.mxu0 %v1757_v48  ;;  %v1779_v18 = vld [vmem:[#allocation14 + $0x258] sm:$0xff]  ;;  %v1778_v48 = vld [vmem:[#allocation14 + $0x250] sm:$0xff] }
 0x2b6   :  { %2190 = vmatprep.subr.mxu1 %v1206_v20  ;;  %1887 = vmatpush2.msra.mxu0 %v1756_v21  ;;  %v1777_v20 = vld [vmem:[#allocation14 + $0x248] sm:$0xff]  ;;  %v1776_v21 = vld [vmem:[#allocation14 + $0x240] sm:$0xff] }
 0x2b7   :  { %2191 = vmatpush3.msra.mxu1 %v1126_v22  ;;  %1888 = vmatprep.subr.mxu0 %v1755_v23  ;;  %v1775_v22 = vld [vmem:[#allocation14 + $0x238] sm:$0xff]  ;;  %v1774_v23 = vld [vmem:[#allocation14 + $0x230] sm:$0xff] }
 0x2b8   :  { %2192 = vmatprep.subr.mxu1 %v1201_v24  ;;  %1889 = vmatpush2.msra.mxu0 %v1754_v27  ;;  %v1773_v24 = vld [vmem:[#allocation14 + $0x228] sm:$0xff]  ;;  %v1772_v27 = vld [vmem:[#allocation14 + $0x220] sm:$0xff] }
 0x2b9   :  { %2193 = vmatpush3.msra.mxu1 %v1121_v29  ;;  %1890 = vmatprep.subr.mxu0 %v1753_v30  ;;  %v1771_v29 = vld [vmem:[#allocation14 + $0x218] sm:$0xff]  ;;  %v1770_v30 = vld [vmem:[#allocation14 + $0x210] sm:$0xff] }
 0x2ba   :  { %2194 = vmatprep.subr.mxu1 %v1196_v31  ;;  %1891 = vmatpush2.msra.mxu0 %v1752_v33  ;;  %v1769_v31 = vld [vmem:[#allocation14 + $0x208] sm:$0xff]  ;;  %v1768_v33 = vld [vmem:[#allocation14 + $0x200] sm:$0xff] }
 0x2bb   :  { %2195 = vmatpush3.msra.mxu1 %v1116_v34  ;;  %1892 = vmatprep.subr.mxu0 %v1751_v36  ;;  %v1831_v34 = vld [vmem:[#allocation14 + $0x3f8] sm:$0xff]  ;;  %v1830_v36 = vld [vmem:[#allocation14 + $0x3f0] sm:$0xff] }
 0x2bc   :  { %2196 = vmatprep.subr.mxu1 %v1191_v39  ;;  %1893 = vmatpush2.msra.mxu0 %v1750_v40  ;;  %v1829_v39 = vld [vmem:[#allocation14 + $0x3e8] sm:$0xff]  ;;  %v1828_v40 = vld [vmem:[#allocation14 + $0x3e0] sm:$0xff] }
 0x2bd   :  { %2197 = vmatpush3.msra.mxu1 %v1111_v41  ;;  %1894 = vmatprep.subr.mxu0 %v1749_v42  ;;  %v1827_v41 = vld [vmem:[#allocation14 + $0x3d8] sm:$0xff]  ;;  %v1826_v42 = vld [vmem:[#allocation14 + $0x3d0] sm:$0xff] }
 0x2be   :  { %2198 = vmatprep.subr.mxu1 %v1186_v9  ;;  %1895 = vmatpush2.msra.mxu0 %v1748_v44  ;;  %v1825_v9 = vld [vmem:[#allocation14 + $0x3c8] sm:$0xff]  ;;  %v1824_v44 = vld [vmem:[#allocation14 + $0x3c0] sm:$0xff] }
 0x2bf   :  { %2199 = vmatpush3.msra.mxu1 %v1106_v46  ;;  %1896 = vmatprep.subr.mxu0 %v1747_v47  ;;  %v1823_v46 = vld [vmem:[#allocation14 + $0x3b8] sm:$0xff]  ;;  %v1822_v47 = vld [vmem:[#allocation14 + $0x3b0] sm:$0xff] }
 0x2c0   :  { %2200 = vmatprep.subr.mxu1 %v1181_v49  ;;  %1897 = vmatpush2.msra.mxu0 %v1746_v50  ;;  %v1821_v49 = vld [vmem:[#allocation14 + $0x3a8] sm:$0xff]  ;;  %v1820_v50 = vld [vmem:[#allocation14 + $0x3a0] sm:$0xff] }
 0x2c1   :  { %2201 = vmatpush3.msra.mxu1 %v1101_v51  ;;  %1898 = vmatprep.subr.mxu0 %v1745_v52  ;;  %v1819_v51 = vld [vmem:[#allocation14 + $0x398] sm:$0xff]  ;;  %v1818_v52 = vld [vmem:[#allocation14 + $0x390] sm:$0xff] }
 0x2c2   :  { %2202 = vmatprep.subr.mxu1 %v1176_v53  ;;  %1899 = vmatpush2.msra.mxu0 %v1744_v54  ;;  %v1817_v53 = vld [vmem:[#allocation14 + $0x388] sm:$0xff]  ;;  %v1816_v54 = vld [vmem:[#allocation14 + $0x380] sm:$0xff] }
 0x2c3   :  { %2203 = vmatpush3.msra.mxu1 %v1096_v55  ;;  %1900 = vmatprep.subr.mxu0 %v1743_v57  ;;  %v1815_v55 = vld [vmem:[#allocation14 + $0x378] sm:$0xff]  ;;  %v1814_v57 = vld [vmem:[#allocation14 + $0x370] sm:$0xff] }
 0x2c4   :  { %2204 = vmatprep.subr.mxu1 %v1171_v58  ;;  %1901 = vmatpush2.msra.mxu0 %v1742_v59  ;;  %v1813_v58 = vld [vmem:[#allocation14 + $0x368] sm:$0xff]  ;;  %v1812_v59 = vld [vmem:[#allocation14 + $0x360] sm:$0xff] }
 0x2c5   :  { %2205 = vmatpush3.msra.mxu1 %v1091_v60  ;;  %1902 = vmatprep.subr.mxu0 %v1741_v61  ;;  %v1811_v60 = vld [vmem:[#allocation14 + $0x358] sm:$0xff]  ;;  %v1810_v61 = vld [vmem:[#allocation14 + $0x350] sm:$0xff] }
 0x2c6   :  { %1693 = vmatmul.mubr.f32.vlgmr.msra.gmra.mxu1 %v2693_v45  ;;  %1903 = vmatpush2.msra.mxu0 %v1740_v62  ;;  %v1791_v45 = vld [vmem:[#allocation14 + $0x2b8] sm:$0xff]  ;;  %v1809_v62 = vld [vmem:[#allocation14 + $0x348] sm:$0xff] }
 0x2c7   :  { %1904 = vmatprep.subr.mxu0 %v1739_v63  ;;  %1915 = vmatprep.subr.mxu1 %v1799_v0  ;;  %v1808_v63 = vld [vmem:[#allocation14 + $0x340] sm:$0xff]  ;;  %v1807_v0 = vld [vmem:[#allocation14 + $0x338] sm:$0xff] }
 0x2c8   :  { %1905 = vmatpush2.msra.mxu0 %v1738_v1  ;;  %1916 = vmatpush1.msra.mxu1 %v1798_v56  ;;  %v1806_v1 = vld [vmem:[#allocation14 + $0x330] sm:$0xff]  ;;  %v1805_v56 = vld [vmem:[#allocation14 + $0x328] sm:$0xff] }
 0x2c9   :  { %1906 = vmatprep.subr.mxu0 %v1737_v2  ;;  %1917 = vmatprep.subr.mxu1 %v1797_v32  ;;  %v1804_v2 = vld [vmem:[#allocation14 + $0x320] sm:$0xff]  ;;  %v1803_v32 = vld [vmem:[#allocation14 + $0x318] sm:$0xff] }
 0x2ca   :  { %1907 = vmatpush2.msra.mxu0 %v1736_v38  ;;  %1918 = vmatpush1.msra.mxu1 %v1796_v3  ;;  %v1802_v38 = vld [vmem:[#allocation14 + $0x310] sm:$0xff]  ;;  %v1801_v3 = vld [vmem:[#allocation14 + $0x308] sm:$0xff] }
 0x2cb   :  { %1919 = vmatprep.subr.mxu1 %v1795_v19  ;;  %v1800_v19 = vld [vmem:[#allocation14 + $0x300] sm:$0xff] }
 0x2cc   :  { %1920 = vmatpush1.msra.mxu1 %v1794_v4  ;;  %v2704_v4 = vld [vmem:[#allocation13] sm:$0x1f] }
 0x2cd   :  { %1921 = vmatprep.subr.mxu1 %v1793_v5 }
 0x2ce   :  { %1922 = vmatpush1.msra.mxu1 %v1792_v43  ;;  %v1252_v43 = vrot.slane %v2704_v4, %v2645_v26 }
 0x2cf   :  { %1923 = vmatprep.subr.mxu1 %v1791_v45  ;;  %v1256_v45 = vrot.slane %v2704_v4, %v2648_v28 }
 0x2d0   :  { %1924 = vmatpush1.msra.mxu1 %v1790_v6 }
 0x2d1   :  { %1925 = vmatprep.subr.mxu1 %v1789_v7 }
 0x2d2   :  { %1926 = vmatpush1.msra.mxu1 %v1788_v8 }
 0x2d3   :  { %1927 = vmatprep.subr.mxu1 %v1787_v10 }
 0x2d4   :  { %1928 = vmatpush1.msra.mxu1 %v1786_v11 }
 0x2d5   :  { %1929 = vmatprep.subr.mxu1 %v1785_v12 }
 0x2d6   :  { %1930 = vmatpush1.msra.mxu1 %v1784_v13 }
 0x2d7   :  { %1931 = vmatprep.subr.mxu1 %v1783_v14 }
 0x2d8   :  { %1932 = vmatpush1.msra.mxu1 %v1782_v15 }
 0x2d9   :  { %1933 = vmatprep.subr.mxu1 %v1781_v16 }
 0x2da   :  { %1934 = vmatpush1.msra.mxu1 %v1780_v17  ;;  %v1260_v17 = vrot.slane %v2704_v4, %v2655_v35  ;;  %v2003_v35 = vld [vmem:[%s2837_s9 + $0x78] sm:$0xff] }
 0x2db   :  { %1935 = vmatprep.subr.mxu1 %v1779_v18  ;;  %v1264_v18 = vrot.slane %v2704_v4, %v2658_v37  ;;  %v2018_v37 = vld [vmem:[%s2837_s9 + $0xf0] sm:$0xff] }
 0x2dc   :  { %1936 = vmatpush1.msra.mxu1 %v1778_v48 }
 0x2dd   :  { %1937 = vmatprep.subr.mxu1 %v1777_v20 }
 0x2de   :  { %1938 = vmatpush1.msra.mxu1 %v1776_v21 }
 0x2df   :  { %1939 = vmatprep.subr.mxu1 %v1775_v22 }
 0x2e0   :  { %1940 = vmatpush1.msra.mxu1 %v1774_v23 }
 0x2e1   :  { %1941 = vmatprep.subr.mxu1 %v1773_v24 }
 0x2e2   :  { %1942 = vmatpush1.msra.mxu1 %v1772_v27 }
 0x2e3   :  { %1943 = vmatprep.subr.mxu1 %v1771_v29 }
 0x2e4   :  { %1944 = vmatpush1.msra.mxu1 %v1770_v30 }
 0x2e5   :  { %1945 = vmatprep.subr.mxu1 %v1769_v31  ;;  %v1340_v5 = vpop.f32.mrf.mxu0  ;;  %v2019_v31 = vld [vmem:[%s2837_s9 + $0xf8] sm:$0xff] }
 0x2e6   :  { %1946 = vmatpush1.msra.mxu1 %v1768_v33  ;;  %v1341_v7 = vadd.f32 %v1340_v5, %v1252_v43  ;;  %2209 = vmatprep.subr.mxu0 %v2019_v31  ;;  %v2002_v33 = vld [vmem:[%s2837_s9 + $0x70] sm:$0xff]  ;;  %v2005_v5 = vld [vmem:[%s2837_s9 + $0x88] sm:$0xff] }
 0x2e7   :  { %1947 = vmatprep.subr.mxu1 %v1831_v34  ;;  %v1342_v6 = vpop.f32.mrf.mxu0  ;;  %v2017_v34 = vld [vmem:[%s2837_s9 + $0xe8] sm:$0xff] }
 0x2e8   :  { %1948 = vmatpush2.msra.mxu1 %v1830_v36  ;;  %v1343_v10 = vadd.f32 %v1342_v6, %v1256_v45  ;;  %v2001_v36 = vld [vmem:[%s2837_s9 + $0x68] sm:$0xff]  ;;  %v2004_v45 = vld [vmem:[%s2837_s9 + $0x80] sm:$0xff] }
 0x2e9   :  { %1949 = vmatprep.subr.mxu1 %v1829_v39  ;;  %v2016_v39 = vld [vmem:[%s2837_s9 + $0xe0] sm:$0xff]  ;;  %v1989_v43 = vld [vmem:[%s2837_s9 + $0x8] sm:$0xff] }
 0x2ea   :  { %1950 = vmatpush2.msra.mxu1 %v1828_v40  ;;  %v2000_v40 = vld [vmem:[%s2837_s9 + $0x60] sm:$0xff] }
 0x2eb   :  { %1951 = vmatprep.subr.mxu1 %v1827_v41  ;;  %v2015_v41 = vld [vmem:[%s2837_s9 + $0xd8] sm:$0xff]  ;;  %v1988_v6 = vld [vmem:[%s2837_s9] sm:$0xff] }
 0x2ec   :  { %1952 = vmatpush2.msra.mxu1 %v1826_v42  ;;  %v1999_v42 = vld [vmem:[%s2837_s9 + $0x58] sm:$0xff] }
 0x2ed   :  { %1953 = vmatprep.subr.mxu1 %v1825_v9  ;;  %v2014_v9 = vld [vmem:[%s2837_s9 + $0xd0] sm:$0xff] }
 0x2ee   :  { %1954 = vmatpush2.msra.mxu1 %v1824_v44  ;;  %v1998_v44 = vld [vmem:[%s2837_s9 + $0x50] sm:$0xff] }
 0x2ef   :  { %1955 = vmatprep.subr.mxu1 %v1823_v46  ;;  %v2013_v46 = vld [vmem:[%s2837_s9 + $0xc8] sm:$0xff] }
 0x2f0   :  { %1956 = vmatpush2.msra.mxu1 %v1822_v47  ;;  %v1997_v47 = vld [vmem:[%s2837_s9 + $0x48] sm:$0xff] }
 0x2f1   :  { %1957 = vmatprep.subr.mxu1 %v1821_v49  ;;  %v2012_v49 = vld [vmem:[%s2837_s9 + $0xc0] sm:$0xff] }
 0x2f2   :  { %1958 = vmatpush2.msra.mxu1 %v1820_v50 }
 0x2f3   :  { %1959 = vmatprep.subr.mxu1 %v1819_v51  ;;  %v1996_v51 = vld [vmem:[%s2837_s9 + $0x40] sm:$0xff] }
 0x2f4   :  { %1960 = vmatpush2.msra.mxu1 %v1818_v52  ;;  %v2011_v52 = vld [vmem:[%s2837_s9 + $0xb8] sm:$0xff] }
 0x2f5   :  { %1961 = vmatprep.subr.mxu1 %v1817_v53  ;;  %v1995_v53 = vld [vmem:[%s2837_s9 + $0x38] sm:$0xff] }
 0x2f6   :  { %1962 = vmatpush2.msra.mxu1 %v1816_v54  ;;  %v1267_v54 = vsub.s32 4, %v2642_v25  ;;  %v1993_v25 = vld [vmem:[%s2837_s9 + $0x28] sm:$0xff] }
 0x2f7   :  { %1963 = vmatprep.subr.mxu1 %v1815_v55  ;;  %v2010_v55 = vld [vmem:[%s2837_s9 + $0xb0] sm:$0xff] }
 0x2f8   :  { %1964 = vmatpush2.msra.mxu1 %v1814_v57 }
 0x2f9   :  { %1965 = vmatprep.subr.mxu1 %v1813_v58  ;;  %v1994_v58 = vld [vmem:[%s2837_s9 + $0x30] sm:$0xff] }
 0x2fa   :  { %1966 = vmatpush2.msra.mxu1 %v1812_v59  ;;  %v2009_v59 = vld [vmem:[%s2837_s9 + $0xa8] sm:$0xff] }
 0x2fb   :  { %1967 = vmatprep.subr.mxu1 %v1811_v60  ;;  %v1268_v60 = vrot.slane %v2704_v4, %v1267_v54  ;;  %v1990_v4 = vld [vmem:[%s2837_s9 + $0x10] sm:$0xff] }
 0x2fc   :  { %1968 = vmatpush2.msra.mxu1 %v1810_v61 }
 0x2fd   :  { %1969 = vmatprep.subr.mxu1 %v1809_v62  ;;  %v2008_v62 = vld [vmem:[%s2837_s9 + $0xa0] sm:$0xff] }
 0x2fe   :  { %1970 = vmatpush2.msra.mxu1 %v1808_v63 }
 0x2ff   :  { %1971 = vmatprep.subr.mxu1 %v1807_v0  ;;  %v1992_v0 = vld [vmem:[%s2837_s9 + $0x20] sm:$0xff] }
 0x300   :  { %1972 = vmatpush2.msra.mxu1 %v1806_v1 }
 0x301   :  { %1973 = vmatprep.subr.mxu1 %v1805_v56 }
 0x302   :  { %1974 = vmatpush2.msra.mxu1 %v1804_v2 }
 0x303   :  { %1975 = vmatprep.subr.mxu1 %v1803_v32 }
 0x304   :  { %1976 = vmatpush2.msra.mxu1 %v1802_v38  ;;  %v2007_v38 = vld [vmem:[%s2837_s9 + $0x98] sm:$0xff] }
 0x305   :  { %1977 = vmatprep.subr.mxu1 %v1801_v3  ;;  %v1991_v3 = vld [vmem:[%s2837_s9 + $0x18] sm:$0xff] }
 0x306   :  { %1978 = vmatpush2.msra.mxu1 %v1800_v19  ;;  %v2006_v19 = vld [vmem:[%s2837_s9 + $0x90] sm:$0xff] }
 0x325   :  { %v1482_v16 = vpop.f32.mrf.mxu0 }
 0x326   :  { %v1411_v8 = vpop.f32.mrf.mxu1  ;;  %v1483_v20 = vadd.f32 %v1482_v16, %v1260_v17 }
 0x327   :  { %v1412_v11 = vadd.f32 %v1411_v8, %v1341_v7  ;;  %v1484_v48 = vpop.f32.mrf.mxu0  ;;  %v1832_v7 = vld [vmem:[#allocation16] sm:$0x3] }
 0x328   :  { %v1413_v12 = vpop.f32.mrf.mxu1  ;;  %v1485_v22 = vadd.f32 %v1484_v48, %v1264_v18 }
 0x329   :  { %v1414_v13 = vadd.f32 %v1413_v12, %v1343_v10  ;;  %v1700_v15 = vmax.f32 %v1412_v11, 0.0  ;;  %v1837_v10 = vrot.slane %v1832_v7, %v2645_v26  ;;  %v1841_v11 = vrot.slane %v1832_v7, %v2648_v28 }
 0x32b   :  { %v1701_v14 = vmax.f32 %v1414_v13, 0.0 }
 0x32d   :  { %1908 = vmatprep.mubr.f32.mxu0 %v1701_v14 }
 0x32e   :  { %1909 = vmatmul.mubr.f32.vlgmr.msra.gmra.mxu0 %v1700_v15 }
 0x32f   :  { %2210 = vmatpush3.msra.mxu0 %v2003_v35 }
 0x330   :  { %2211 = vmatprep.subr.mxu0 %v2018_v37 }
 0x331   :  { %2212 = vmatpush3.msra.mxu0 %v2002_v33 }
 0x332   :  { %2213 = vmatprep.subr.mxu0 %v2017_v34 }
 0x333   :  { %2214 = vmatpush3.msra.mxu0 %v2001_v36 }
 0x334   :  { %2215 = vmatprep.subr.mxu0 %v2016_v39 }
 0x335   :  { %2216 = vmatpush3.msra.mxu0 %v2000_v40 }
 0x336   :  { %2217 = vmatprep.subr.mxu0 %v2015_v41 }
 0x337   :  { %2218 = vmatpush3.msra.mxu0 %v1999_v42 }
 0x338   :  { %2219 = vmatprep.subr.mxu0 %v2014_v9 }
 0x339   :  { %2220 = vmatpush3.msra.mxu0 %v1998_v44 }
 0x33a   :  { %2221 = vmatprep.subr.mxu0 %v2013_v46 }
 0x33b   :  { %2222 = vmatpush3.msra.mxu0 %v1997_v47 }
 0x33c   :  { %2223 = vmatprep.subr.mxu0 %v2012_v49 }
 0x33d   :  { %2224 = vmatpush3.msra.mxu0 %v1996_v51 }
 0x33e   :  { %2225 = vmatprep.subr.mxu0 %v2011_v52 }
 0x33f   :  { %2226 = vmatpush3.msra.mxu0 %v1995_v53 }
 0x340   :  { %2227 = vmatprep.subr.mxu0 %v2010_v55 }
 0x341   :  { %2228 = vmatpush3.msra.mxu0 %v1994_v58 }
 0x342   :  { %2229 = vmatprep.subr.mxu0 %v2009_v59 }
 0x343   :  { %2230 = vmatpush3.msra.mxu0 %v1993_v25 }
 0x344   :  { %2231 = vmatprep.subr.mxu0 %v2008_v62 }
 0x345   :  { %2232 = vmatpush3.msra.mxu0 %v1992_v0 }
 0x346   :  { %2233 = vmatprep.subr.mxu0 %v2007_v38 }
 0x347   :  { %2234 = vmatpush3.msra.mxu0 %v1991_v3 }
 0x348   :  { %v2171_v50 = vpop.f32.mrf.mxu0  ;;  %2235 = vmatprep.subr.mxu0 %v2006_v19 }
 0x349   :  { %2236 = vmatpush3.msra.mxu0 %v1990_v4 }
 0x34a   :  { %v2172_v57 = vpop.f32.mrf.mxu0  ;;  %2237 = vmatprep.subr.mxu0 %v2005_v5 }
 0x34b   :  { %v2173_v61 = vadd.f32 %v2172_v57, %v2171_v50  ;;  %2238 = vmatpush3.msra.mxu0 %v1989_v43 }
 0x34c   :  { %2239 = vmatprep.subr.mxu0 %v2004_v45 }
 0x34d   :  { %v1625_v56 = vadd.f32 %v2173_v61, %v1268_v60  ;;  %2240 = vmatpush3.msra.mxu0 %v1988_v6 }
 0x366   :  { %v1553_v21 = vpop.f32.mrf.mxu1 }
 0x367   :  { %v1554_v23 = vadd.f32 %v1553_v21, %v1483_v20 }
 0x368   :  { %v1555_v24 = vpop.f32.mrf.mxu1 }
 0x369   :  { %v1556_v27 = vadd.f32 %v1555_v24, %v1485_v22  ;;  %v1702_v30 = vmax.f32 %v1554_v23, 0.0  ;;  %v2138_v22 = vld [vmem:[#allocation17] ss:$0 sm:$0xff] }
 0x36b   :  { %v1703_v29 = vmax.f32 %v1556_v27, 0.0 }
 0x36d   :  { %1979 = vmatprep.mubr.f32.mxu1 %v1703_v29 }
 0x36e   :  { %1980 = vmatmul.mubr.f32.vlgmr.msra.gmra.mxu1 %v1702_v30 }
 0x386   :  { %v2206_v63 = vpop.f32.mrf.mxu1 }
 0x388   :  { %v2207_v1 = vpop.f32.mrf.mxu1 }
 0x389   :  { %v2208_v2 = vadd.f32 %v2207_v1, %v2206_v63 }
 0x38b   :  { %v1695_v32 = vadd.f32 %v2208_v2, %v1625_v56 }
 0x38d   :  { %1699 = vst.msk [vmem:[#allocation19] sm:$0xff] %vm1698_vm1, %v1695_v32 }
 0x3ee   :  { %v1910_v8 = vpop.f32.mrf.mxu0 }
 0x3ef   :  { %v1911_v13 = vadd.f32 %v1910_v8, %v1837_v10 }
 0x3f0   :  { %v1912_v12 = vpop.f32.mrf.mxu0 }
 0x3f1   :  { %v1913_v15 = vadd.f32 %v1912_v12, %v1841_v11 }
 0x42e   :  { %v1981_v14 = vpop.f32.mrf.mxu1 }
 0x42f   :  { %v1982_v16 = vadd.f32 %v1981_v14, %v1911_v13 }
 0x430   :  { %v1983_v17 = vpop.f32.mrf.mxu1 }
 0x431   :  { %v1984_v18 = vadd.f32 %v1983_v17, %v1913_v15  ;;  %v1986_v20 = vmax.f32 %v1982_v16, 0.0 }
 0x433   :  { %v1987_v48 = vmax.f32 %v1984_v18, 0.0 }
 0x435   :  { %2091 = vmatprep.mubr.f32.mxu0 %v1987_v48 }
 0x436   :  { %2092 = vmatmul.mubr.f32.vlgmr.msra.gmra.mxu0 %v1986_v20 }
 0x4f6   :  { %v2241_v21 = vpop.f32.mrf.mxu0 }
 0x4f8   :  { %v2242_v23 = vpop.f32.mrf.mxu0 }
 0x4f9   :  { %v2243_v24 = vadd.f32 %v2242_v23, %v2241_v21 }
 0x4fb   :  { %v2094_v27 = vadd.f32 %v2243_v24, %v2138_v22 }
 0x4fd   :  { %2097 = vst.msk [vmem:[#allocation20] sm:$0xff] %vm1698_vm1, %v2094_v27 }
 0x4fe   :  { %2102 = vsyncadd [#allocation4], 96  ;;  %s2538_s9 = smov [#allocation19]  }
 0x4ff   :  { %s2103_s2 = sshll.u32 %s2538_s9, 4  ;;  %s2104_s2 = int_to_ptr.vmem [resolvable:$true] %s2103_s2 }
 0x500   :  { %s2464_s26 = scalar_lea.vmem %s2104_s2, 32  ;;  %s2468_s27 = scalar_lea.vmem %s2104_s2, 128 }
 0x501   :  { %p2465_p8 = scmp.ne.s32.totalorder %s2104_s2, %s2464_s26  ;;  %p2469_p9 = scmp.lt.s32.totalorder %s2104_s2, %s2104_s2 }
 0x502   :  { %p2470_p10 = scmp.lt.s32.totalorder %s2468_s27, %s2464_s26 }
 0x504   :  { %p2471_p11 = por %p2470_p10, %p2469_p9 }
 0x506   :  { %p2472_p12 = pnand %p2471_p11, %p2465_p8 }
 0x508   :  { %2475 = shalt.err (!%p2472_p12)
}
 0x509   :  { %2109 = dma.vmem_to_hbm [thread:$0]  %s2104_s2, 32, %s2839_s11, [#allocation4], %s2522_s25, %s2522_s25, %s2532_s15  }
 0x50a   :  { %2114 = vsyncadd [#allocation21], 96  ;;  %s2539_s5 = smov [#allocation20]  }
 0x50b   :  { %s2115_s30 = sshll.u32 %s2539_s5, 4  ;;  %s2116_s30 = int_to_ptr.vmem [resolvable:$true] %s2115_s30 }
 0x50c   :  { %s2484_s13 = scalar_lea.vmem %s2116_s30, 32  ;;  %s2488_s4 = scalar_lea.vmem %s2116_s30, 128 }
 0x50d   :  { %p2485_p13 = scmp.ne.s32.totalorder %s2116_s30, %s2484_s13  ;;  %p2489_p0 = scmp.lt.s32.totalorder %s2116_s30, %s2116_s30 }
 0x50e   :  { %p2490_p1 = scmp.lt.s32.totalorder %s2488_s4, %s2484_s13 }
 0x510   :  { %p2491_p2 = por %p2490_p1, %p2489_p0 }
 0x512   :  { %p2492_p3 = pnand %p2491_p2, %p2485_p13 }
 0x514   :  { %2495 = shalt.err (!%p2492_p3)
}
 0x515   :  { %2121 = dma.vmem_to_hbm [thread:$0]  %s2116_s30, 32, %s2840_s12, [#allocation21], %s2522_s25, %s2522_s25, %s2532_s15  }
 0x516   :  { %2516 = dma.done.wait [#allocation4], 128  }
 0x517   :  { %2517 = vsyncadd [#allocation4], 4294967168 }
 0x518   :  { %2518 = dma.done.wait [#allocation21], 128  }
 0x519   :  { %2519 = vsyncadd [#allocation21], 4294967168 }
 0x51a   :  { %2128 = vsyncpa [#allocation3], 1 }
 0x51b   :  { %2129 = vsyncpa [#allocation6], 1 }
 0x51c   :  { %2130 = vsyncpa [#allocation9], 1 }
 0x51d   :  { %2131 = vsyncpa [#allocation12], 1 }
 0x51e   :  { %2132 = vsyncpa [#allocation15], 1 }
 0x51f   :  { %2133 = vsyncpa [#allocation18], 1 }
 0x520   :  { %2134 = vsyncpa [#allocation4], 1 }
 0x521   :  { %2135 = vsyncpa [#allocation21], 1 }

// kernel: tpu_custom_call.1
= control target key start
LH: loop header
LB: loop body
LE: loop exit
PB: predicated region body
PF: predicated region fallthrough
CT: control target
= control target key end

     0   :  { %18 = vsyncpa [#allocation3], 0  ;;  %s2828_s0 = inlined_call_operand.hbm [shape: f32[2,40], index: 0, kind: input, shape index: {}]   ;;  %s2829_s1 = inlined_call_operand.hbm [shape: f32[40,512], index: 1, kind: input, shape index: {}]   ;;  %s2830_s2 = inlined_call_operand.hbm [shape: f32[1,512], index: 2, kind: input, shape index: {}]   ;;  %s2831_s3 = inlined_call_operand.hbm [shape: f32[512,512], index: 3, kind: input, shape index: {}]   ;;  %s2832_s4 = inlined_call_operand.hbm [shape: f32[1,512], index: 4, kind: input, shape index: {}]   ;;  %s2833_s5 = inlined_call_operand.hbm [shape: f32[512,640], index: 5, kind: input, shape index: {}]   ;;  %s2834_s6 = inlined_call_operand.hbm [shape: f32[1,640], index: 6, kind: input, shape index: {}]   ;;  %s2835_s7 = inlined_call_operand.hbm [shape: f32[512,256], index: 7, kind: input, shape index: {}]   ;;  %s2836_s8 = inlined_call_operand.hbm [shape: f32[1,256], index: 8, kind: input, shape index: {}]   ;;  %s2837_s9 = inlined_call_operand.vmem [shape: f32[256,3], index: 9, kind: input, shape index: {}]   ;;  %s2838_s10 = inlined_call_operand.hbm [shape: f32[1,3], index: 10, kind: input, shape index: {}]   ;;  %s2839_s11 = inlined_call_operand.hbm [shape: f32[2,3], index: 11, kind: output, shape index: {0}]   ;;  %s2840_s12 = inlined_call_operand.hbm [shape: f32[2,3], index: 12, kind: output, shape index: {1}]  }
   0x1   :  { %19 = vsyncpa [#allocation6], 0 }
   0x2   :  { %20 = vsyncpa [#allocation9], 0 }
   0x3   :  { %21 = vsyncpa [#allocation12], 0 }
   0x4   :  { %22 = vsyncpa [#allocation15], 0 }
   0x5   :  { %23 = vsyncpa [#allocation18], 0 }
   0x6   :  { %24 = vsyncpa [#allocation4], 0 }
   0x7   :  { %25 = vsyncpa [#allocation21], 0 }
   0x8   :  { %30 = vsyncadd [#allocation3], 96  ;;  %s2520_s21 = smov [#allocation5]  }
   0x9   :  { %s43_s22 = sshll.u32 %s2520_s21, 4  ;;  %s44_s22 = int_to_ptr.vmem [resolvable:$true] %s43_s22 }
   0xa   :  { %s2272_s23 = scalar_lea.vmem %s44_s22, 2560  ;;  %p2277_p1 = scmp.lt.s32.totalorder %s44_s22, %s44_s22 }
   0xb   :  { %p2273_p0 = scmp.ne.s32.totalorder %s44_s22, %s2272_s23  ;;  %p2278_p2 = scmp.lt.s32.totalorder %s2272_s23, %s2272_s23 }
   0xd   :  { %p2279_p3 = por %p2278_p2, %p2277_p1 }
   0xf   :  { %p2280_p4 = pnand %p2279_p3, %p2273_p0 }
  0x11   :  { %2283 = shalt.err (!%p2280_p4)
}
  0x12   :  { %s2521_s24 = smov 512   ;;  %s2522_s25 = smov 32  }
  0x13   :  { %49 = dma.hbm_to_vmem [thread:$0]  %s2829_s1, 2560, %s44_s22, [#allocation6], %s2521_s24, %s2521_s24, %s2522_s25  }
  0x14   :  { %s2523_s28 = smov [#allocation8]   ;;  %s2524_s30 = smov [#allocation11]  }
  0x15   :  { %s65_s29 = sshll.u32 %s2523_s28, 4  ;;  %s87_s13 = sshll.u32 %s2524_s30, 4  ;;  %s66_s29 = int_to_ptr.vmem [resolvable:$true] %s65_s29  ;;  %s88_s13 = int_to_ptr.vmem [resolvable:$true] %s87_s13 }
  0x16   :  { %s2292_s14 = scalar_lea.vmem %s66_s29, 32768  ;;  %p2297_p6 = scmp.lt.s32.totalorder %s66_s29, %s66_s29 }
  0x17   :  { %p2293_p5 = scmp.ne.s32.totalorder %s66_s29, %s2292_s14  ;;  %p2298_p7 = scmp.lt.s32.totalorder %s2292_s14, %s2292_s14 }
  0x19   :  { %p2299_p8 = por %p2298_p7, %p2297_p6 }
  0x1b   :  { %p2300_p9 = pnand %p2299_p8, %p2293_p5 }
  0x1d   :  { %2303 = shalt.err (!%p2300_p9)
}
  0x1e   :  { %71 = dma.hbm_to_vmem [thread:$0]  %s2831_s3, 32768, %s66_s29, [#allocation9], %s2521_s24, %s2521_s24, %s2522_s25  }
  0x1f   :  { %s2312_s17 = scalar_lea.vmem %s88_s13, 40960  ;;  %p2317_p11 = scmp.lt.s32.totalorder %s88_s13, %s88_s13 }
  0x20   :  { %p2313_p10 = scmp.ne.s32.totalorder %s88_s13, %s2312_s17  ;;  %p2318_p12 = scmp.lt.s32.totalorder %s2312_s17, %s2312_s17 }
  0x22   :  { %p2319_p13 = por %p2318_p12, %p2317_p11 }
  0x24   :  { %p2320_p0 = pnand %p2319_p13, %p2313_p10 }
  0x26   :  { %2323 = shalt.err (!%p2320_p0)
}
  0x27   :  { %s2525_s1 = smov 640   ;;  %s2526_s18 = smov 40  }
  0x28   :  { %93 = dma.hbm_to_vmem [thread:$0]  %s2833_s5, 40960, %s88_s13, [#allocation12], %s2525_s1, %s2525_s1, %s2526_s18  }
  0x29   :  { %s2527_s21 = smov [#allocation14]  }
  0x2a   :  { %s109_s22 = sshll.u32 %s2527_s21, 4  ;;  %s110_s22 = int_to_ptr.vmem [resolvable:$true] %s109_s22 }
  0x2b   :  { %s2332_s23 = scalar_lea.vmem %s110_s22, 16384  ;;  %p2337_p2 = scmp.lt.s32.totalorder %s110_s22, %s110_s22 }
  0x2c   :  { %p2333_p1 = scmp.ne.s32.totalorder %s110_s22, %s2332_s23  ;;  %p2338_p3 = scmp.lt.s32.totalorder %s2332_s23, %s2332_s23 }
  0x2e   :  { %p2339_p4 = por %p2338_p3, %p2337_p2 }
  0x30   :  { %p2340_p5 = pnand %p2339_p4, %p2333_p1 }
  0x32   :  { %2343 = shalt.err (!%p2340_p5)
}
  0x33   :  { %s2528_s3 = smov 256   ;;  %s2529_s24 = smov 16  }
  0x34   :  { %115 = dma.hbm_to_vmem [thread:$0]  %s2835_s7, 16384, %s110_s22, [#allocation15], %s2528_s3, %s2528_s3, %s2529_s24  }
  0x35   :  { %s2530_s28 = smov [#allocation2]   ;;  %s2531_s5 = smov [#allocation7]  }
  0x36   :  { %s31_s29 = sshll.u32 %s2530_s28, 4  ;;  %s56_s30 = sshll.u32 %s2531_s5, 4  ;;  %s32_s29 = int_to_ptr.vmem [resolvable:$true] %s31_s29  ;;  %s57_s30 = int_to_ptr.vmem [resolvable:$true] %s56_s30 }
  0x37   :  { %s2352_s13 = scalar_lea.vmem %s32_s29, 32  ;;  %s2356_s14 = scalar_lea.vmem %s32_s29, 128 }
  0x38   :  { %p2353_p6 = scmp.ne.s32.totalorder %s32_s29, %s2352_s13  ;;  %p2357_p7 = scmp.lt.s32.totalorder %s32_s29, %s32_s29 }
  0x39   :  { %p2358_p8 = scmp.lt.s32.totalorder %s2356_s14, %s2352_s13 }
  0x3b   :  { %p2359_p9 = por %p2358_p8, %p2357_p7 }
  0x3d   :  { %p2360_p10 = pnand %p2359_p9, %p2353_p6 }
  0x3f   :  { %2363 = shalt.err (!%p2360_p10)
}
  0x40   :  { %s2532_s15 = smov 2   ;;  %s2372_s7 = scalar_lea.vmem %s57_s30, 64 }
  0x41   :  { %37 = dma.hbm_to_vmem [thread:$0]  %s2828_s0, 32, %s32_s29, [#allocation3], %s2522_s25, %s2522_s25, %s2532_s15  }
  0x42   :  { %p2373_p11 = scmp.ne.s32.totalorder %s57_s30, %s2372_s7  ;;  %p2377_p12 = scmp.lt.s32.totalorder %s57_s30, %s57_s30 }
  0x43   :  { %p2378_p13 = scmp.lt.s32.totalorder %s2372_s7, %s2372_s7 }
  0x45   :  { %p2379_p0 = por %p2378_p13, %p2377_p12 }
  0x47   :  { %p2380_p1 = pnand %p2379_p0, %p2373_p11 }
  0x49   :  { %2383 = shalt.err (!%p2380_p1)
}
  0x4a   :  { %59 = dma.hbm_to_vmem [thread:$0]  %s2830_s2, 64, %s57_s30, [#allocation6]  }
  0x4b   :  { %s2533_s19 = smov [#allocation10]   ;;  %s2534_s21 = smov [#allocation13]  }
  0x4c   :  { %s78_s20 = sshll.u32 %s2533_s19, 4  ;;  %s100_s22 = sshll.u32 %s2534_s21, 4  ;;  %s79_s20 = int_to_ptr.vmem [resolvable:$true] %s78_s20  ;;  %s101_s22 = int_to_ptr.vmem [resolvable:$true] %s100_s22 }
  0x4d   :  { %s2392_s23 = scalar_lea.vmem %s79_s20, 64  ;;  %p2397_p3 = scmp.lt.s32.totalorder %s79_s20, %s79_s20 }
  0x4e   :  { %p2393_p2 = scmp.ne.s32.totalorder %s79_s20, %s2392_s23  ;;  %p2398_p4 = scmp.lt.s32.totalorder %s2392_s23, %s2392_s23 }
  0x50   :  { %p2399_p5 = por %p2398_p4, %p2397_p3 }
  0x52   :  { %p2400_p6 = pnand %p2399_p5, %p2393_p2 }
  0x54   :  { %2403 = shalt.err (!%p2400_p6)
}
  0x55   :  { %81 = dma.hbm_to_vmem [thread:$0]  %s2832_s4, 64, %s79_s20, [#allocation9]  }
  0x56   :  { %s2412_s24 = scalar_lea.vmem %s101_s22, 80  ;;  %s2416_s2 = scalar_lea.vmem %s101_s22, 96 }
  0x57   :  { %p2413_p7 = scmp.ne.s32.totalorder %s101_s22, %s2412_s24  ;;  %p2417_p8 = scmp.lt.s32.totalorder %s101_s22, %s101_s22 }
  0x58   :  { %p2418_p9 = scmp.lt.s32.totalorder %s2416_s2, %s2412_s24 }
  0x5a   :  { %p2419_p10 = por %p2418_p9, %p2417_p8 }
  0x5c   :  { %p2420_p11 = pnand %p2419_p10, %p2413_p7 }
  0x5e   :  { %2423 = shalt.err (!%p2420_p11)
}
  0x5f   :  { %103 = dma.hbm_to_vmem [thread:$0]  %s2834_s6, 80, %s101_s22, [#allocation12]  }
  0x60   :  { %s2535_s28 = smov [#allocation16]   ;;  %s2536_s5 = smov [#allocation17]  }
  0x61   :  { %s122_s29 = sshll.u32 %s2535_s28, 4  ;;  %s134_s30 = sshll.u32 %s2536_s5, 4  ;;  %s123_s29 = int_to_ptr.vmem [resolvable:$true] %s122_s29  ;;  %s135_s30 = int_to_ptr.vmem [resolvable:$true] %s134_s30 }
  0x62   :  { %s2432_s13 = scalar_lea.vmem %s123_s29, 32  ;;  %p2437_p13 = scmp.lt.s32.totalorder %s123_s29, %s123_s29 }
  0x63   :  { %p2433_p12 = scmp.ne.s32.totalorder %s123_s29, %s2432_s13  ;;  %p2438_p0 = scmp.lt.s32.totalorder %s2432_s13, %s2432_s13 }
  0x65   :  { %p2439_p1 = por %p2438_p0, %p2437_p13 }
  0x67   :  { %p2440_p2 = pnand %p2439_p1, %p2433_p12 }
  0x69   :  { %2443 = shalt.err (!%p2440_p2)
}
  0x6a   :  { %125 = dma.hbm_to_vmem [thread:$0]  %s2836_s8, 32, %s123_s29, [#allocation15]  }
  0x6b   :  { %s2452_s16 = scalar_lea.vmem %s135_s30, 16  ;;  %s2456_s6 = scalar_lea.vmem %s135_s30, 32 }
  0x6c   :  { %p2453_p3 = scmp.ne.s32.totalorder %s135_s30, %s2452_s16  ;;  %p2457_p4 = scmp.lt.s32.totalorder %s135_s30, %s135_s30 }
  0x6d   :  { %p2458_p5 = scmp.lt.s32.totalorder %s2456_s6, %s2452_s16 }
  0x6f   :  { %p2459_p6 = por %p2458_p5, %p2457_p4 }
  0x71   :  { %p2460_p7 = pnand %p2459_p6, %p2453_p3 }
  0x73   :  { %2463 = shalt.err (!%p2460_p7)
}
  0x74   :  { %137 = dma.hbm_to_vmem [thread:$0]  %s2838_s10, 16, %s135_s30, [#allocation18]  }
  0x75   :  { %2504 = dma.done.wait [#allocation3], 128  }
  0x76   :  { %2505 = vsyncadd [#allocation3], 4294967168 }
  0x77   :  { %2506 = dma.done.wait [#allocation6], 2624  }
  0x78   :  { %2507 = vsyncadd [#allocation6], 4294964672 }
  0x79   :  { %2508 = dma.done.wait [#allocation9], 32832  }
  0x7a   :  { %2509 = vsyncadd [#allocation9], 4294934464 }
  0x7b   :  { %2510 = dma.done.wait [#allocation12], 41040  }
  0x7c   :  { %2511 = vsyncadd [#allocation12], 4294926256 }
  0x7d   :  { %2512 = dma.done.wait [#allocation15], 16416  }
  0x7e   :  { %2513 = vsyncadd [#allocation15], 4294950880 }
  0x7f   :  { %2514 = dma.done.wait [#allocation18], 16  }
  0x80   :  { %2515 = vsyncadd [#allocation18], 4294967280  ;;  %v2537_v0 = vmov 0.0   ;;  %v186_v1 = vld [vmem:[#allocation5 + $0x88] sm:$0xff]  ;;  %v185_v2 = vld [vmem:[#allocation5 + $0x80] sm:$0xff]  ;;  %vm211_vm0 = vcmask 326656  }
  0x81   :  { %279 = vmatprep.mubr.f32.mxu1 %v2537_v0  ;;  %v182_v3 = vld [vmem:[#allocation5 + $0x68] sm:$0xff]  ;;  %237 = vmatprep.subr.mxu1 %v186_v1  ;;  %v181_v4 = vld [vmem:[#allocation5 + $0x60] sm:$0xff]  ;;  %v168_v14 = vld [vmem:[#allocation2] sm:$0xff]  ;;  %vm1698_vm1 = vcmask 23552  }
  0x82   :  { %238 = vmatpush1.msra.mxu1 %v185_v2  ;;  %v178_v5 = vld [vmem:[#allocation5 + $0x48] sm:$0xff]  ;;  %v177_v6 = vld [vmem:[#allocation5 + $0x40] sm:$0xff]  ;;  %v188_v15 = vld [vmem:[#allocation5 + $0x98] sm:$0xff] }
  0x83   :  { %239 = vmatprep.subr.mxu1 %v182_v3  ;;  %v174_v7 = vld [vmem:[#allocation5 + $0x28] sm:$0xff]  ;;  %v173_v8 = vld [vmem:[#allocation5 + $0x20] sm:$0xff]  ;;  %v187_v16 = vld [vmem:[#allocation5 + $0x90] sm:$0xff] }
  0x84   :  { %240 = vmatpush1.msra.mxu1 %v181_v4  ;;  %v170_v9 = vld [vmem:[#allocation5 + $0x8] sm:$0xff]  ;;  %v169_v10 = vld [vmem:[#allocation5] sm:$0xff]  ;;  %v184_v17 = vld [vmem:[#allocation5 + $0x78] sm:$0xff] }
  0x85   :  { %241 = vmatprep.subr.mxu1 %v178_v5  ;;  %v422_v11 = vld [vmem:[#allocation8 + $0x1e8] sm:$0xff]  ;;  %v421_v12 = vld [vmem:[#allocation8 + $0x1e0] sm:$0xff]  ;;  %v180_v21 = vld [vmem:[#allocation5 + $0x58] sm:$0xff] }
  0x86   :  { %242 = vmatpush1.msra.mxu1 %v177_v6  ;;  %v418_v13 = vld [vmem:[#allocation8 + $0x1c8] sm:$0xff]  ;;  %639 = vmatprep.subr.mxu0 %v422_v11  ;;  %v417_v18 = vld [vmem:[#allocation8 + $0x1c0] sm:$0xff]  ;;  %v176_v25 = vld [vmem:[#allocation5 + $0x38] sm:$0xff] }
  0x87   :  { %243 = vmatprep.subr.mxu1 %v174_v7  ;;  %640 = vmatpush1.msra.mxu0 %v421_v12  ;;  %v183_v19 = vld [vmem:[#allocation5 + $0x70] sm:$0xff]  ;;  %v413_v22 = vld [vmem:[#allocation8 + $0x1a0] sm:$0xff]  ;;  %v172_v29 = vld [vmem:[#allocation5 + $0x18] sm:$0xff] }
  0x88   :  { %244 = vmatpush1.msra.mxu1 %v173_v8  ;;  %641 = vmatprep.subr.mxu0 %v418_v13  ;;  %v414_v20 = vld [vmem:[#allocation8 + $0x1a8] sm:$0xff]  ;;  %v409_v26 = vld [vmem:[#allocation8 + $0x180] sm:$0xff] }
  0x89   :  { %245 = vmatprep.subr.mxu1 %v170_v9  ;;  %v179_v23 = vld [vmem:[#allocation5 + $0x50] sm:$0xff]  ;;  %642 = vmatpush1.msra.mxu0 %v417_v18  ;;  %v405_v30 = vld [vmem:[#allocation8 + $0x160] sm:$0xff] }
  0x8a   :  { %246 = vmatpush1.msra.mxu1 %v169_v10  ;;  %v410_v24 = vld [vmem:[#allocation8 + $0x188] sm:$0xff]  ;;  %643 = vmatprep.subr.mxu0 %v414_v20  ;;  %v401_v34 = vld [vmem:[#allocation8 + $0x140] sm:$0xff] }
  0x8b   :  { %2136 = vmatmul.mubr.msk.f32.vlgmr.msra.gmra.mxu1 %vm211_vm0, %v168_v14  ;;  %308 = vmatprep.subr.mxu1 %v188_v15  ;;  %v175_v27 = vld [vmem:[#allocation5 + $0x30] sm:$0xff]  ;;  %v549_v35 = vld [vmem:[#allocation8 + $0x5e0] sm:$0xff] }
  0x8c   :  { %309 = vmatpush1.msra.mxu1 %v187_v16  ;;  %350 = vmatprep.mubr.f32.mxu1 %v2537_v0  ;;  %v406_v28 = vld [vmem:[#allocation8 + $0x168] sm:$0xff]  ;;  %v397_v38 = vld [vmem:[#allocation8 + $0x120] sm:$0xff] }
  0x8d   :  { %310 = vmatprep.subr.mxu1 %v184_v17  ;;  %644 = vmatpush1.msra.mxu0 %v413_v22  ;;  %v171_v31 = vld [vmem:[#allocation5 + $0x10] sm:$0xff]  ;;  %v545_v39 = vld [vmem:[#allocation8 + $0x5c0] sm:$0xff] }
  0x8e   :  { %311 = vmatpush1.msra.mxu1 %v183_v19  ;;  %645 = vmatprep.subr.mxu0 %v410_v24  ;;  %v402_v32 = vld [vmem:[#allocation8 + $0x148] sm:$0xff]  ;;  %v393_v42 = vld [vmem:[#allocation8 + $0x100] sm:$0xff] }
  0x8f   :  { %312 = vmatprep.subr.mxu1 %v180_v21  ;;  %646 = vmatpush1.msra.mxu0 %v409_v26  ;;  %v550_v33 = vld [vmem:[#allocation8 + $0x5e8] sm:$0xff]  ;;  %v541_v43 = vld [vmem:[#allocation8 + $0x5a0] sm:$0xff] }
  0x90   :  { %313 = vmatpush1.msra.mxu1 %v179_v23  ;;  %647 = vmatprep.subr.mxu0 %v406_v28  ;;  %v398_v36 = vld [vmem:[#allocation8 + $0x128] sm:$0xff]  ;;  %v389_v46 = vld [vmem:[#allocation8 + $0xe0] sm:$0xff] }
  0x91   :  { %314 = vmatprep.subr.mxu1 %v176_v25  ;;  %648 = vmatpush1.msra.mxu0 %v405_v30  ;;  %v546_v37 = vld [vmem:[#allocation8 + $0x5c8] sm:$0xff]  ;;  %v537_v47 = vld [vmem:[#allocation8 + $0x580] sm:$0xff] }
  0x92   :  { %315 = vmatpush1.msra.mxu1 %v175_v27  ;;  %649 = vmatprep.subr.mxu0 %v402_v32  ;;  %v394_v40 = vld [vmem:[#allocation8 + $0x108] sm:$0xff]  ;;  %v385_v50 = vld [vmem:[#allocation8 + $0xc0] sm:$0xff] }
  0x93   :  { %316 = vmatprep.subr.mxu1 %v172_v29  ;;  %650 = vmatpush1.msra.mxu0 %v401_v34  ;;  %v542_v41 = vld [vmem:[#allocation8 + $0x5a8] sm:$0xff]  ;;  %v533_v51 = vld [vmem:[#allocation8 + $0x560] sm:$0xff] }
  0x94   :  { %317 = vmatpush1.msra.mxu1 %v171_v31  ;;  %651 = vmatprep.subr.mxu0 %v398_v36  ;;  %v390_v44 = vld [vmem:[#allocation8 + $0xe8] sm:$0xff]  ;;  %v381_v54 = vld [vmem:[#allocation8 + $0xa0] sm:$0xff] }
  0x95   :  { %2137 = vmatmul.mubr.msk.f32.vlgmr.msra.gmra.mxu1 %vm211_vm0, %v168_v14  ;;  %710 = vmatprep.subr.mxu1 %v550_v33  ;;  %v538_v45 = vld [vmem:[#allocation8 + $0x588] sm:$0xff]  ;;  %v529_v55 = vld [vmem:[#allocation8 + $0x540] sm:$0xff] }
  0x96   :  { %711 = vmatpush1.msra.mxu1 %v549_v35  ;;  %652 = vmatpush1.msra.mxu0 %v397_v38  ;;  %v386_v48 = vld [vmem:[#allocation8 + $0xc8] sm:$0xff]  ;;  %v377_v58 = vld [vmem:[#allocation8 + $0x80] sm:$0xff] }
  0x97   :  { %712 = vmatprep.subr.mxu1 %v546_v37  ;;  %653 = vmatprep.subr.mxu0 %v394_v40  ;;  %v534_v49 = vld [vmem:[#allocation8 + $0x568] sm:$0xff]  ;;  %v525_v59 = vld [vmem:[#allocation8 + $0x520] sm:$0xff] }
  0x98   :  { %713 = vmatpush1.msra.mxu1 %v545_v39  ;;  %654 = vmatpush1.msra.mxu0 %v393_v42  ;;  %v382_v52 = vld [vmem:[#allocation8 + $0xa8] sm:$0xff]  ;;  %v373_v62 = vld [vmem:[#allocation8 + $0x60] sm:$0xff] }
  0x99   :  { %714 = vmatprep.subr.mxu1 %v542_v41  ;;  %655 = vmatprep.subr.mxu0 %v390_v44  ;;  %v530_v53 = vld [vmem:[#allocation8 + $0x548] sm:$0xff]  ;;  %v521_v63 = vld [vmem:[#allocation8 + $0x500] sm:$0xff] }
  0x9a   :  { %715 = vmatpush1.msra.mxu1 %v541_v43  ;;  %656 = vmatpush1.msra.mxu0 %v389_v46  ;;  %v378_v56 = vld [vmem:[#allocation8 + $0x88] sm:$0xff]  ;;  %v369_v2 = vld [vmem:[#allocation8 + $0x40] sm:$0xff] }
  0x9b   :  { %716 = vmatprep.subr.mxu1 %v538_v45  ;;  %657 = vmatprep.subr.mxu0 %v386_v48  ;;  %v526_v57 = vld [vmem:[#allocation8 + $0x528] sm:$0xff]  ;;  %v517_v3 = vld [vmem:[#allocation8 + $0x4e0] sm:$0xff] }
  0x9c   :  { %717 = vmatpush1.msra.mxu1 %v537_v47  ;;  %658 = vmatpush1.msra.mxu0 %v385_v50  ;;  %v374_v60 = vld [vmem:[#allocation8 + $0x68] sm:$0xff]  ;;  %v365_v6 = vld [vmem:[#allocation8 + $0x20] sm:$0xff] }
  0x9d   :  { %718 = vmatprep.subr.mxu1 %v534_v49  ;;  %659 = vmatprep.subr.mxu0 %v382_v52  ;;  %v522_v61 = vld [vmem:[#allocation8 + $0x508] sm:$0xff]  ;;  %v513_v7 = vld [vmem:[#allocation8 + $0x4c0] sm:$0xff] }
  0x9e   :  { %719 = vmatpush1.msra.mxu1 %v533_v51  ;;  %660 = vmatpush1.msra.mxu0 %v381_v54  ;;  %v370_v0 = vld [vmem:[#allocation8 + $0x48] sm:$0xff]  ;;  %v361_v10 = vld [vmem:[#allocation8] sm:$0xff] }
  0x9f   :  { %720 = vmatprep.subr.mxu1 %v530_v53  ;;  %661 = vmatprep.subr.mxu0 %v378_v56  ;;  %v518_v1 = vld [vmem:[#allocation8 + $0x4e8] sm:$0xff]  ;;  %v509_v11 = vld [vmem:[#allocation8 + $0x4a0] sm:$0xff] }
  0xa0   :  { %721 = vmatpush1.msra.mxu1 %v529_v55  ;;  %662 = vmatpush1.msra.mxu0 %v377_v58  ;;  %v366_v4 = vld [vmem:[#allocation8 + $0x28] sm:$0xff]  ;;  %v485_v14 = vld [vmem:[#allocation8 + $0x3e0] sm:$0xff] }
  0xa1   :  { %722 = vmatprep.subr.mxu1 %v526_v57  ;;  %663 = vmatprep.subr.mxu0 %v374_v60  ;;  %v514_v5 = vld [vmem:[#allocation8 + $0x4c8] sm:$0xff]  ;;  %v505_v15 = vld [vmem:[#allocation8 + $0x480] sm:$0xff] }
  0xa2   :  { %723 = vmatpush1.msra.mxu1 %v525_v59  ;;  %664 = vmatpush1.msra.mxu0 %v373_v62  ;;  %v362_v8 = vld [vmem:[#allocation8 + $0x8] sm:$0xff]  ;;  %v481_v18 = vld [vmem:[#allocation8 + $0x3c0] sm:$0xff] }
  0xa3   :  { %724 = vmatprep.subr.mxu1 %v522_v61  ;;  %665 = vmatprep.subr.mxu0 %v370_v0  ;;  %v510_v9 = vld [vmem:[#allocation8 + $0x4a8] sm:$0xff]  ;;  %v501_v19 = vld [vmem:[#allocation8 + $0x460] sm:$0xff] }
  0xa4   :  { %725 = vmatpush1.msra.mxu1 %v521_v63  ;;  %666 = vmatpush1.msra.mxu0 %v369_v2  ;;  %v486_v12 = vld [vmem:[#allocation8 + $0x3e8] sm:$0xff]  ;;  %v477_v22 = vld [vmem:[#allocation8 + $0x3a0] sm:$0xff] }
  0xa5   :  { %726 = vmatprep.subr.mxu1 %v518_v1  ;;  %667 = vmatprep.subr.mxu0 %v366_v4  ;;  %v506_v13 = vld [vmem:[#allocation8 + $0x488] sm:$0xff]  ;;  %v497_v23 = vld [vmem:[#allocation8 + $0x440] sm:$0xff] }
  0xa6   :  { %727 = vmatpush1.msra.mxu1 %v517_v3  ;;  %668 = vmatpush1.msra.mxu0 %v365_v6  ;;  %v482_v16 = vld [vmem:[#allocation8 + $0x3c8] sm:$0xff]  ;;  %v473_v26 = vld [vmem:[#allocation8 + $0x380] sm:$0xff] }
  0xa7   :  { %728 = vmatprep.subr.mxu1 %v514_v5  ;;  %669 = vmatprep.subr.mxu0 %v362_v8  ;;  %v502_v17 = vld [vmem:[#allocation8 + $0x468] sm:$0xff]  ;;  %v493_v27 = vld [vmem:[#allocation8 + $0x420] sm:$0xff] }
  0xa8   :  { %729 = vmatpush1.msra.mxu1 %v513_v7  ;;  %670 = vmatpush1.msra.mxu0 %v361_v10  ;;  %v478_v20 = vld [vmem:[#allocation8 + $0x3a8] sm:$0xff]  ;;  %v469_v30 = vld [vmem:[#allocation8 + $0x360] sm:$0xff] }
  0xa9   :  { %730 = vmatprep.subr.mxu1 %v510_v9  ;;  %671 = vmatprep.subr.mxu0 %v486_v12  ;;  %v498_v21 = vld [vmem:[#allocation8 + $0x448] sm:$0xff]  ;;  %v489_v31 = vld [vmem:[#allocation8 + $0x400] sm:$0xff] }
  0xaa   :  { %731 = vmatpush1.msra.mxu1 %v509_v11  ;;  %672 = vmatpush2.msra.mxu0 %v485_v14  ;;  %v474_v24 = vld [vmem:[#allocation8 + $0x388] sm:$0xff]  ;;  %v465_v34 = vld [vmem:[#allocation8 + $0x340] sm:$0xff] }
  0xab   :  { %732 = vmatprep.subr.mxu1 %v506_v13  ;;  %673 = vmatprep.subr.mxu0 %v482_v16  ;;  %v494_v25 = vld [vmem:[#allocation8 + $0x428] sm:$0xff]  ;;  %v613_v35 = vld [vmem:[#allocation8 + $0x7e0] sm:$0xff]  ;;  %v424_v13 = vld [vmem:[#allocation8 + $0x1f8] sm:$0xff] }
  0xac   :  { %733 = vmatpush1.msra.mxu1 %v505_v15  ;;  %674 = vmatpush2.msra.mxu0 %v481_v18  ;;  %v470_v28 = vld [vmem:[#allocation8 + $0x368] sm:$0xff]  ;;  %v461_v38 = vld [vmem:[#allocation8 + $0x320] sm:$0xff] }
  0xad   :  { %734 = vmatprep.subr.mxu1 %v502_v17  ;;  %675 = vmatprep.subr.mxu0 %v478_v20  ;;  %v490_v29 = vld [vmem:[#allocation8 + $0x408] sm:$0xff]  ;;  %v609_v39 = vld [vmem:[#allocation8 + $0x7c0] sm:$0xff] }
  0xae   :  { %735 = vmatpush1.msra.mxu1 %v501_v19  ;;  %676 = vmatpush2.msra.mxu0 %v477_v22  ;;  %v466_v32 = vld [vmem:[#allocation8 + $0x348] sm:$0xff]  ;;  %v457_v42 = vld [vmem:[#allocation8 + $0x300] sm:$0xff] }
  0xaf   :  { %736 = vmatprep.subr.mxu1 %v498_v21  ;;  %677 = vmatprep.subr.mxu0 %v474_v24  ;;  %v614_v33 = vld [vmem:[#allocation8 + $0x7e8] sm:$0xff]  ;;  %v605_v43 = vld [vmem:[#allocation8 + $0x7a0] sm:$0xff]  ;;  %v191_v24 = vlaneseq }
  0xb0   :  { %737 = vmatpush1.msra.mxu1 %v497_v23  ;;  %678 = vmatpush2.msra.mxu0 %v473_v26  ;;  %v462_v36 = vld [vmem:[#allocation8 + $0x328] sm:$0xff]  ;;  %v453_v46 = vld [vmem:[#allocation8 + $0x2e0] sm:$0xff]  ;;  %v552_v23 = vld [vmem:[#allocation8 + $0x5f8] sm:$0xff] }
  0xb1   :  { %738 = vmatprep.subr.mxu1 %v494_v25  ;;  %679 = vmatprep.subr.mxu0 %v470_v28  ;;  %v610_v37 = vld [vmem:[#allocation8 + $0x7c8] sm:$0xff]  ;;  %v601_v47 = vld [vmem:[#allocation8 + $0x780] sm:$0xff]  ;;  %v2642_v25 = vshrl.u32 %v191_v24, 7  ;;  %v520_v24 = vld [vmem:[#allocation8 + $0x4f8] sm:$0xff] }
  0xb2   :  { %739 = vmatpush1.msra.mxu1 %v493_v27  ;;  %680 = vmatpush2.msra.mxu0 %v469_v30  ;;  %v458_v40 = vld [vmem:[#allocation8 + $0x308] sm:$0xff]  ;;  %v449_v50 = vld [vmem:[#allocation8 + $0x2c0] sm:$0xff]  ;;  %v189_v27 = vld [vmem:[#allocation7] sm:$0xf] }
  0xb3   :  { %740 = vmatprep.subr.mxu1 %v490_v29  ;;  %681 = vmatprep.subr.mxu0 %v466_v32  ;;  %v606_v41 = vld [vmem:[#allocation8 + $0x7a8] sm:$0xff]  ;;  %v597_v51 = vld [vmem:[#allocation8 + $0x760] sm:$0xff]  ;;  %v2645_v26 = vsub.s32 0, %v2642_v25  ;;  %v2648_v28 = vsub.s32 1, %v2642_v25 }
  0xb4   :  { %741 = vmatpush1.msra.mxu1 %v489_v31  ;;  %682 = vmatpush2.msra.mxu0 %v465_v34  ;;  %v454_v44 = vld [vmem:[#allocation8 + $0x2e8] sm:$0xff]  ;;  %v445_v54 = vld [vmem:[#allocation8 + $0x2a0] sm:$0xff] }
  0xb5   :  { %742 = vmatprep.subr.mxu1 %v614_v33  ;;  %683 = vmatprep.subr.mxu0 %v462_v36  ;;  %v602_v45 = vld [vmem:[#allocation8 + $0x788] sm:$0xff]  ;;  %v593_v55 = vld [vmem:[#allocation8 + $0x740] sm:$0xff]  ;;  %v194_v29 = vrot.slane %v189_v27, %v2645_v26  ;;  %v198_v30 = vrot.slane %v189_v27, %v2648_v28 }
  0xb6   :  { %743 = vmatpush2.msra.mxu1 %v613_v35  ;;  %684 = vmatpush2.msra.mxu0 %v461_v38  ;;  %v450_v48 = vld [vmem:[#allocation8 + $0x2c8] sm:$0xff]  ;;  %v441_v58 = vld [vmem:[#allocation8 + $0x280] sm:$0xff]  ;;  %v2655_v35 = vsub.s32 2, %v2642_v25 }
  0xb7   :  { %744 = vmatprep.subr.mxu1 %v610_v37  ;;  %685 = vmatprep.subr.mxu0 %v458_v40  ;;  %v598_v49 = vld [vmem:[#allocation8 + $0x768] sm:$0xff]  ;;  %v589_v59 = vld [vmem:[#allocation8 + $0x720] sm:$0xff]  ;;  %v2658_v37 = vsub.s32 3, %v2642_v25  ;;  %v420_v40 = vld [vmem:[#allocation8 + $0x1d8] sm:$0xff] }
  0xb8   :  { %745 = vmatpush2.msra.mxu1 %v609_v39  ;;  %686 = vmatpush2.msra.mxu0 %v457_v42  ;;  %v446_v52 = vld [vmem:[#allocation8 + $0x2a8] sm:$0xff]  ;;  %v437_v62 = vld [vmem:[#allocation8 + $0x260] sm:$0xff]  ;;  %v423_v39 = vld [vmem:[#allocation8 + $0x1f0] sm:$0xff] }
  0xb9   :  { %746 = vmatprep.subr.mxu1 %v606_v41  ;;  %687 = vmatprep.subr.mxu0 %v454_v44  ;;  %v594_v53 = vld [vmem:[#allocation8 + $0x748] sm:$0xff]  ;;  %v585_v63 = vld [vmem:[#allocation8 + $0x700] sm:$0xff]  ;;  %v202_v41 = vrot.slane %v189_v27, %v2655_v35  ;;  %v419_v42 = vld [vmem:[#allocation8 + $0x1d0] sm:$0xff]  ;;  %v206_v44 = vrot.slane %v189_v27, %v2658_v37 }
  0xba   :  { %747 = vmatpush2.msra.mxu1 %v605_v43  ;;  %688 = vmatpush2.msra.mxu0 %v453_v46  ;;  %v442_v56 = vld [vmem:[#allocation8 + $0x288] sm:$0xff]  ;;  %v433_v2 = vld [vmem:[#allocation8 + $0x240] sm:$0xff]  ;;  %v416_v43 = vld [vmem:[#allocation8 + $0x1b8] sm:$0xff] }
  0xbb   :  { %748 = vmatprep.subr.mxu1 %v602_v45  ;;  %689 = vmatprep.subr.mxu0 %v450_v48  ;;  %v590_v57 = vld [vmem:[#allocation8 + $0x728] sm:$0xff]  ;;  %v581_v3 = vld [vmem:[#allocation8 + $0x6e0] sm:$0xff]  ;;  %v415_v46 = vld [vmem:[#allocation8 + $0x1b0] sm:$0xff] }
  0xbc   :  { %749 = vmatpush2.msra.mxu1 %v601_v47  ;;  %690 = vmatpush2.msra.mxu0 %v449_v50  ;;  %v438_v60 = vld [vmem:[#allocation8 + $0x268] sm:$0xff]  ;;  %v429_v6 = vld [vmem:[#allocation8 + $0x220] sm:$0xff]  ;;  %v412_v47 = vld [vmem:[#allocation8 + $0x198] sm:$0xff] }
  0xbd   :  { %750 = vmatprep.subr.mxu1 %v598_v49  ;;  %691 = vmatprep.subr.mxu0 %v446_v52  ;;  %v586_v61 = vld [vmem:[#allocation8 + $0x708] sm:$0xff]  ;;  %v577_v7 = vld [vmem:[#allocation8 + $0x6c0] sm:$0xff]  ;;  %v411_v50 = vld [vmem:[#allocation8 + $0x190] sm:$0xff] }
  0xbe   :  { %751 = vmatpush2.msra.mxu1 %v597_v51  ;;  %692 = vmatpush2.msra.mxu0 %v445_v54  ;;  %v434_v0 = vld [vmem:[#allocation8 + $0x248] sm:$0xff]  ;;  %v425_v10 = vld [vmem:[#allocation8 + $0x200] sm:$0xff]  ;;  %v408_v52 = vld [vmem:[#allocation8 + $0x178] sm:$0xff] }
  0xbf   :  { %752 = vmatprep.subr.mxu1 %v594_v53  ;;  %693 = vmatprep.subr.mxu0 %v442_v56  ;;  %v582_v1 = vld [vmem:[#allocation8 + $0x6e8] sm:$0xff]  ;;  %v573_v11 = vld [vmem:[#allocation8 + $0x6a0] sm:$0xff]  ;;  %v407_v53 = vld [vmem:[#allocation8 + $0x170] sm:$0xff] }
  0xc0   :  { %753 = vmatpush2.msra.mxu1 %v593_v55  ;;  %694 = vmatpush2.msra.mxu0 %v441_v58  ;;  %v430_v4 = vld [vmem:[#allocation8 + $0x228] sm:$0xff]  ;;  %v569_v14 = vld [vmem:[#allocation8 + $0x680] sm:$0xff]  ;;  %v404_v55 = vld [vmem:[#allocation8 + $0x158] sm:$0xff] }
  0xc1   :  { %754 = vmatprep.subr.mxu1 %v590_v57  ;;  %695 = vmatprep.subr.mxu0 %v438_v60  ;;  %v578_v5 = vld [vmem:[#allocation8 + $0x6c8] sm:$0xff]  ;;  %v565_v16 = vld [vmem:[#allocation8 + $0x660] sm:$0xff]  ;;  %v403_v57 = vld [vmem:[#allocation8 + $0x150] sm:$0xff] }
  0xc2   :  { %755 = vmatpush2.msra.mxu1 %v589_v59  ;;  %696 = vmatpush2.msra.mxu0 %v437_v62  ;;  %v426_v8 = vld [vmem:[#allocation8 + $0x208] sm:$0xff]  ;;  %v561_v18 = vld [vmem:[#allocation8 + $0x640] sm:$0xff]  ;;  %v551_v58 = vld [vmem:[#allocation8 + $0x5f0] sm:$0xff] }
  0xc3   :  { %756 = vmatprep.subr.mxu1 %v586_v61  ;;  %697 = vmatprep.subr.mxu0 %v434_v0  ;;  %v574_v9 = vld [vmem:[#allocation8 + $0x6a8] sm:$0xff]  ;;  %v557_v20 = vld [vmem:[#allocation8 + $0x620] sm:$0xff]  ;;  %v400_v59 = vld [vmem:[#allocation8 + $0x138] sm:$0xff] }
  0xc4   :  { %757 = vmatpush2.msra.mxu1 %v585_v63  ;;  %698 = vmatpush2.msra.mxu0 %v433_v2  ;;  %v570_v12 = vld [vmem:[#allocation8 + $0x688] sm:$0xff]  ;;  %v553_v22 = vld [vmem:[#allocation8 + $0x600] sm:$0xff]  ;;  %v548_v60 = vld [vmem:[#allocation8 + $0x5d8] sm:$0xff] }
  0xc5   :  { %758 = vmatprep.subr.mxu1 %v582_v1  ;;  %699 = vmatprep.subr.mxu0 %v430_v4  ;;  %v566_v15 = vld [vmem:[#allocation8 + $0x668] sm:$0xff]  ;;  %v399_v61 = vld [vmem:[#allocation8 + $0x130] sm:$0xff]  ;;  %v396_v63 = vld [vmem:[#allocation8 + $0x118] sm:$0xff] }
  0xc6   :  { %759 = vmatpush2.msra.mxu1 %v581_v3  ;;  %700 = vmatpush2.msra.mxu0 %v429_v6  ;;  %v562_v17 = vld [vmem:[#allocation8 + $0x648] sm:$0xff]  ;;  %v547_v62 = vld [vmem:[#allocation8 + $0x5d0] sm:$0xff]  ;;  %v544_v0 = vld [vmem:[#allocation8 + $0x5b8] sm:$0xff] }
  0xc7   :  { %760 = vmatprep.subr.mxu1 %v578_v5  ;;  %701 = vmatprep.subr.mxu0 %v426_v8  ;;  %v558_v19 = vld [vmem:[#allocation8 + $0x628] sm:$0xff]  ;;  %v395_v1 = vld [vmem:[#allocation8 + $0x110] sm:$0xff]  ;;  %v392_v3 = vld [vmem:[#allocation8 + $0xf8] sm:$0xff] }
  0xc8   :  { %761 = vmatpush2.msra.mxu1 %v577_v7  ;;  %702 = vmatpush2.msra.mxu0 %v425_v10  ;;  %v554_v21 = vld [vmem:[#allocation8 + $0x608] sm:$0xff]  ;;  %v543_v2 = vld [vmem:[#allocation8 + $0x5b0] sm:$0xff]  ;;  %v540_v4 = vld [vmem:[#allocation8 + $0x598] sm:$0xff] }
  0xc9   :  { %762 = vmatprep.subr.mxu1 %v574_v9  ;;  %781 = vmatprep.subr.mxu0 %v424_v13  ;;  %v391_v5 = vld [vmem:[#allocation8 + $0xf0] sm:$0xff]  ;;  %v388_v7 = vld [vmem:[#allocation8 + $0xd8] sm:$0xff] }
  0xca   :  { %763 = vmatpush2.msra.mxu1 %v573_v11  ;;  %v539_v6 = vld [vmem:[#allocation8 + $0x590] sm:$0xff]  ;;  %v536_v8 = vld [vmem:[#allocation8 + $0x578] sm:$0xff] }
  0xcb   :  { %764 = vmatprep.subr.mxu1 %v570_v12  ;;  %v387_v9 = vld [vmem:[#allocation8 + $0xd0] sm:$0xff]  ;;  %v384_v11 = vld [vmem:[#allocation8 + $0xb8] sm:$0xff] }
  0xcc   :  { %765 = vmatpush2.msra.mxu1 %v569_v14  ;;  %v535_v10 = vld [vmem:[#allocation8 + $0x570] sm:$0xff]  ;;  %v532_v12 = vld [vmem:[#allocation8 + $0x558] sm:$0xff] }
  0xcd   :  { %766 = vmatprep.subr.mxu1 %v566_v15  ;;  %v383_v13 = vld [vmem:[#allocation8 + $0xb0] sm:$0xff]  ;;  %v380_v15 = vld [vmem:[#allocation8 + $0x98] sm:$0xff] }
  0xce   :  { %767 = vmatpush2.msra.mxu1 %v565_v16  ;;  %v531_v14 = vld [vmem:[#allocation8 + $0x550] sm:$0xff]  ;;  %v528_v16 = vld [vmem:[#allocation8 + $0x538] sm:$0xff] }
  0xcf   :  { %768 = vmatprep.subr.mxu1 %v562_v17  ;;  %v379_v17 = vld [vmem:[#allocation8 + $0x90] sm:$0xff] }
  0xd0   :  { %769 = vmatpush2.msra.mxu1 %v561_v18  ;;  %v527_v18 = vld [vmem:[#allocation8 + $0x530] sm:$0xff] }
  0xd1   :  { %770 = vmatprep.subr.mxu1 %v558_v19  ;;  %v376_v19 = vld [vmem:[#allocation8 + $0x78] sm:$0xff]  ;;  %v371_v27 = vld [vmem:[#allocation8 + $0x50] sm:$0xff] }
  0xd2   :  { %771 = vmatpush2.msra.mxu1 %v557_v20  ;;  %v524_v20 = vld [vmem:[#allocation8 + $0x518] sm:$0xff] }
  0xd3   :  { %772 = vmatprep.subr.mxu1 %v554_v21  ;;  %v375_v21 = vld [vmem:[#allocation8 + $0x70] sm:$0xff] }
  0xd4   :  { %773 = vmatpush2.msra.mxu1 %v553_v22  ;;  %v523_v22 = vld [vmem:[#allocation8 + $0x510] sm:$0xff] }
  0xd5   :  { %852 = vmatprep.subr.mxu1 %v552_v23  ;;  %v372_v23 = vld [vmem:[#allocation8 + $0x58] sm:$0xff] }
 0x14b   :  { %v281_v31 = vpop.f32.mrf.mxu1 }
 0x14c   :  { %v2652_v32 = vadd.f32 %v281_v31, %v194_v29  ;;  %v519_v29 = vld [vmem:[#allocation8 + $0x4f0] sm:$0xff]  ;;  %v516_v31 = vld [vmem:[#allocation8 + $0x4d8] sm:$0xff] }
 0x14d   :  { %v283_v33 = vpop.f32.mrf.mxu1 }
 0x14e   :  { %v284_v34 = vadd.f32 %v283_v33, %v198_v30  ;;  %v357_v38 = vmax.f32 %v2652_v32, 0.0  ;;  %v368_v30 = vld [vmem:[#allocation8 + $0x38] sm:$0xff]  ;;  %v367_v33 = vld [vmem:[#allocation8 + $0x30] sm:$0xff] }
 0x14f   :  { %v559_v32 = vld [vmem:[#allocation8 + $0x630] sm:$0xff] }
 0x150   :  { %v358_v36 = vmax.f32 %v284_v34, 0.0  ;;  %v515_v34 = vld [vmem:[#allocation8 + $0x4d0] sm:$0xff] }
 0x152   :  { %703 = vmatprep.mubr.f32.mxu0 %v358_v36 }
 0x153   :  { %704 = vmatmul.mubr.f32.vlgmr.msra.gmra.mxu0 %v357_v38 }
 0x154   :  { %782 = vmatpush1.msra.mxu0 %v423_v39  ;;  %845 = vmatprep.mubr.f32.mxu0 %v358_v36  ;;  %v364_v36 = vld [vmem:[#allocation8 + $0x18] sm:$0xff] }
 0x155   :  { %783 = vmatprep.subr.mxu0 %v420_v40  ;;  %v352_v45 = vpop.f32.mrf.mxu1  ;;  %v512_v39 = vld [vmem:[#allocation8 + $0x4b8] sm:$0xff]  ;;  %v363_v40 = vld [vmem:[#allocation8 + $0x10] sm:$0xff] }
 0x156   :  { %784 = vmatpush1.msra.mxu0 %v419_v42  ;;  %v2665_v48 = vadd.f32 %v352_v45, %v202_v41  ;;  %v511_v41 = vld [vmem:[#allocation8 + $0x4b0] sm:$0xff]  ;;  %v488_v42 = vld [vmem:[#allocation8 + $0x3f8] sm:$0xff] }
 0x157   :  { %785 = vmatprep.subr.mxu0 %v416_v43  ;;  %v354_v49 = vpop.f32.mrf.mxu1  ;;  %v508_v43 = vld [vmem:[#allocation8 + $0x498] sm:$0xff]  ;;  %v507_v45 = vld [vmem:[#allocation8 + $0x490] sm:$0xff] }
 0x158   :  { %v355_v51 = vadd.f32 %v354_v49, %v206_v44  ;;  %786 = vmatpush1.msra.mxu0 %v415_v46  ;;  %v359_v56 = vmax.f32 %v2665_v48, 0.0  ;;  %v487_v44 = vld [vmem:[#allocation8 + $0x3f0] sm:$0xff]  ;;  %v484_v46 = vld [vmem:[#allocation8 + $0x3d8] sm:$0xff] }
 0x159   :  { %787 = vmatprep.subr.mxu0 %v412_v47  ;;  %v504_v47 = vld [vmem:[#allocation8 + $0x478] sm:$0xff]  ;;  %v483_v49 = vld [vmem:[#allocation8 + $0x3d0] sm:$0xff] }
 0x15a   :  { %v360_v54 = vmax.f32 %v355_v51, 0.0  ;;  %788 = vmatpush1.msra.mxu0 %v411_v50  ;;  %v503_v50 = vld [vmem:[#allocation8 + $0x470] sm:$0xff]  ;;  %v480_v51 = vld [vmem:[#allocation8 + $0x3b8] sm:$0xff] }
 0x15b   :  { %789 = vmatprep.subr.mxu0 %v408_v52  ;;  %v500_v52 = vld [vmem:[#allocation8 + $0x458] sm:$0xff] }
 0x15c   :  { %790 = vmatpush1.msra.mxu0 %v407_v53  ;;  %774 = vmatprep.mubr.f32.mxu1 %v360_v54  ;;  %v479_v53 = vld [vmem:[#allocation8 + $0x3b0] sm:$0xff] }
 0x15d   :  { %791 = vmatprep.subr.mxu0 %v404_v55  ;;  %775 = vmatmul.mubr.f32.vlgmr.msra.gmra.mxu1 %v359_v56  ;;  %v476_v55 = vld [vmem:[#allocation8 + $0x398] sm:$0xff] }
 0x15e   :  { %792 = vmatpush1.msra.mxu0 %v403_v57  ;;  %853 = vmatpush1.msra.mxu1 %v551_v58  ;;  %v496_v57 = vld [vmem:[#allocation8 + $0x438] sm:$0xff]  ;;  %v475_v58 = vld [vmem:[#allocation8 + $0x390] sm:$0xff] }
 0x15f   :  { %793 = vmatprep.subr.mxu0 %v400_v59  ;;  %854 = vmatprep.subr.mxu1 %v548_v60  ;;  %v495_v59 = vld [vmem:[#allocation8 + $0x430] sm:$0xff]  ;;  %v472_v60 = vld [vmem:[#allocation8 + $0x378] sm:$0xff] }
 0x160   :  { %916 = vmatprep.mubr.f32.mxu1 %v360_v54  ;;  %794 = vmatpush1.msra.mxu0 %v399_v61  ;;  %v499_v54 = vld [vmem:[#allocation8 + $0x450] sm:$0xff]  ;;  %v492_v61 = vld [vmem:[#allocation8 + $0x418] sm:$0xff] }
 0x161   :  { %855 = vmatpush1.msra.mxu1 %v547_v62  ;;  %795 = vmatprep.subr.mxu0 %v396_v63  ;;  %v471_v62 = vld [vmem:[#allocation8 + $0x370] sm:$0xff] }
 0x162   :  { %856 = vmatprep.subr.mxu1 %v544_v0  ;;  %796 = vmatpush1.msra.mxu0 %v395_v1  ;;  %v491_v63 = vld [vmem:[#allocation8 + $0x410] sm:$0xff]  ;;  %v468_v0 = vld [vmem:[#allocation8 + $0x358] sm:$0xff] }
 0x163   :  { %857 = vmatpush1.msra.mxu1 %v543_v2  ;;  %797 = vmatprep.subr.mxu0 %v392_v3  ;;  %v616_v1 = vld [vmem:[#allocation8 + $0x7f8] sm:$0xff]  ;;  %v467_v2 = vld [vmem:[#allocation8 + $0x350] sm:$0xff] }
 0x164   :  { %858 = vmatprep.subr.mxu1 %v540_v4  ;;  %798 = vmatpush1.msra.mxu0 %v391_v5  ;;  %v615_v3 = vld [vmem:[#allocation8 + $0x7f0] sm:$0xff]  ;;  %v464_v4 = vld [vmem:[#allocation8 + $0x338] sm:$0xff] }
 0x165   :  { %859 = vmatpush1.msra.mxu1 %v539_v6  ;;  %799 = vmatprep.subr.mxu0 %v388_v7  ;;  %v612_v5 = vld [vmem:[#allocation8 + $0x7d8] sm:$0xff]  ;;  %v463_v6 = vld [vmem:[#allocation8 + $0x330] sm:$0xff] }
 0x166   :  { %860 = vmatprep.subr.mxu1 %v536_v8  ;;  %800 = vmatpush1.msra.mxu0 %v387_v9  ;;  %v611_v7 = vld [vmem:[#allocation8 + $0x7d0] sm:$0xff]  ;;  %v460_v8 = vld [vmem:[#allocation8 + $0x318] sm:$0xff] }
 0x167   :  { %861 = vmatpush1.msra.mxu1 %v535_v10  ;;  %801 = vmatprep.subr.mxu0 %v384_v11  ;;  %v608_v9 = vld [vmem:[#allocation8 + $0x7b8] sm:$0xff]  ;;  %v459_v10 = vld [vmem:[#allocation8 + $0x310] sm:$0xff] }
 0x168   :  { %862 = vmatprep.subr.mxu1 %v532_v12  ;;  %802 = vmatpush1.msra.mxu0 %v383_v13  ;;  %v607_v11 = vld [vmem:[#allocation8 + $0x7b0] sm:$0xff]  ;;  %v456_v12 = vld [vmem:[#allocation8 + $0x2f8] sm:$0xff] }
 0x169   :  { %863 = vmatpush1.msra.mxu1 %v531_v14  ;;  %803 = vmatprep.subr.mxu0 %v380_v15  ;;  %v604_v13 = vld [vmem:[#allocation8 + $0x798] sm:$0xff]  ;;  %v455_v14 = vld [vmem:[#allocation8 + $0x2f0] sm:$0xff] }
 0x16a   :  { %864 = vmatprep.subr.mxu1 %v528_v16  ;;  %804 = vmatpush1.msra.mxu0 %v379_v17  ;;  %v603_v15 = vld [vmem:[#allocation8 + $0x790] sm:$0xff]  ;;  %v452_v16 = vld [vmem:[#allocation8 + $0x2d8] sm:$0xff] }
 0x16b   :  { %865 = vmatpush1.msra.mxu1 %v527_v18  ;;  %805 = vmatprep.subr.mxu0 %v376_v19  ;;  %v600_v17 = vld [vmem:[#allocation8 + $0x778] sm:$0xff]  ;;  %v451_v18 = vld [vmem:[#allocation8 + $0x2d0] sm:$0xff] }
 0x16c   :  { %866 = vmatprep.subr.mxu1 %v524_v20  ;;  %806 = vmatpush1.msra.mxu0 %v375_v21  ;;  %v599_v19 = vld [vmem:[#allocation8 + $0x770] sm:$0xff]  ;;  %v448_v20 = vld [vmem:[#allocation8 + $0x2b8] sm:$0xff] }
 0x16d   :  { %867 = vmatpush1.msra.mxu1 %v523_v22  ;;  %807 = vmatprep.subr.mxu0 %v372_v23  ;;  %v596_v21 = vld [vmem:[#allocation8 + $0x758] sm:$0xff]  ;;  %v447_v22 = vld [vmem:[#allocation8 + $0x2b0] sm:$0xff] }
 0x16e   :  { %868 = vmatprep.subr.mxu1 %v520_v24  ;;  %808 = vmatpush1.msra.mxu0 %v371_v27  ;;  %v595_v23 = vld [vmem:[#allocation8 + $0x750] sm:$0xff]  ;;  %v444_v24 = vld [vmem:[#allocation8 + $0x298] sm:$0xff] }
 0x16f   :  { %869 = vmatpush1.msra.mxu1 %v519_v29  ;;  %809 = vmatprep.subr.mxu0 %v368_v30  ;;  %v592_v27 = vld [vmem:[#allocation8 + $0x738] sm:$0xff]  ;;  %v443_v29 = vld [vmem:[#allocation8 + $0x290] sm:$0xff] }
 0x170   :  { %870 = vmatprep.subr.mxu1 %v516_v31  ;;  %810 = vmatpush1.msra.mxu0 %v367_v33  ;;  %v591_v30 = vld [vmem:[#allocation8 + $0x730] sm:$0xff]  ;;  %v440_v31 = vld [vmem:[#allocation8 + $0x278] sm:$0xff] }
 0x171   :  { %871 = vmatpush1.msra.mxu1 %v515_v34  ;;  %811 = vmatprep.subr.mxu0 %v364_v36  ;;  %v588_v33 = vld [vmem:[#allocation8 + $0x718] sm:$0xff]  ;;  %v439_v34 = vld [vmem:[#allocation8 + $0x270] sm:$0xff] }
 0x172   :  { %872 = vmatprep.subr.mxu1 %v512_v39  ;;  %812 = vmatpush1.msra.mxu0 %v363_v40  ;;  %v587_v36 = vld [vmem:[#allocation8 + $0x710] sm:$0xff]  ;;  %v436_v39 = vld [vmem:[#allocation8 + $0x258] sm:$0xff] }
 0x173   :  { %873 = vmatpush1.msra.mxu1 %v511_v41  ;;  %813 = vmatprep.subr.mxu0 %v488_v42  ;;  %v584_v40 = vld [vmem:[#allocation8 + $0x6f8] sm:$0xff]  ;;  %v435_v41 = vld [vmem:[#allocation8 + $0x250] sm:$0xff] }
 0x174   :  { %874 = vmatprep.subr.mxu1 %v508_v43  ;;  %814 = vmatpush2.msra.mxu0 %v487_v44  ;;  %v583_v42 = vld [vmem:[#allocation8 + $0x6f0] sm:$0xff]  ;;  %v432_v43 = vld [vmem:[#allocation8 + $0x238] sm:$0xff] }
 0x175   :  { %875 = vmatpush1.msra.mxu1 %v507_v45  ;;  %815 = vmatprep.subr.mxu0 %v484_v46  ;;  %v580_v44 = vld [vmem:[#allocation8 + $0x6d8] sm:$0xff]  ;;  %v431_v45 = vld [vmem:[#allocation8 + $0x230] sm:$0xff] }
 0x176   :  { %876 = vmatprep.subr.mxu1 %v504_v47  ;;  %816 = vmatpush2.msra.mxu0 %v483_v49  ;;  %v579_v46 = vld [vmem:[#allocation8 + $0x6d0] sm:$0xff]  ;;  %v428_v47 = vld [vmem:[#allocation8 + $0x218] sm:$0xff] }
 0x177   :  { %877 = vmatpush1.msra.mxu1 %v503_v50  ;;  %817 = vmatprep.subr.mxu0 %v480_v51  ;;  %v576_v49 = vld [vmem:[#allocation8 + $0x6b8] sm:$0xff]  ;;  %v427_v50 = vld [vmem:[#allocation8 + $0x210] sm:$0xff] }
 0x178   :  { %878 = vmatprep.subr.mxu1 %v500_v52  ;;  %818 = vmatpush2.msra.mxu0 %v479_v53  ;;  %v575_v51 = vld [vmem:[#allocation8 + $0x6b0] sm:$0xff]  ;;  %v572_v52 = vld [vmem:[#allocation8 + $0x698] sm:$0xff]  ;;  %v1003_v53 = vld [vmem:[#allocation11 + $0x260] sm:$0xff] }
 0x179   :  { %879 = vmatpush1.msra.mxu1 %v499_v54  ;;  %819 = vmatprep.subr.mxu0 %v476_v55  ;;  %v571_v54 = vld [vmem:[#allocation8 + $0x690] sm:$0xff]  ;;  %v1002_v55 = vld [vmem:[#allocation11 + $0x258] sm:$0xff] }
 0x17a   :  { %880 = vmatprep.subr.mxu1 %v496_v57  ;;  %820 = vmatpush2.msra.mxu0 %v475_v58  ;;  %v568_v57 = vld [vmem:[#allocation8 + $0x678] sm:$0xff] }
 0x17b   :  { %881 = vmatpush1.msra.mxu1 %v495_v59  ;;  %821 = vmatprep.subr.mxu0 %v472_v60  ;;  %v998_v58 = vld [vmem:[#allocation11 + $0x238] sm:$0xff]  ;;  %v567_v59 = vld [vmem:[#allocation8 + $0x670] sm:$0xff] }
 0x17c   :  { %882 = vmatprep.subr.mxu1 %v492_v61  ;;  %822 = vmatpush2.msra.mxu0 %v471_v62  ;;  %v997_v60 = vld [vmem:[#allocation11 + $0x230] sm:$0xff] }
 0x17d   :  { %883 = vmatpush1.msra.mxu1 %v491_v63  ;;  %823 = vmatprep.subr.mxu0 %v468_v0  ;;  %v564_v61 = vld [vmem:[#allocation8 + $0x658] sm:$0xff]  ;;  %v563_v63 = vld [vmem:[#allocation8 + $0x650] sm:$0xff] }
 0x17e   :  { %884 = vmatprep.subr.mxu1 %v616_v1  ;;  %824 = vmatpush2.msra.mxu0 %v467_v2  ;;  %v993_v62 = vld [vmem:[#allocation11 + $0x210] sm:$0xff]  ;;  %v992_v0 = vld [vmem:[#allocation11 + $0x208] sm:$0xff] }
 0x17f   :  { %885 = vmatpush2.msra.mxu1 %v615_v3  ;;  %825 = vmatprep.subr.mxu0 %v464_v4  ;;  %v560_v1 = vld [vmem:[#allocation8 + $0x638] sm:$0xff]  ;;  %v988_v2 = vld [vmem:[#allocation11 + $0x1e8] sm:$0xff]  ;;  %v983_v4 = vld [vmem:[#allocation11 + $0x1c0] sm:$0xff] }
 0x180   :  { %886 = vmatprep.subr.mxu1 %v612_v5  ;;  %826 = vmatpush2.msra.mxu0 %v463_v6  ;;  %v556_v3 = vld [vmem:[#allocation8 + $0x618] sm:$0xff]  ;;  %v555_v5 = vld [vmem:[#allocation8 + $0x610] sm:$0xff] }
 0x181   :  { %887 = vmatpush2.msra.mxu1 %v611_v7  ;;  %827 = vmatprep.subr.mxu0 %v460_v8  ;;  %v982_v6 = vld [vmem:[#allocation11 + $0x1b8] sm:$0xff]  ;;  %v977_v8 = vld [vmem:[#allocation11 + $0x190] sm:$0xff] }
 0x182   :  { %888 = vmatprep.subr.mxu1 %v608_v9  ;;  %828 = vmatpush2.msra.mxu0 %v459_v10  ;;  %v978_v7 = vld [vmem:[#allocation11 + $0x198] sm:$0xff]  ;;  %v973_v9 = vld [vmem:[#allocation11 + $0x170] sm:$0xff]  ;;  %v972_v10 = vld [vmem:[#allocation11 + $0x168] sm:$0xff] }
 0x183   :  { %889 = vmatpush2.msra.mxu1 %v607_v11  ;;  %829 = vmatprep.subr.mxu0 %v456_v12  ;;  %v968_v11 = vld [vmem:[#allocation11 + $0x148] sm:$0xff]  ;;  %v967_v12 = vld [vmem:[#allocation11 + $0x140] sm:$0xff]  ;;  %v953_v48 = vld [vmem:[#allocation11 + $0xd0] sm:$0xff] }
 0x184   :  { %890 = vmatprep.subr.mxu1 %v604_v13  ;;  %830 = vmatpush2.msra.mxu0 %v455_v14  ;;  %v963_v13 = vld [vmem:[#allocation11 + $0x120] sm:$0xff]  ;;  %v962_v14 = vld [vmem:[#allocation11 + $0x118] sm:$0xff] }
 0x185   :  { %891 = vmatpush2.msra.mxu1 %v603_v15  ;;  %831 = vmatprep.subr.mxu0 %v452_v16  ;;  %v958_v15 = vld [vmem:[#allocation11 + $0xf8] sm:$0xff]  ;;  %v1163_v16 = vld [vmem:[#allocation11 + $0x760] sm:$0xff] }
 0x186   :  { %892 = vmatprep.subr.mxu1 %v600_v17  ;;  %832 = vmatpush2.msra.mxu0 %v451_v18  ;;  %v957_v17 = vld [vmem:[#allocation11 + $0xf0] sm:$0xff]  ;;  %v1162_v18 = vld [vmem:[#allocation11 + $0x758] sm:$0xff] }
 0x187   :  { %893 = vmatpush2.msra.mxu1 %v599_v19  ;;  %833 = vmatprep.subr.mxu0 %v448_v20  ;;  %v952_v19 = vld [vmem:[#allocation11 + $0xc8] sm:$0xff]  ;;  %v1157_v20 = vld [vmem:[#allocation11 + $0x730] sm:$0xff] }
 0x188   :  { %894 = vmatprep.subr.mxu1 %v596_v21  ;;  %834 = vmatpush2.msra.mxu0 %v447_v22  ;;  %v948_v21 = vld [vmem:[#allocation11 + $0xa8] sm:$0xff]  ;;  %v1153_v22 = vld [vmem:[#allocation11 + $0x710] sm:$0xff] }
 0x189   :  { %895 = vmatpush2.msra.mxu1 %v595_v23  ;;  %835 = vmatprep.subr.mxu0 %v444_v24  ;;  %v947_v23 = vld [vmem:[#allocation11 + $0xa0] sm:$0xff]  ;;  %v1152_v24 = vld [vmem:[#allocation11 + $0x708] sm:$0xff] }
 0x18a   :  { %896 = vmatprep.subr.mxu1 %v592_v27  ;;  %836 = vmatpush2.msra.mxu0 %v443_v29  ;;  %v943_v27 = vld [vmem:[#allocation11 + $0x80] sm:$0xff]  ;;  %v1148_v29 = vld [vmem:[#allocation11 + $0x6e8] sm:$0xff] }
 0x18b   :  { %897 = vmatpush2.msra.mxu1 %v591_v30  ;;  %837 = vmatprep.subr.mxu0 %v440_v31  ;;  %v942_v30 = vld [vmem:[#allocation11 + $0x78] sm:$0xff]  ;;  %v1147_v31 = vld [vmem:[#allocation11 + $0x6e0] sm:$0xff] }
 0x18c   :  { %898 = vmatprep.subr.mxu1 %v588_v33  ;;  %838 = vmatpush2.msra.mxu0 %v439_v34  ;;  %v938_v33 = vld [vmem:[#allocation11 + $0x58] sm:$0xff]  ;;  %v1143_v34 = vld [vmem:[#allocation11 + $0x6c0] sm:$0xff] }
 0x18d   :  { %899 = vmatpush2.msra.mxu1 %v587_v36  ;;  %839 = vmatprep.subr.mxu0 %v436_v39  ;;  %v937_v36 = vld [vmem:[#allocation11 + $0x50] sm:$0xff]  ;;  %v1142_v39 = vld [vmem:[#allocation11 + $0x6b8] sm:$0xff] }
 0x18e   :  { %900 = vmatprep.subr.mxu1 %v584_v40  ;;  %840 = vmatpush2.msra.mxu0 %v435_v41  ;;  %v933_v40 = vld [vmem:[#allocation11 + $0x30] sm:$0xff]  ;;  %v1138_v41 = vld [vmem:[#allocation11 + $0x698] sm:$0xff] }
 0x18f   :  { %901 = vmatpush2.msra.mxu1 %v583_v42  ;;  %841 = vmatprep.subr.mxu0 %v432_v43  ;;  %v932_v42 = vld [vmem:[#allocation11 + $0x28] sm:$0xff]  ;;  %v1137_v43 = vld [vmem:[#allocation11 + $0x690] sm:$0xff] }
 0x190   :  { %902 = vmatprep.subr.mxu1 %v580_v44  ;;  %842 = vmatpush2.msra.mxu0 %v431_v45  ;;  %v928_v44 = vld [vmem:[#allocation11 + $0x8] sm:$0xff]  ;;  %v1133_v45 = vld [vmem:[#allocation11 + $0x670] sm:$0xff] }
 0x191   :  { %903 = vmatpush2.msra.mxu1 %v579_v46  ;;  %843 = vmatprep.subr.mxu0 %v428_v47  ;;  %v927_v46 = vld [vmem:[#allocation11] sm:$0xff]  ;;  %v1132_v47 = vld [vmem:[#allocation11 + $0x668] sm:$0xff] }
 0x192   :  { %904 = vmatprep.subr.mxu1 %v576_v49  ;;  %844 = vmatpush2.msra.mxu0 %v427_v50  ;;  %v1083_v49 = vld [vmem:[#allocation11 + $0x4e0] sm:$0xff]  ;;  %v1128_v50 = vld [vmem:[#allocation11 + $0x648] sm:$0xff] }
 0x193   :  { %905 = vmatpush2.msra.mxu1 %v575_v51  ;;  %846 = vmatmul.mubr.f32.vlgmr.msra.gmra.mxu0 %v357_v38  ;;  %v987_v38 = vld [vmem:[#allocation11 + $0x1e0] sm:$0xff]  ;;  %v1082_v51 = vld [vmem:[#allocation11 + $0x4d8] sm:$0xff] }
 0x194   :  { %906 = vmatprep.subr.mxu1 %v572_v52  ;;  %1274 = vmatprep.subr.mxu0 %v1003_v53  ;;  %v1127_v52 = vld [vmem:[#allocation11 + $0x640] sm:$0xff]  ;;  %v1078_v53 = vld [vmem:[#allocation11 + $0x4b8] sm:$0xff] }
 0x195   :  { %907 = vmatpush2.msra.mxu1 %v571_v54  ;;  %1275 = vmatpush1.msra.mxu0 %v1002_v55  ;;  %v1123_v54 = vld [vmem:[#allocation11 + $0x620] sm:$0xff]  ;;  %v1077_v55 = vld [vmem:[#allocation11 + $0x4b0] sm:$0xff] }
 0x196   :  { %908 = vmatprep.subr.mxu1 %v568_v57  ;;  %1276 = vmatprep.subr.mxu0 %v998_v58  ;;  %v1122_v57 = vld [vmem:[#allocation11 + $0x618] sm:$0xff]  ;;  %v1073_v58 = vld [vmem:[#allocation11 + $0x490] sm:$0xff] }
 0x197   :  { %909 = vmatpush2.msra.mxu1 %v567_v59  ;;  %1277 = vmatpush1.msra.mxu0 %v997_v60  ;;  %v1118_v59 = vld [vmem:[#allocation11 + $0x5f8] sm:$0xff]  ;;  %v1072_v60 = vld [vmem:[#allocation11 + $0x488] sm:$0xff] }
 0x198   :  { %910 = vmatprep.subr.mxu1 %v564_v61  ;;  %1278 = vmatprep.subr.mxu0 %v993_v62  ;;  %v1117_v61 = vld [vmem:[#allocation11 + $0x5f0] sm:$0xff]  ;;  %v1068_v62 = vld [vmem:[#allocation11 + $0x468] sm:$0xff] }
 0x199   :  { %911 = vmatpush2.msra.mxu1 %v563_v63  ;;  %1279 = vmatpush1.msra.mxu0 %v992_v0  ;;  %v1113_v63 = vld [vmem:[#allocation11 + $0x5d0] sm:$0xff]  ;;  %v1067_v0 = vld [vmem:[#allocation11 + $0x460] sm:$0xff] }
 0x19a   :  { %912 = vmatprep.subr.mxu1 %v560_v1  ;;  %1280 = vmatprep.subr.mxu0 %v988_v2  ;;  %v1112_v1 = vld [vmem:[#allocation11 + $0x5c8] sm:$0xff]  ;;  %v1063_v2 = vld [vmem:[#allocation11 + $0x440] sm:$0xff] }
 0x19b   :  { %913 = vmatpush2.msra.mxu1 %v559_v32  ;;  %1281 = vmatpush1.msra.mxu0 %v987_v38  ;;  %v1108_v32 = vld [vmem:[#allocation11 + $0x5a8] sm:$0xff]  ;;  %v1062_v38 = vld [vmem:[#allocation11 + $0x438] sm:$0xff] }
 0x19c   :  { %914 = vmatprep.subr.mxu1 %v556_v3  ;;  %1282 = vmatprep.subr.mxu0 %v983_v4  ;;  %v1107_v3 = vld [vmem:[#allocation11 + $0x5a0] sm:$0xff]  ;;  %v1058_v4 = vld [vmem:[#allocation11 + $0x418] sm:$0xff] }
 0x19d   :  { %915 = vmatpush2.msra.mxu1 %v555_v5  ;;  %1283 = vmatpush1.msra.mxu0 %v982_v6  ;;  %v1103_v5 = vld [vmem:[#allocation11 + $0x580] sm:$0xff]  ;;  %v1057_v6 = vld [vmem:[#allocation11 + $0x410] sm:$0xff] }
 0x19e   :  { %917 = vmatmul.mubr.f32.vlgmr.msra.gmra.mxu1 %v359_v56  ;;  %1284 = vmatprep.subr.mxu0 %v978_v7  ;;  %v1158_v56 = vld [vmem:[#allocation11 + $0x738] sm:$0xff] }
 0x19f   :  { %1285 = vmatpush1.msra.mxu0 %v977_v8  ;;  %1345 = vmatprep.subr.mxu1 %v1163_v16  ;;  %v1102_v7 = vld [vmem:[#allocation11 + $0x578] sm:$0xff]  ;;  %v1053_v8 = vld [vmem:[#allocation11 + $0x3f0] sm:$0xff]  ;;  %v1043_v16 = vld [vmem:[#allocation11 + $0x3a0] sm:$0xff] }
 0x1a0   :  { %1286 = vmatprep.subr.mxu0 %v973_v9  ;;  %1346 = vmatpush1.msra.mxu1 %v1162_v18  ;;  %v1098_v9 = vld [vmem:[#allocation11 + $0x558] sm:$0xff] }
 0x1a1   :  { %1287 = vmatpush1.msra.mxu0 %v972_v10  ;;  %1347 = vmatprep.subr.mxu1 %v1158_v56  ;;  %v1052_v10 = vld [vmem:[#allocation11 + $0x3e8] sm:$0xff]  ;;  %v1042_v18 = vld [vmem:[#allocation11 + $0x398] sm:$0xff] }
 0x1a2   :  { %1288 = vmatprep.subr.mxu0 %v968_v11  ;;  %1348 = vmatpush1.msra.mxu1 %v1157_v20  ;;  %v1097_v11 = vld [vmem:[#allocation11 + $0x550] sm:$0xff]  ;;  %v1038_v56 = vld [vmem:[#allocation11 + $0x378] sm:$0xff] }
 0x1a3   :  { %1289 = vmatpush1.msra.mxu0 %v967_v12  ;;  %1349 = vmatprep.subr.mxu1 %v1153_v22  ;;  %v1048_v12 = vld [vmem:[#allocation11 + $0x3c8] sm:$0xff]  ;;  %v1037_v20 = vld [vmem:[#allocation11 + $0x370] sm:$0xff] }
 0x1a4   :  { %1290 = vmatprep.subr.mxu0 %v963_v13  ;;  %1350 = vmatpush1.msra.mxu1 %v1152_v24  ;;  %v1093_v13 = vld [vmem:[#allocation11 + $0x530] sm:$0xff]  ;;  %v1032_v24 = vld [vmem:[#allocation11 + $0x348] sm:$0xff] }
 0x1a5   :  { %1291 = vmatpush1.msra.mxu0 %v962_v14  ;;  %1351 = vmatprep.subr.mxu1 %v1148_v29  ;;  %v1047_v14 = vld [vmem:[#allocation11 + $0x3c0] sm:$0xff]  ;;  %v1033_v22 = vld [vmem:[#allocation11 + $0x350] sm:$0xff]  ;;  %v1028_v29 = vld [vmem:[#allocation11 + $0x328] sm:$0xff] }
 0x1a6   :  { %1292 = vmatprep.subr.mxu0 %v958_v15  ;;  %1352 = vmatpush1.msra.mxu1 %v1147_v31  ;;  %v1092_v15 = vld [vmem:[#allocation11 + $0x528] sm:$0xff]  ;;  %v1027_v31 = vld [vmem:[#allocation11 + $0x320] sm:$0xff] }
 0x1a7   :  { %1293 = vmatpush1.msra.mxu0 %v957_v17  ;;  %1353 = vmatprep.subr.mxu1 %v1143_v34  ;;  %v1088_v17 = vld [vmem:[#allocation11 + $0x508] sm:$0xff]  ;;  %v1023_v34 = vld [vmem:[#allocation11 + $0x300] sm:$0xff] }
 0x1a8   :  { %1294 = vmatprep.subr.mxu0 %v953_v48  ;;  %1354 = vmatpush1.msra.mxu1 %v1142_v39  ;;  %v1087_v48 = vld [vmem:[#allocation11 + $0x500] sm:$0xff]  ;;  %v1022_v39 = vld [vmem:[#allocation11 + $0x2f8] sm:$0xff] }
 0x1a9   :  { %1295 = vmatpush1.msra.mxu0 %v952_v19  ;;  %1355 = vmatprep.subr.mxu1 %v1138_v41  ;;  %v1243_v19 = vld [vmem:[#allocation11 + $0x9e0] sm:$0xff]  ;;  %v1018_v41 = vld [vmem:[#allocation11 + $0x2d8] sm:$0xff] }
 0x1aa   :  { %1296 = vmatprep.subr.mxu0 %v948_v21  ;;  %1356 = vmatpush1.msra.mxu1 %v1137_v43  ;;  %v1242_v21 = vld [vmem:[#allocation11 + $0x9d8] sm:$0xff]  ;;  %v1017_v43 = vld [vmem:[#allocation11 + $0x2d0] sm:$0xff] }
 0x1ab   :  { %1297 = vmatpush1.msra.mxu0 %v947_v23  ;;  %1357 = vmatprep.subr.mxu1 %v1133_v45  ;;  %v1238_v23 = vld [vmem:[#allocation11 + $0x9b8] sm:$0xff]  ;;  %v1013_v45 = vld [vmem:[#allocation11 + $0x2b0] sm:$0xff] }
 0x1ac   :  { %1298 = vmatprep.subr.mxu0 %v943_v27  ;;  %1358 = vmatpush1.msra.mxu1 %v1132_v47  ;;  %v1237_v27 = vld [vmem:[#allocation11 + $0x9b0] sm:$0xff]  ;;  %v1012_v47 = vld [vmem:[#allocation11 + $0x2a8] sm:$0xff] }
 0x1ad   :  { %1299 = vmatpush1.msra.mxu0 %v942_v30  ;;  %1359 = vmatprep.subr.mxu1 %v1128_v50  ;;  %v1233_v30 = vld [vmem:[#allocation11 + $0x990] sm:$0xff]  ;;  %v1008_v50 = vld [vmem:[#allocation11 + $0x288] sm:$0xff] }
 0x1ae   :  { %1300 = vmatprep.subr.mxu0 %v938_v33  ;;  %1360 = vmatpush1.msra.mxu1 %v1127_v52  ;;  %v1232_v33 = vld [vmem:[#allocation11 + $0x988] sm:$0xff]  ;;  %v1007_v52 = vld [vmem:[#allocation11 + $0x280] sm:$0xff] }
 0x1af   :  { %1301 = vmatpush1.msra.mxu0 %v937_v36  ;;  %1361 = vmatprep.subr.mxu1 %v1123_v54  ;;  %v1228_v36 = vld [vmem:[#allocation11 + $0x968] sm:$0xff]  ;;  %v1005_v54 = vld [vmem:[#allocation11 + $0x270] sm:$0xff] }
 0x1b0   :  { %1302 = vmatprep.subr.mxu0 %v933_v40  ;;  %1362 = vmatpush1.msra.mxu1 %v1122_v57  ;;  %v1227_v40 = vld [vmem:[#allocation11 + $0x960] sm:$0xff] }
 0x1b1   :  { %1303 = vmatpush1.msra.mxu0 %v932_v42  ;;  %1363 = vmatprep.subr.mxu1 %v1118_v59  ;;  %v1223_v42 = vld [vmem:[#allocation11 + $0x940] sm:$0xff]  ;;  %v1202_v59 = vld [vmem:[#allocation11 + $0x898] sm:$0xff] }
 0x1b2   :  { %1304 = vmatprep.subr.mxu0 %v928_v44  ;;  %1364 = vmatpush1.msra.mxu1 %v1117_v61  ;;  %v1222_v44 = vld [vmem:[#allocation11 + $0x938] sm:$0xff]  ;;  %v1207_v57 = vld [vmem:[#allocation11 + $0x8c0] sm:$0xff]  ;;  %v1197_v61 = vld [vmem:[#allocation11 + $0x870] sm:$0xff] }
 0x1b3   :  { %1305 = vmatpush1.msra.mxu0 %v927_v46  ;;  %1365 = vmatprep.subr.mxu1 %v1113_v63  ;;  %v1218_v46 = vld [vmem:[#allocation11 + $0x918] sm:$0xff]  ;;  %v1192_v63 = vld [vmem:[#allocation11 + $0x848] sm:$0xff] }
 0x1b4   :  { %1306 = vmatprep.subr.mxu0 %v1083_v49  ;;  %1366 = vmatpush1.msra.mxu1 %v1112_v1  ;;  %v1217_v49 = vld [vmem:[#allocation11 + $0x910] sm:$0xff]  ;;  %v1187_v1 = vld [vmem:[#allocation11 + $0x820] sm:$0xff] }
 0x1b5   :  { %1307 = vmatpush2.msra.mxu0 %v1082_v51  ;;  %1367 = vmatprep.subr.mxu1 %v1108_v32  ;;  %v1213_v51 = vld [vmem:[#allocation11 + $0x8f0] sm:$0xff]  ;;  %v1182_v32 = vld [vmem:[#allocation11 + $0x7f8] sm:$0xff] }
 0x1b6   :  { %1308 = vmatprep.subr.mxu0 %v1078_v53  ;;  %1368 = vmatpush1.msra.mxu1 %v1107_v3  ;;  %v1212_v53 = vld [vmem:[#allocation11 + $0x8e8] sm:$0xff]  ;;  %v1177_v3 = vld [vmem:[#allocation11 + $0x7d0] sm:$0xff] }
 0x1b7   :  { %1309 = vmatpush2.msra.mxu0 %v1077_v55  ;;  %1369 = vmatprep.subr.mxu1 %v1103_v5  ;;  %v1208_v55 = vld [vmem:[#allocation11 + $0x8c8] sm:$0xff] }
 0x1b8   :  { %1310 = vmatprep.subr.mxu0 %v1073_v58  ;;  %1370 = vmatpush1.msra.mxu1 %v1102_v7  ;;  %v1203_v58 = vld [vmem:[#allocation11 + $0x8a0] sm:$0xff]  ;;  %v1172_v5 = vld [vmem:[#allocation11 + $0x7a8] sm:$0xff] }
 0x1b9   :  { %1311 = vmatpush2.msra.mxu0 %v1072_v60  ;;  %1371 = vmatprep.subr.mxu1 %v1098_v9  ;;  %v1198_v60 = vld [vmem:[#allocation11 + $0x878] sm:$0xff]  ;;  %v1167_v7 = vld [vmem:[#allocation11 + $0x780] sm:$0xff] }
 0x1ba   :  { %1312 = vmatprep.subr.mxu0 %v1068_v62  ;;  %1372 = vmatpush1.msra.mxu1 %v1097_v11  ;;  %v1193_v62 = vld [vmem:[#allocation11 + $0x850] sm:$0xff]  ;;  %v2674_v9 = vld [vmem:[#allocation10] sm:$0xf] }
 0x1bb   :  { %1313 = vmatpush2.msra.mxu0 %v1067_v0  ;;  %1373 = vmatprep.subr.mxu1 %v1093_v13  ;;  %v1188_v0 = vld [vmem:[#allocation11 + $0x828] sm:$0xff]  ;;  %v622_v11 = vrot.slane %v2674_v9, %v2645_v26 }
 0x1bc   :  { %1314 = vmatprep.subr.mxu0 %v1063_v2  ;;  %1374 = vmatpush1.msra.mxu1 %v1092_v15  ;;  %v1183_v2 = vld [vmem:[#allocation11 + $0x800] sm:$0xff] }
 0x1bd   :  { %1315 = vmatpush2.msra.mxu0 %v1062_v38  ;;  %1375 = vmatprep.subr.mxu1 %v1088_v17  ;;  %v1178_v38 = vld [vmem:[#allocation11 + $0x7d8] sm:$0xff] }
 0x1be   :  { %1316 = vmatprep.subr.mxu0 %v1058_v4  ;;  %1376 = vmatpush1.msra.mxu1 %v1087_v48  ;;  %v1173_v4 = vld [vmem:[#allocation11 + $0x7b0] sm:$0xff] }
 0x1bf   :  { %1317 = vmatpush2.msra.mxu0 %v1057_v6  ;;  %1377 = vmatprep.subr.mxu1 %v1243_v19  ;;  %v1168_v6 = vld [vmem:[#allocation11 + $0x788] sm:$0xff] }
 0x1c0   :  { %1318 = vmatprep.subr.mxu0 %v1053_v8  ;;  %1378 = vmatpush2.msra.mxu1 %v1242_v21  ;;  %v1165_v8 = vld [vmem:[#allocation11 + $0x770] sm:$0xff]  ;;  %v1000_v21 = vld [vmem:[#allocation11 + $0x248] sm:$0xff] }
 0x1c1   :  { %1319 = vmatpush2.msra.mxu0 %v1052_v10  ;;  %1379 = vmatprep.subr.mxu1 %v1238_v23  ;;  %v995_v23 = vld [vmem:[#allocation11 + $0x220] sm:$0xff] }
 0x1c2   :  { %1320 = vmatprep.subr.mxu0 %v1048_v12  ;;  %1380 = vmatpush2.msra.mxu1 %v1237_v27  ;;  %v626_v12 = vrot.slane %v2674_v9, %v2648_v28  ;;  %v990_v27 = vld [vmem:[#allocation11 + $0x1f8] sm:$0xff] }
 0x1c3   :  { %1321 = vmatpush2.msra.mxu0 %v1047_v14  ;;  %1381 = vmatprep.subr.mxu1 %v1233_v30  ;;  %v985_v30 = vld [vmem:[#allocation11 + $0x1d0] sm:$0xff] }
 0x1c4   :  { %1322 = vmatprep.subr.mxu0 %v1043_v16  ;;  %1382 = vmatpush2.msra.mxu1 %v1232_v33  ;;  %v980_v33 = vld [vmem:[#allocation11 + $0x1a8] sm:$0xff] }
 0x1c5   :  { %1323 = vmatpush2.msra.mxu0 %v1042_v18  ;;  %1383 = vmatprep.subr.mxu1 %v1228_v36  ;;  %v975_v36 = vld [vmem:[#allocation11 + $0x180] sm:$0xff] }
 0x1c6   :  { %1324 = vmatprep.subr.mxu0 %v1038_v56  ;;  %1384 = vmatpush2.msra.mxu1 %v1227_v40  ;;  %v970_v40 = vld [vmem:[#allocation11 + $0x158] sm:$0xff] }
 0x1c7   :  { %1325 = vmatpush2.msra.mxu0 %v1037_v20  ;;  %1385 = vmatprep.subr.mxu1 %v1223_v42  ;;  %v1004_v20 = vld [vmem:[#allocation11 + $0x268] sm:$0xff]  ;;  %v965_v42 = vld [vmem:[#allocation11 + $0x130] sm:$0xff] }
 0x1c8   :  { %1326 = vmatprep.subr.mxu0 %v1033_v22  ;;  %1386 = vmatpush2.msra.mxu1 %v1222_v44  ;;  %v999_v22 = vld [vmem:[#allocation11 + $0x240] sm:$0xff]  ;;  %v960_v44 = vld [vmem:[#allocation11 + $0x108] sm:$0xff] }
 0x1c9   :  { %1327 = vmatpush2.msra.mxu0 %v1032_v24  ;;  %1387 = vmatprep.subr.mxu1 %v1218_v46  ;;  %v994_v24 = vld [vmem:[#allocation11 + $0x218] sm:$0xff]  ;;  %v955_v46 = vld [vmem:[#allocation11 + $0xe0] sm:$0xff] }
 0x1ca   :  { %1328 = vmatprep.subr.mxu0 %v1028_v29  ;;  %1388 = vmatpush2.msra.mxu1 %v1217_v49  ;;  %v989_v29 = vld [vmem:[#allocation11 + $0x1f0] sm:$0xff]  ;;  %v950_v49 = vld [vmem:[#allocation11 + $0xb8] sm:$0xff] }
 0x1cb   :  { %1329 = vmatpush2.msra.mxu0 %v1027_v31  ;;  %1389 = vmatprep.subr.mxu1 %v1213_v51  ;;  %v984_v31 = vld [vmem:[#allocation11 + $0x1c8] sm:$0xff]  ;;  %v945_v51 = vld [vmem:[#allocation11 + $0x90] sm:$0xff] }
 0x1cc   :  { %1330 = vmatprep.subr.mxu0 %v1023_v34  ;;  %1390 = vmatpush2.msra.mxu1 %v1212_v53  ;;  %v979_v34 = vld [vmem:[#allocation11 + $0x1a0] sm:$0xff]  ;;  %v940_v53 = vld [vmem:[#allocation11 + $0x68] sm:$0xff] }
 0x1cd   :  { %1331 = vmatpush2.msra.mxu0 %v1022_v39  ;;  %1391 = vmatprep.subr.mxu1 %v1208_v55  ;;  %v974_v39 = vld [vmem:[#allocation11 + $0x178] sm:$0xff]  ;;  %v935_v55 = vld [vmem:[#allocation11 + $0x40] sm:$0xff] }
 0x1ce   :  { %1332 = vmatprep.subr.mxu0 %v1018_v41  ;;  %1392 = vmatpush2.msra.mxu1 %v1207_v57  ;;  %v969_v41 = vld [vmem:[#allocation11 + $0x150] sm:$0xff]  ;;  %v934_v57 = vld [vmem:[#allocation11 + $0x38] sm:$0xff] }
 0x1cf   :  { %1333 = vmatpush2.msra.mxu0 %v1017_v43  ;;  %1393 = vmatprep.subr.mxu1 %v1203_v58  ;;  %v964_v43 = vld [vmem:[#allocation11 + $0x128] sm:$0xff]  ;;  %v930_v58 = vld [vmem:[#allocation11 + $0x18] sm:$0xff] }
 0x1d0   :  { %1334 = vmatprep.subr.mxu0 %v1013_v45  ;;  %1394 = vmatpush2.msra.mxu1 %v1202_v59  ;;  %v959_v45 = vld [vmem:[#allocation11 + $0x100] sm:$0xff]  ;;  %v929_v59 = vld [vmem:[#allocation11 + $0x10] sm:$0xff] }
 0x1d1   :  { %1335 = vmatpush2.msra.mxu0 %v1012_v47  ;;  %1395 = vmatprep.subr.mxu1 %v1198_v60  ;;  %v954_v47 = vld [vmem:[#allocation11 + $0xd8] sm:$0xff]  ;;  %v1085_v60 = vld [vmem:[#allocation11 + $0x4f0] sm:$0xff] }
 0x1d2   :  { %1336 = vmatprep.subr.mxu0 %v1008_v50  ;;  %1396 = vmatpush2.msra.mxu1 %v1197_v61  ;;  %v949_v50 = vld [vmem:[#allocation11 + $0xb0] sm:$0xff]  ;;  %v1084_v61 = vld [vmem:[#allocation11 + $0x4e8] sm:$0xff] }
 0x1d3   :  { %1337 = vmatpush2.msra.mxu0 %v1007_v52  ;;  %1397 = vmatprep.subr.mxu1 %v1193_v62  ;;  %v944_v52 = vld [vmem:[#allocation11 + $0x88] sm:$0xff] }
 0x1d4   :  { %1416 = vmatprep.subr.mxu0 %v1005_v54  ;;  %1398 = vmatpush2.msra.mxu1 %v1192_v63  ;;  %v939_v54 = vld [vmem:[#allocation11 + $0x60] sm:$0xff]  ;;  %v1080_v62 = vld [vmem:[#allocation11 + $0x4c8] sm:$0xff] }
 0x1d5   :  { %1399 = vmatprep.subr.mxu1 %v1188_v0  ;;  %v1079_v63 = vld [vmem:[#allocation11 + $0x4c0] sm:$0xff] }
 0x1d6   :  { %1400 = vmatpush2.msra.mxu1 %v1187_v1  ;;  %v1075_v0 = vld [vmem:[#allocation11 + $0x4a0] sm:$0xff]  ;;  %v1074_v1 = vld [vmem:[#allocation11 + $0x498] sm:$0xff] }
 0x1d7   :  { %1401 = vmatprep.subr.mxu1 %v1183_v2  ;;  %v1070_v2 = vld [vmem:[#allocation11 + $0x478] sm:$0xff] }
 0x1d8   :  { %1402 = vmatpush2.msra.mxu1 %v1182_v32  ;;  %v1069_v32 = vld [vmem:[#allocation11 + $0x470] sm:$0xff] }
 0x1d9   :  { %1403 = vmatprep.subr.mxu1 %v1178_v38  ;;  %v1065_v38 = vld [vmem:[#allocation11 + $0x450] sm:$0xff] }
 0x1da   :  { %1404 = vmatpush2.msra.mxu1 %v1177_v3  ;;  %v1064_v3 = vld [vmem:[#allocation11 + $0x448] sm:$0xff] }
 0x1db   :  { %1405 = vmatprep.subr.mxu1 %v1173_v4  ;;  %v1060_v4 = vld [vmem:[#allocation11 + $0x428] sm:$0xff] }
 0x1dc   :  { %1406 = vmatpush2.msra.mxu1 %v1172_v5  ;;  %v1059_v5 = vld [vmem:[#allocation11 + $0x420] sm:$0xff] }
 0x1dd   :  { %1407 = vmatprep.subr.mxu1 %v1168_v6  ;;  %v1055_v6 = vld [vmem:[#allocation11 + $0x400] sm:$0xff] }
 0x1de   :  { %1408 = vmatpush2.msra.mxu1 %v1167_v7  ;;  %v1054_v7 = vld [vmem:[#allocation11 + $0x3f8] sm:$0xff] }
 0x1df   :  { %1487 = vmatprep.subr.mxu1 %v1165_v8  ;;  %v1050_v8 = vld [vmem:[#allocation11 + $0x3d8] sm:$0xff] }
 0x213   :  { %v705_v10 = vpop.f32.mrf.mxu0 }
 0x214   :  { %v706_v14 = vadd.f32 %v705_v10, %v622_v11  ;;  %v1049_v10 = vld [vmem:[#allocation11 + $0x3d0] sm:$0xff] }
 0x215   :  { %v707_v13 = vpop.f32.mrf.mxu0  ;;  %v1045_v11 = vld [vmem:[#allocation11 + $0x3b0] sm:$0xff] }
 0x216   :  { %v708_v16 = vadd.f32 %v707_v13, %v626_v12  ;;  %v1044_v12 = vld [vmem:[#allocation11 + $0x3a8] sm:$0xff] }
 0x217   :  { %v1040_v13 = vld [vmem:[#allocation11 + $0x388] sm:$0xff] }
 0x21d   :  { %v776_v15 = vpop.f32.mrf.mxu1 }
 0x21e   :  { %v777_v17 = vadd.f32 %v776_v15, %v706_v14  ;;  %v1039_v14 = vld [vmem:[#allocation11 + $0x380] sm:$0xff] }
 0x21f   :  { %v778_v18 = vpop.f32.mrf.mxu1  ;;  %v1035_v15 = vld [vmem:[#allocation11 + $0x360] sm:$0xff] }
 0x220   :  { %v779_v48 = vadd.f32 %v778_v18, %v708_v16  ;;  %v2682_v19 = vmax.f32 %v777_v17, 0.0  ;;  %v1034_v16 = vld [vmem:[#allocation11 + $0x358] sm:$0xff] }
 0x221   :  { %v1030_v18 = vld [vmem:[#allocation11 + $0x338] sm:$0xff] }
 0x222   :  { %v2680_v56 = vmax.f32 %v779_v48, 0.0  ;;  %v1029_v48 = vld [vmem:[#allocation11 + $0x330] sm:$0xff] }
 0x224   :  { %1338 = vmatprep.mubr.f32.mxu0 %v2680_v56 }
 0x225   :  { %1339 = vmatmul.mubr.f32.vlgmr.msra.gmra.mxu0 %v2682_v19 }
 0x226   :  { %1417 = vmatpush1.msra.mxu0 %v1004_v20  ;;  %1480 = vmatprep.mubr.f32.mxu0 %v2680_v56  ;;  %v630_v20 = vrot.slane %v2674_v9, %v2655_v35 }
 0x227   :  { %1418 = vmatprep.subr.mxu0 %v1000_v21  ;;  %v1025_v21 = vld [vmem:[#allocation11 + $0x310] sm:$0xff] }
 0x228   :  { %1419 = vmatpush1.msra.mxu0 %v999_v22  ;;  %v634_v22 = vrot.slane %v2674_v9, %v2658_v37  ;;  %v1009_v9 = vld [vmem:[#allocation11 + $0x290] sm:$0xff] }
 0x229   :  { %1420 = vmatprep.subr.mxu0 %v995_v23  ;;  %v1024_v23 = vld [vmem:[#allocation11 + $0x308] sm:$0xff] }
 0x22a   :  { %1421 = vmatpush1.msra.mxu0 %v994_v24 }
 0x22b   :  { %1422 = vmatprep.subr.mxu0 %v990_v27  ;;  %v1020_v27 = vld [vmem:[#allocation11 + $0x2e8] sm:$0xff] }
 0x22c   :  { %1423 = vmatpush1.msra.mxu0 %v989_v29  ;;  %v1019_v29 = vld [vmem:[#allocation11 + $0x2e0] sm:$0xff] }
 0x22d   :  { %1424 = vmatprep.subr.mxu0 %v985_v30 }
 0x22e   :  { %1425 = vmatpush1.msra.mxu0 %v984_v31 }
 0x22f   :  { %1426 = vmatprep.subr.mxu0 %v980_v33  ;;  %v1015_v33 = vld [vmem:[#allocation11 + $0x2c0] sm:$0xff] }
 0x230   :  { %1427 = vmatpush1.msra.mxu0 %v979_v34 }
 0x231   :  { %1428 = vmatprep.subr.mxu0 %v975_v36  ;;  %v1014_v36 = vld [vmem:[#allocation11 + $0x2b8] sm:$0xff] }
 0x232   :  { %1429 = vmatpush1.msra.mxu0 %v974_v39 }
 0x233   :  { %1430 = vmatprep.subr.mxu0 %v970_v40 }
 0x234   :  { %1431 = vmatpush1.msra.mxu0 %v969_v41  ;;  %v1010_v41 = vld [vmem:[#allocation11 + $0x298] sm:$0xff] }
 0x235   :  { %1432 = vmatprep.subr.mxu0 %v965_v42 }
 0x236   :  { %1433 = vmatpush1.msra.mxu0 %v964_v43 }
 0x237   :  { %1434 = vmatprep.subr.mxu0 %v960_v44  ;;  %v1086_v44 = vld [vmem:[#allocation11 + $0x4f8] sm:$0xff] }
 0x238   :  { %1435 = vmatpush1.msra.mxu0 %v959_v45 }
 0x239   :  { %1436 = vmatprep.subr.mxu0 %v955_v46  ;;  %v1164_v46 = vld [vmem:[#allocation11 + $0x768] sm:$0xff] }
 0x23a   :  { %1437 = vmatpush1.msra.mxu0 %v954_v47  ;;  %v1160_v47 = vld [vmem:[#allocation11 + $0x748] sm:$0xff] }
 0x23b   :  { %1438 = vmatprep.subr.mxu0 %v950_v49  ;;  %v1006_v49 = vld [vmem:[#allocation11 + $0x278] sm:$0xff] }
 0x23c   :  { %1439 = vmatpush1.msra.mxu0 %v949_v50  ;;  %v1159_v50 = vld [vmem:[#allocation11 + $0x740] sm:$0xff] }
 0x23d   :  { %1440 = vmatprep.subr.mxu0 %v945_v51  ;;  %v1081_v51 = vld [vmem:[#allocation11 + $0x4d0] sm:$0xff] }
 0x23e   :  { %1441 = vmatpush1.msra.mxu0 %v944_v52  ;;  %v1155_v52 = vld [vmem:[#allocation11 + $0x720] sm:$0xff] }
 0x23f   :  { %1442 = vmatprep.subr.mxu0 %v940_v53  ;;  %v1001_v53 = vld [vmem:[#allocation11 + $0x250] sm:$0xff] }
 0x240   :  { %1443 = vmatpush1.msra.mxu0 %v939_v54  ;;  %v1154_v54 = vld [vmem:[#allocation11 + $0x718] sm:$0xff] }
 0x241   :  { %1444 = vmatprep.subr.mxu0 %v935_v55  ;;  %v1076_v55 = vld [vmem:[#allocation11 + $0x4a8] sm:$0xff] }
 0x242   :  { %1445 = vmatpush1.msra.mxu0 %v934_v57  ;;  %v1150_v57 = vld [vmem:[#allocation11 + $0x6f8] sm:$0xff] }
 0x243   :  { %1446 = vmatprep.subr.mxu0 %v930_v58  ;;  %v996_v58 = vld [vmem:[#allocation11 + $0x228] sm:$0xff] }
 0x244   :  { %1447 = vmatpush1.msra.mxu0 %v929_v59  ;;  %v1149_v59 = vld [vmem:[#allocation11 + $0x6f0] sm:$0xff] }
 0x245   :  { %1448 = vmatprep.subr.mxu0 %v1085_v60  ;;  %v1071_v60 = vld [vmem:[#allocation11 + $0x480] sm:$0xff] }
 0x246   :  { %1449 = vmatpush2.msra.mxu0 %v1084_v61  ;;  %v1145_v61 = vld [vmem:[#allocation11 + $0x6d0] sm:$0xff] }
 0x247   :  { %1450 = vmatprep.subr.mxu0 %v1080_v62  ;;  %v991_v62 = vld [vmem:[#allocation11 + $0x200] sm:$0xff] }
 0x248   :  { %1451 = vmatpush2.msra.mxu0 %v1079_v63  ;;  %v1144_v63 = vld [vmem:[#allocation11 + $0x6c8] sm:$0xff] }
 0x249   :  { %1452 = vmatprep.subr.mxu0 %v1075_v0  ;;  %v1066_v0 = vld [vmem:[#allocation11 + $0x458] sm:$0xff] }
 0x24a   :  { %1453 = vmatpush2.msra.mxu0 %v1074_v1  ;;  %v1140_v1 = vld [vmem:[#allocation11 + $0x6a8] sm:$0xff] }
 0x24b   :  { %1454 = vmatprep.subr.mxu0 %v1070_v2  ;;  %v1139_v2 = vld [vmem:[#allocation11 + $0x6a0] sm:$0xff] }
 0x24c   :  { %1455 = vmatpush2.msra.mxu0 %v1069_v32  ;;  %v1061_v32 = vld [vmem:[#allocation11 + $0x430] sm:$0xff] }
 0x24d   :  { %1456 = vmatprep.subr.mxu0 %v1065_v38  ;;  %v1135_v38 = vld [vmem:[#allocation11 + $0x680] sm:$0xff] }
 0x24e   :  { %1457 = vmatpush2.msra.mxu0 %v1064_v3  ;;  %v981_v3 = vld [vmem:[#allocation11 + $0x1b0] sm:$0xff] }
 0x24f   :  { %1458 = vmatprep.subr.mxu0 %v1060_v4  ;;  %v1134_v4 = vld [vmem:[#allocation11 + $0x678] sm:$0xff] }
 0x250   :  { %1459 = vmatpush2.msra.mxu0 %v1059_v5  ;;  %v1056_v5 = vld [vmem:[#allocation11 + $0x408] sm:$0xff] }
 0x251   :  { %1460 = vmatprep.subr.mxu0 %v1055_v6  ;;  %v1130_v6 = vld [vmem:[#allocation11 + $0x658] sm:$0xff] }
 0x252   :  { %1461 = vmatpush2.msra.mxu0 %v1054_v7  ;;  %v976_v7 = vld [vmem:[#allocation11 + $0x188] sm:$0xff] }
 0x253   :  { %1462 = vmatprep.subr.mxu0 %v1050_v8  ;;  %v847_v17 = vpop.f32.mrf.mxu0  ;;  %v1129_v8 = vld [vmem:[#allocation11 + $0x650] sm:$0xff] }
 0x254   :  { %1463 = vmatpush2.msra.mxu0 %v1049_v10  ;;  %v848_v30 = vadd.f32 %v847_v17, %v630_v20  ;;  %v1051_v10 = vld [vmem:[#allocation11 + $0x3e0] sm:$0xff]  ;;  %v961_v20 = vld [vmem:[#allocation11 + $0x110] sm:$0xff] }
 0x255   :  { %1464 = vmatprep.subr.mxu0 %v1045_v11  ;;  %v849_v24 = vpop.f32.mrf.mxu0  ;;  %v1125_v11 = vld [vmem:[#allocation11 + $0x630] sm:$0xff]  ;;  %v1119_v17 = vld [vmem:[#allocation11 + $0x600] sm:$0xff] }
 0x256   :  { %1465 = vmatpush2.msra.mxu0 %v1044_v12  ;;  %v850_v34 = vadd.f32 %v849_v24, %v634_v22  ;;  %v971_v12 = vld [vmem:[#allocation11 + $0x160] sm:$0xff]  ;;  %v1036_v22 = vld [vmem:[#allocation11 + $0x368] sm:$0xff] }
 0x257   :  { %1466 = vmatprep.subr.mxu0 %v1040_v13  ;;  %v1124_v13 = vld [vmem:[#allocation11 + $0x628] sm:$0xff] }
 0x258   :  { %1467 = vmatpush2.msra.mxu0 %v1039_v14  ;;  %v1046_v14 = vld [vmem:[#allocation11 + $0x3b8] sm:$0xff]  ;;  %v956_v24 = vld [vmem:[#allocation11 + $0xe8] sm:$0xff] }
 0x259   :  { %1468 = vmatprep.subr.mxu0 %v1035_v15  ;;  %v1120_v15 = vld [vmem:[#allocation11 + $0x608] sm:$0xff] }
 0x25a   :  { %1469 = vmatpush2.msra.mxu0 %v1034_v16  ;;  %v966_v16 = vld [vmem:[#allocation11 + $0x138] sm:$0xff] }
 0x25b   :  { %1470 = vmatprep.subr.mxu0 %v1030_v18  ;;  %v1041_v18 = vld [vmem:[#allocation11 + $0x390] sm:$0xff] }
 0x25c   :  { %1471 = vmatpush2.msra.mxu0 %v1029_v48  ;;  %v1115_v48 = vld [vmem:[#allocation11 + $0x5e0] sm:$0xff] }
 0x25d   :  { %1472 = vmatprep.subr.mxu0 %v1025_v21  ;;  %v1114_v21 = vld [vmem:[#allocation11 + $0x5d8] sm:$0xff] }
 0x25e   :  { %v918_v31 = vpop.f32.mrf.mxu1  ;;  %1473 = vmatpush2.msra.mxu0 %v1024_v23  ;;  %v1110_v23 = vld [vmem:[#allocation11 + $0x5b8] sm:$0xff] }
 0x25f   :  { %1474 = vmatprep.subr.mxu0 %v1020_v27  ;;  %v919_v39 = vadd.f32 %v918_v31, %v848_v30  ;;  %v1109_v27 = vld [vmem:[#allocation11 + $0x5b0] sm:$0xff]  ;;  %v951_v31 = vld [vmem:[#allocation11 + $0xc0] sm:$0xff] }
 0x260   :  { %v920_v40 = vpop.f32.mrf.mxu1  ;;  %1475 = vmatpush2.msra.mxu0 %v1019_v29  ;;  %v1031_v29 = vld [vmem:[#allocation11 + $0x340] sm:$0xff]  ;;  %v1105_v30 = vld [vmem:[#allocation11 + $0x590] sm:$0xff] }
 0x261   :  { %v921_v42 = vadd.f32 %v920_v40, %v850_v34  ;;  %1476 = vmatprep.subr.mxu0 %v1015_v33  ;;  %v2693_v45 = vmax.f32 %v919_v39, 0.0  ;;  %v1104_v33 = vld [vmem:[#allocation11 + $0x588] sm:$0xff]  ;;  %v1026_v34 = vld [vmem:[#allocation11 + $0x318] sm:$0xff]  ;;  %v1099_v40 = vld [vmem:[#allocation11 + $0x560] sm:$0xff] }
 0x262   :  { %1477 = vmatpush2.msra.mxu0 %v1014_v36  ;;  %v1100_v36 = vld [vmem:[#allocation11 + $0x568] sm:$0xff]  ;;  %v946_v39 = vld [vmem:[#allocation11 + $0x98] sm:$0xff] }
 0x263   :  { %v2691_v43 = vmax.f32 %v921_v42, 0.0  ;;  %1478 = vmatprep.subr.mxu0 %v1010_v41  ;;  %v1021_v41 = vld [vmem:[#allocation11 + $0x2f0] sm:$0xff]  ;;  %v1095_v42 = vld [vmem:[#allocation11 + $0x540] sm:$0xff] }
 0x264   :  { %1479 = vmatpush2.msra.mxu0 %v1009_v9  ;;  %v941_v9 = vld [vmem:[#allocation11 + $0x70] sm:$0xff] }
 0x265   :  { %1409 = vmatprep.mubr.f32.mxu1 %v2691_v43  ;;  %1481 = vmatmul.mubr.f32.vlgmr.msra.gmra.mxu0 %v2682_v19 }
 0x266   :  { %1410 = vmatmul.mubr.f32.vlgmr.msra.gmra.mxu1 %v2693_v45  ;;  %2139 = vmatprep.subr.mxu0 %v1086_v44  ;;  %v1094_v44 = vld [vmem:[#allocation11 + $0x538] sm:$0xff] }
 0x267   :  { %1488 = vmatpush1.msra.mxu1 %v1164_v46  ;;  %1551 = vmatprep.mubr.f32.mxu1 %v2691_v43  ;;  %v1016_v46 = vld [vmem:[#allocation11 + $0x2c8] sm:$0xff] }
 0x268   :  { %1489 = vmatprep.subr.mxu1 %v1160_v47  ;;  %2140 = vmatpush3.msra.mxu0 %v1006_v49  ;;  %v1090_v47 = vld [vmem:[#allocation11 + $0x518] sm:$0xff]  ;;  %v936_v49 = vld [vmem:[#allocation11 + $0x48] sm:$0xff] }
 0x269   :  { %1622 = vmatprep.mubr.f32.mxu0 %v2680_v56  ;;  %1490 = vmatpush1.msra.mxu1 %v1159_v50  ;;  %v986_v56 = vld [vmem:[#allocation11 + $0x1d8] sm:$0xff]  ;;  %v1089_v50 = vld [vmem:[#allocation11 + $0x510] sm:$0xff] }
 0x26a   :  { %2141 = vmatprep.subr.mxu0 %v1081_v51  ;;  %1491 = vmatprep.subr.mxu1 %v1155_v52  ;;  %v1011_v51 = vld [vmem:[#allocation11 + $0x2a0] sm:$0xff]  ;;  %v1245_v52 = vld [vmem:[#allocation11 + $0x9f0] sm:$0xff] }
 0x26b   :  { %2142 = vmatpush3.msra.mxu0 %v1001_v53  ;;  %1492 = vmatpush1.msra.mxu1 %v1154_v54  ;;  %v931_v53 = vld [vmem:[#allocation11 + $0x20] sm:$0xff]  ;;  %v1244_v54 = vld [vmem:[#allocation11 + $0x9e8] sm:$0xff] }
 0x26c   :  { %2143 = vmatprep.subr.mxu0 %v1076_v55  ;;  %1493 = vmatprep.subr.mxu1 %v1150_v57  ;;  %v1240_v55 = vld [vmem:[#allocation11 + $0x9c8] sm:$0xff]  ;;  %v1239_v57 = vld [vmem:[#allocation11 + $0x9c0] sm:$0xff] }
 0x26d   :  { %2144 = vmatpush3.msra.mxu0 %v996_v58  ;;  %1494 = vmatpush1.msra.mxu1 %v1149_v59  ;;  %v1735_v58 = vld [vmem:[#allocation14 + $0xf8] sm:$0xff] }
 0x26e   :  { %2145 = vmatprep.subr.mxu0 %v1071_v60  ;;  %1495 = vmatprep.subr.mxu1 %v1145_v61  ;;  %v1235_v59 = vld [vmem:[#allocation11 + $0x9a0] sm:$0xff]  ;;  %v1734_v60 = vld [vmem:[#allocation14 + $0xf0] sm:$0xff] }
 0x26f   :  { %2146 = vmatpush3.msra.mxu0 %v991_v62  ;;  %1496 = vmatpush1.msra.mxu1 %v1144_v63  ;;  %v1234_v61 = vld [vmem:[#allocation11 + $0x998] sm:$0xff]  ;;  %v1733_v62 = vld [vmem:[#allocation14 + $0xe8] sm:$0xff] }
 0x270   :  { %2147 = vmatprep.subr.mxu0 %v1066_v0  ;;  %1497 = vmatprep.subr.mxu1 %v1140_v1  ;;  %v1230_v63 = vld [vmem:[#allocation11 + $0x978] sm:$0xff]  ;;  %v1732_v0 = vld [vmem:[#allocation14 + $0xe0] sm:$0xff]  ;;  %v1229_v1 = vld [vmem:[#allocation11 + $0x970] sm:$0xff] }
 0x271   :  { %2148 = vmatpush3.msra.mxu0 %v986_v56  ;;  %1498 = vmatpush1.msra.mxu1 %v1139_v2  ;;  %v1731_v56 = vld [vmem:[#allocation14 + $0xd8] sm:$0xff]  ;;  %v1225_v2 = vld [vmem:[#allocation11 + $0x950] sm:$0xff] }
 0x272   :  { %2149 = vmatprep.subr.mxu0 %v1061_v32  ;;  %1499 = vmatprep.subr.mxu1 %v1135_v38  ;;  %v1730_v32 = vld [vmem:[#allocation14 + $0xd0] sm:$0xff]  ;;  %v1224_v38 = vld [vmem:[#allocation11 + $0x948] sm:$0xff] }
 0x273   :  { %2150 = vmatpush3.msra.mxu0 %v981_v3  ;;  %1500 = vmatpush1.msra.mxu1 %v1134_v4  ;;  %v1729_v3 = vld [vmem:[#allocation14 + $0xc8] sm:$0xff]  ;;  %v1728_v4 = vld [vmem:[#allocation14 + $0xc0] sm:$0xff] }
 0x274   :  { %2151 = vmatprep.subr.mxu0 %v1056_v5  ;;  %1501 = vmatprep.subr.mxu1 %v1130_v6  ;;  %v1219_v5 = vld [vmem:[#allocation11 + $0x920] sm:$0xff] }
 0x275   :  { %2152 = vmatpush3.msra.mxu0 %v976_v7  ;;  %1502 = vmatpush1.msra.mxu1 %v1129_v8  ;;  %v1727_v6 = vld [vmem:[#allocation14 + $0xb8] sm:$0xff]  ;;  %v1726_v8 = vld [vmem:[#allocation14 + $0xb0] sm:$0xff] }
 0x276   :  { %2153 = vmatprep.subr.mxu0 %v1051_v10  ;;  %1503 = vmatprep.subr.mxu1 %v1125_v11  ;;  %v1215_v7 = vld [vmem:[#allocation11 + $0x900] sm:$0xff]  ;;  %v1214_v10 = vld [vmem:[#allocation11 + $0x8f8] sm:$0xff]  ;;  %v1725_v11 = vld [vmem:[#allocation14 + $0xa8] sm:$0xff] }
 0x277   :  { %2154 = vmatpush3.msra.mxu0 %v971_v12  ;;  %1504 = vmatpush1.msra.mxu1 %v1124_v13  ;;  %v1210_v12 = vld [vmem:[#allocation11 + $0x8d8] sm:$0xff]  ;;  %v1724_v13 = vld [vmem:[#allocation14 + $0xa0] sm:$0xff] }
 0x278   :  { %2155 = vmatprep.subr.mxu0 %v1046_v14  ;;  %1505 = vmatprep.subr.mxu1 %v1120_v15  ;;  %v1209_v14 = vld [vmem:[#allocation11 + $0x8d0] sm:$0xff]  ;;  %v1723_v15 = vld [vmem:[#allocation14 + $0x98] sm:$0xff] }
 0x279   :  { %2156 = vmatpush3.msra.mxu0 %v966_v16  ;;  %1506 = vmatpush1.msra.mxu1 %v1119_v17  ;;  %v1205_v16 = vld [vmem:[#allocation11 + $0x8b0] sm:$0xff] }
 0x27a   :  { %2157 = vmatprep.subr.mxu0 %v1041_v18  ;;  %1507 = vmatprep.subr.mxu1 %v1115_v48  ;;  %v1722_v17 = vld [vmem:[#allocation14 + $0x90] sm:$0xff]  ;;  %v1204_v18 = vld [vmem:[#allocation11 + $0x8a8] sm:$0xff] }
 0x27b   :  { %2158 = vmatpush3.msra.mxu0 %v961_v20  ;;  %1508 = vmatpush1.msra.mxu1 %v1114_v21  ;;  %v1721_v48 = vld [vmem:[#allocation14 + $0x88] sm:$0xff]  ;;  %v1720_v21 = vld [vmem:[#allocation14 + $0x80] sm:$0xff] }
 0x27c   :  { %2159 = vmatprep.subr.mxu0 %v1036_v22  ;;  %1509 = vmatprep.subr.mxu1 %v1110_v23  ;;  %v1200_v20 = vld [vmem:[#allocation11 + $0x888] sm:$0xff]  ;;  %v1199_v22 = vld [vmem:[#allocation11 + $0x880] sm:$0xff] }
 0x27d   :  { %2160 = vmatpush3.msra.mxu0 %v956_v24  ;;  %1510 = vmatpush1.msra.mxu1 %v1109_v27  ;;  %v1719_v23 = vld [vmem:[#allocation14 + $0x78] sm:$0xff]  ;;  %v1718_v27 = vld [vmem:[#allocation14 + $0x70] sm:$0xff] }
 0x27e   :  { %2161 = vmatprep.subr.mxu0 %v1031_v29  ;;  %1511 = vmatprep.subr.mxu1 %v1105_v30  ;;  %v1195_v24 = vld [vmem:[#allocation11 + $0x860] sm:$0xff]  ;;  %v1194_v29 = vld [vmem:[#allocation11 + $0x858] sm:$0xff]  ;;  %v1717_v30 = vld [vmem:[#allocation14 + $0x68] sm:$0xff] }
 0x27f   :  { %2162 = vmatpush3.msra.mxu0 %v951_v31  ;;  %1512 = vmatpush1.msra.mxu1 %v1104_v33  ;;  %v1190_v31 = vld [vmem:[#allocation11 + $0x838] sm:$0xff]  ;;  %v1716_v33 = vld [vmem:[#allocation14 + $0x60] sm:$0xff] }
 0x280   :  { %2163 = vmatprep.subr.mxu0 %v1026_v34  ;;  %1513 = vmatprep.subr.mxu1 %v1100_v36  ;;  %v1189_v34 = vld [vmem:[#allocation11 + $0x830] sm:$0xff]  ;;  %v1715_v36 = vld [vmem:[#allocation14 + $0x58] sm:$0xff] }
 0x281   :  { %2164 = vmatpush3.msra.mxu0 %v946_v39  ;;  %1514 = vmatpush1.msra.mxu1 %v1099_v40  ;;  %v1185_v39 = vld [vmem:[#allocation11 + $0x810] sm:$0xff] }
 0x282   :  { %2165 = vmatprep.subr.mxu0 %v1021_v41  ;;  %1515 = vmatprep.subr.mxu1 %v1095_v42  ;;  %v1714_v40 = vld [vmem:[#allocation14 + $0x50] sm:$0xff]  ;;  %v1184_v41 = vld [vmem:[#allocation11 + $0x808] sm:$0xff] }
 0x283   :  { %2166 = vmatpush3.msra.mxu0 %v941_v9  ;;  %1516 = vmatpush1.msra.mxu1 %v1094_v44  ;;  %v1713_v42 = vld [vmem:[#allocation14 + $0x48] sm:$0xff]  ;;  %v1712_v44 = vld [vmem:[#allocation14 + $0x40] sm:$0xff] }
 0x284   :  { %2167 = vmatprep.subr.mxu0 %v1016_v46  ;;  %1517 = vmatprep.subr.mxu1 %v1090_v47  ;;  %v1180_v9 = vld [vmem:[#allocation11 + $0x7e8] sm:$0xff]  ;;  %v1179_v46 = vld [vmem:[#allocation11 + $0x7e0] sm:$0xff] }
 0x285   :  { %2168 = vmatpush3.msra.mxu0 %v936_v49  ;;  %1518 = vmatpush1.msra.mxu1 %v1089_v50  ;;  %v1711_v47 = vld [vmem:[#allocation14 + $0x38] sm:$0xff]  ;;  %v1710_v50 = vld [vmem:[#allocation14 + $0x30] sm:$0xff] }
 0x286   :  { %2169 = vmatprep.subr.mxu0 %v1011_v51  ;;  %1519 = vmatprep.subr.mxu1 %v1245_v52  ;;  %v1175_v49 = vld [vmem:[#allocation11 + $0x7c0] sm:$0xff]  ;;  %v1174_v51 = vld [vmem:[#allocation11 + $0x7b8] sm:$0xff]  ;;  %v1709_v52 = vld [vmem:[#allocation14 + $0x28] sm:$0xff] }
 0x287   :  { %2170 = vmatpush3.msra.mxu0 %v931_v53  ;;  %1520 = vmatpush2.msra.mxu1 %v1244_v54  ;;  %v1170_v53 = vld [vmem:[#allocation11 + $0x798] sm:$0xff]  ;;  %v1708_v54 = vld [vmem:[#allocation14 + $0x20] sm:$0xff] }
 0x288   :  { %1623 = vmatmul.mubr.f32.vlgmr.msra.gmra.mxu0 %v2682_v19  ;;  %1521 = vmatprep.subr.mxu1 %v1240_v55  ;;  %v1220_v19 = vld [vmem:[#allocation11 + $0x928] sm:$0xff]  ;;  %v1169_v55 = vld [vmem:[#allocation11 + $0x790] sm:$0xff] }
 0x289   :  { %1522 = vmatpush2.msra.mxu1 %v1239_v57  ;;  %1844 = vmatprep.subr.mxu0 %v1735_v58  ;;  %v1707_v57 = vld [vmem:[#allocation14 + $0x18] sm:$0xff] }
 0x28a   :  { %1523 = vmatprep.subr.mxu1 %v1235_v59  ;;  %1845 = vmatpush1.msra.mxu0 %v1734_v60  ;;  %v1246_v58 = vld [vmem:[#allocation11 + $0x9f8] sm:$0xff]  ;;  %v1241_v60 = vld [vmem:[#allocation11 + $0x9d0] sm:$0xff] }
 0x28b   :  { %1524 = vmatpush2.msra.mxu1 %v1234_v61  ;;  %1846 = vmatprep.subr.mxu0 %v1733_v62  ;;  %v1166_v59 = vld [vmem:[#allocation11 + $0x778] sm:$0xff]  ;;  %v1161_v62 = vld [vmem:[#allocation11 + $0x750] sm:$0xff] }
 0x28c   :  { %1525 = vmatprep.subr.mxu1 %v1230_v63  ;;  %1847 = vmatpush1.msra.mxu0 %v1732_v0  ;;  %v1706_v61 = vld [vmem:[#allocation14 + $0x10] sm:$0xff]  ;;  %v1705_v63 = vld [vmem:[#allocation14 + $0x8] sm:$0xff] }
 0x28d   :  { %1526 = vmatpush2.msra.mxu1 %v1229_v1  ;;  %1848 = vmatprep.subr.mxu0 %v1731_v56  ;;  %v1236_v0 = vld [vmem:[#allocation11 + $0x9a8] sm:$0xff] }
 0x28e   :  { %1527 = vmatprep.subr.mxu1 %v1225_v2  ;;  %1849 = vmatpush1.msra.mxu0 %v1730_v32  ;;  %v1704_v1 = vld [vmem:[#allocation14] sm:$0xff]  ;;  %v1767_v2 = vld [vmem:[#allocation14 + $0x1f8] sm:$0xff] }
 0x28f   :  { %1528 = vmatpush2.msra.mxu1 %v1224_v38  ;;  %1850 = vmatprep.subr.mxu0 %v1729_v3  ;;  %v1156_v56 = vld [vmem:[#allocation11 + $0x728] sm:$0xff]  ;;  %v1231_v32 = vld [vmem:[#allocation11 + $0x980] sm:$0xff]  ;;  %v1766_v38 = vld [vmem:[#allocation14 + $0x1f0] sm:$0xff] }
 0x290   :  { %1529 = vmatprep.subr.mxu1 %v1220_v19  ;;  %1851 = vmatpush1.msra.mxu0 %v1728_v4  ;;  %v1151_v3 = vld [vmem:[#allocation11 + $0x700] sm:$0xff]  ;;  %v1765_v19 = vld [vmem:[#allocation14 + $0x1e8] sm:$0xff]  ;;  %v1226_v4 = vld [vmem:[#allocation11 + $0x958] sm:$0xff] }
 0x291   :  { %1530 = vmatpush2.msra.mxu1 %v1219_v5  ;;  %1852 = vmatprep.subr.mxu0 %v1727_v6  ;;  %v1764_v5 = vld [vmem:[#allocation14 + $0x1e0] sm:$0xff]  ;;  %v1763_v6 = vld [vmem:[#allocation14 + $0x1d8] sm:$0xff] }
 0x292   :  { %1531 = vmatprep.subr.mxu1 %v1215_v7  ;;  %1853 = vmatpush1.msra.mxu0 %v1726_v8  ;;  %v1221_v7 = vld [vmem:[#allocation11 + $0x930] sm:$0xff] }
 0x293   :  { %1532 = vmatpush2.msra.mxu1 %v1214_v10  ;;  %1854 = vmatprep.subr.mxu0 %v1725_v11  ;;  %v1762_v8 = vld [vmem:[#allocation14 + $0x1d0] sm:$0xff]  ;;  %v1761_v11 = vld [vmem:[#allocation14 + $0x1c8] sm:$0xff] }
 0x294   :  { %1533 = vmatprep.subr.mxu1 %v1210_v12  ;;  %1855 = vmatpush1.msra.mxu0 %v1724_v13  ;;  %v1141_v10 = vld [vmem:[#allocation11 + $0x6b0] sm:$0xff]  ;;  %v1216_v12 = vld [vmem:[#allocation11 + $0x908] sm:$0xff] }
 0x295   :  { %1534 = vmatpush2.msra.mxu1 %v1209_v14  ;;  %1856 = vmatprep.subr.mxu0 %v1723_v15  ;;  %v1760_v13 = vld [vmem:[#allocation14 + $0x1c0] sm:$0xff]  ;;  %v1759_v15 = vld [vmem:[#allocation14 + $0x1b8] sm:$0xff] }
 0x296   :  { %1535 = vmatprep.subr.mxu1 %v1205_v16  ;;  %1857 = vmatpush1.msra.mxu0 %v1722_v17  ;;  %v1136_v14 = vld [vmem:[#allocation11 + $0x688] sm:$0xff]  ;;  %v1211_v16 = vld [vmem:[#allocation11 + $0x8e0] sm:$0xff]  ;;  %v1758_v17 = vld [vmem:[#allocation14 + $0x1b0] sm:$0xff] }
 0x297   :  { %1536 = vmatpush2.msra.mxu1 %v1204_v18  ;;  %1858 = vmatprep.subr.mxu0 %v1721_v48  ;;  %v1131_v18 = vld [vmem:[#allocation11 + $0x660] sm:$0xff]  ;;  %v1757_v48 = vld [vmem:[#allocation14 + $0x1a8] sm:$0xff] }
 0x298   :  { %1537 = vmatprep.subr.mxu1 %v1200_v20  ;;  %1859 = vmatpush1.msra.mxu0 %v1720_v21  ;;  %v1206_v20 = vld [vmem:[#allocation11 + $0x8b8] sm:$0xff]  ;;  %v1756_v21 = vld [vmem:[#allocation14 + $0x1a0] sm:$0xff] }
 0x299   :  { %1538 = vmatpush2.msra.mxu1 %v1199_v22  ;;  %1860 = vmatprep.subr.mxu0 %v1719_v23  ;;  %v1126_v22 = vld [vmem:[#allocation11 + $0x638] sm:$0xff] }
 0x29a   :  { %1539 = vmatprep.subr.mxu1 %v1195_v24  ;;  %1861 = vmatpush1.msra.mxu0 %v1718_v27  ;;  %v1755_v23 = vld [vmem:[#allocation14 + $0x198] sm:$0xff]  ;;  %v1201_v24 = vld [vmem:[#allocation11 + $0x890] sm:$0xff] }
 0x29b   :  { %1540 = vmatpush2.msra.mxu1 %v1194_v29  ;;  %1862 = vmatprep.subr.mxu0 %v1717_v30  ;;  %v1754_v27 = vld [vmem:[#allocation14 + $0x190] sm:$0xff]  ;;  %v1753_v30 = vld [vmem:[#allocation14 + $0x188] sm:$0xff] }
 0x29c   :  { %1541 = vmatprep.subr.mxu1 %v1190_v31  ;;  %1863 = vmatpush1.msra.mxu0 %v1716_v33  ;;  %v1121_v29 = vld [vmem:[#allocation11 + $0x610] sm:$0xff]  ;;  %v1196_v31 = vld [vmem:[#allocation11 + $0x868] sm:$0xff] }
 0x29d   :  { %1542 = vmatpush2.msra.mxu1 %v1189_v34  ;;  %1864 = vmatprep.subr.mxu0 %v1715_v36  ;;  %v1752_v33 = vld [vmem:[#allocation14 + $0x180] sm:$0xff]  ;;  %v1751_v36 = vld [vmem:[#allocation14 + $0x178] sm:$0xff] }
 0x29e   :  { %1543 = vmatprep.subr.mxu1 %v1185_v39  ;;  %1865 = vmatpush1.msra.mxu0 %v1714_v40  ;;  %v1116_v34 = vld [vmem:[#allocation11 + $0x5e8] sm:$0xff]  ;;  %v1191_v39 = vld [vmem:[#allocation11 + $0x840] sm:$0xff]  ;;  %v1750_v40 = vld [vmem:[#allocation14 + $0x170] sm:$0xff] }
 0x29f   :  { %1544 = vmatpush2.msra.mxu1 %v1184_v41  ;;  %1866 = vmatprep.subr.mxu0 %v1713_v42  ;;  %v1111_v41 = vld [vmem:[#allocation11 + $0x5c0] sm:$0xff]  ;;  %v1749_v42 = vld [vmem:[#allocation14 + $0x168] sm:$0xff] }
 0x2a0   :  { %1545 = vmatprep.subr.mxu1 %v1180_v9  ;;  %1867 = vmatpush1.msra.mxu0 %v1712_v44  ;;  %v1186_v9 = vld [vmem:[#allocation11 + $0x818] sm:$0xff]  ;;  %v1748_v44 = vld [vmem:[#allocation14 + $0x160] sm:$0xff] }
 0x2a1   :  { %1546 = vmatpush2.msra.mxu1 %v1179_v46  ;;  %1868 = vmatprep.subr.mxu0 %v1711_v47  ;;  %v1106_v46 = vld [vmem:[#allocation11 + $0x598] sm:$0xff] }
 0x2a2   :  { %1547 = vmatprep.subr.mxu1 %v1175_v49  ;;  %1869 = vmatpush1.msra.mxu0 %v1710_v50  ;;  %v1747_v47 = vld [vmem:[#allocation14 + $0x158] sm:$0xff]  ;;  %v1181_v49 = vld [vmem:[#allocation11 + $0x7f0] sm:$0xff] }
 0x2a3   :  { %1548 = vmatpush2.msra.mxu1 %v1174_v51  ;;  %1870 = vmatprep.subr.mxu0 %v1709_v52  ;;  %v1746_v50 = vld [vmem:[#allocation14 + $0x150] sm:$0xff]  ;;  %v1745_v52 = vld [vmem:[#allocation14 + $0x148] sm:$0xff] }
 0x2a4   :  { %1549 = vmatprep.subr.mxu1 %v1170_v53  ;;  %1871 = vmatpush1.msra.mxu0 %v1708_v54  ;;  %v1101_v51 = vld [vmem:[#allocation11 + $0x570] sm:$0xff]  ;;  %v1176_v53 = vld [vmem:[#allocation11 + $0x7c8] sm:$0xff] }
 0x2a5   :  { %1550 = vmatpush2.msra.mxu1 %v1169_v55  ;;  %1872 = vmatprep.subr.mxu0 %v1707_v57  ;;  %v1744_v54 = vld [vmem:[#allocation14 + $0x140] sm:$0xff]  ;;  %v1743_v57 = vld [vmem:[#allocation14 + $0x138] sm:$0xff] }
 0x2a6   :  { %1552 = vmatmul.mubr.f32.vlgmr.msra.gmra.mxu1 %v2693_v45  ;;  %2174 = vmatprep.subr.mxu1 %v1246_v58  ;;  %v1096_v55 = vld [vmem:[#allocation11 + $0x548] sm:$0xff]  ;;  %v1171_v58 = vld [vmem:[#allocation11 + $0x7a0] sm:$0xff] }
 0x2a7   :  { %2175 = vmatpush3.msra.mxu1 %v1166_v59  ;;  %1692 = vmatprep.mubr.f32.mxu1 %v2691_v43  ;;  %v1146_v43 = vld [vmem:[#allocation11 + $0x6d8] sm:$0xff] }
 0x2a8   :  { %2176 = vmatprep.subr.mxu1 %v1241_v60  ;;  %1873 = vmatpush1.msra.mxu0 %v1706_v61  ;;  %v1742_v59 = vld [vmem:[#allocation14 + $0x130] sm:$0xff]  ;;  %v1091_v60 = vld [vmem:[#allocation11 + $0x520] sm:$0xff]  ;;  %v1741_v61 = vld [vmem:[#allocation14 + $0x128] sm:$0xff] }
 0x2a9   :  { %2177 = vmatpush3.msra.mxu1 %v1161_v62  ;;  %1874 = vmatprep.subr.mxu0 %v1705_v63  ;;  %v1740_v62 = vld [vmem:[#allocation14 + $0x120] sm:$0xff]  ;;  %v1739_v63 = vld [vmem:[#allocation14 + $0x118] sm:$0xff] }
 0x2aa   :  { %2178 = vmatprep.subr.mxu1 %v1236_v0  ;;  %1875 = vmatpush1.msra.mxu0 %v1704_v1  ;;  %v1799_v0 = vld [vmem:[#allocation14 + $0x2f8] sm:$0xff]  ;;  %v1738_v1 = vld [vmem:[#allocation14 + $0x110] sm:$0xff] }
 0x2ab   :  { %2179 = vmatpush3.msra.mxu1 %v1156_v56  ;;  %1876 = vmatprep.subr.mxu0 %v1767_v2  ;;  %v1798_v56 = vld [vmem:[#allocation14 + $0x2f0] sm:$0xff]  ;;  %v1737_v2 = vld [vmem:[#allocation14 + $0x108] sm:$0xff] }
 0x2ac   :  { %2180 = vmatprep.subr.mxu1 %v1231_v32  ;;  %1877 = vmatpush2.msra.mxu0 %v1766_v38  ;;  %v1797_v32 = vld [vmem:[#allocation14 + $0x2e8] sm:$0xff]  ;;  %v1736_v38 = vld [vmem:[#allocation14 + $0x100] sm:$0xff] }
 0x2ad   :  { %2181 = vmatpush3.msra.mxu1 %v1151_v3  ;;  %1878 = vmatprep.subr.mxu0 %v1765_v19  ;;  %v1796_v3 = vld [vmem:[#allocation14 + $0x2e0] sm:$0xff]  ;;  %v1795_v19 = vld [vmem:[#allocation14 + $0x2d8] sm:$0xff] }
 0x2ae   :  { %2182 = vmatprep.subr.mxu1 %v1226_v4  ;;  %1879 = vmatpush2.msra.mxu0 %v1764_v5  ;;  %v1794_v4 = vld [vmem:[#allocation14 + $0x2d0] sm:$0xff]  ;;  %v1793_v5 = vld [vmem:[#allocation14 + $0x2c8] sm:$0xff] }
 0x2af   :  { %2183 = vmatpush3.msra.mxu1 %v1146_v43  ;;  %1880 = vmatprep.subr.mxu0 %v1763_v6  ;;  %v1792_v43 = vld [vmem:[#allocation14 + $0x2c0] sm:$0xff]  ;;  %v1790_v6 = vld [vmem:[#allocation14 + $0x2b0] sm:$0xff] }
 0x2b0   :  { %2184 = vmatprep.subr.mxu1 %v1221_v7  ;;  %1881 = vmatpush2.msra.mxu0 %v1762_v8  ;;  %v1789_v7 = vld [vmem:[#allocation14 + $0x2a8] sm:$0xff]  ;;  %v1788_v8 = vld [vmem:[#allocation14 + $0x2a0] sm:$0xff] }
 0x2b1   :  { %2185 = vmatpush3.msra.mxu1 %v1141_v10  ;;  %1882 = vmatprep.subr.mxu0 %v1761_v11  ;;  %v1787_v10 = vld [vmem:[#allocation14 + $0x298] sm:$0xff]  ;;  %v1786_v11 = vld [vmem:[#allocation14 + $0x290] sm:$0xff] }
 0x2b2   :  { %2186 = vmatprep.subr.mxu1 %v1216_v12  ;;  %1883 = vmatpush2.msra.mxu0 %v1760_v13  ;;  %v1785_v12 = vld [vmem:[#allocation14 + $0x288] sm:$0xff]  ;;  %v1784_v13 = vld [vmem:[#allocation14 + $0x280] sm:$0xff] }
 0x2b3   :  { %2187 = vmatpush3.msra.mxu1 %v1136_v14  ;;  %1884 = vmatprep.subr.mxu0 %v1759_v15  ;;  %v1783_v14 = vld [vmem:[#allocation14 + $0x278] sm:$0xff]  ;;  %v1782_v15 = vld [vmem:[#allocation14 + $0x270] sm:$0xff] }
 0x2b4   :  { %2188 = vmatprep.subr.mxu1 %v1211_v16  ;;  %1885 = vmatpush2.msra.mxu0 %v1758_v17  ;;  %v1781_v16 = vld [vmem:[#allocation14 + $0x268] sm:$0xff]  ;;  %v1780_v17 = vld [vmem:[#allocation14 + $0x260] sm:$0xff] }
 0x2b5   :  { %2189 = vmatpush3.msra.mxu1 %v1131_v18  ;;  %1886 = vmatprep.subr.mxu0 %v1757_v48  ;;  %v1779_v18 = vld [vmem:[#allocation14 + $0x258] sm:$0xff]  ;;  %v1778_v48 = vld [vmem:[#allocation14 + $0x250] sm:$0xff] }
 0x2b6   :  { %2190 = vmatprep.subr.mxu1 %v1206_v20  ;;  %1887 = vmatpush2.msra.mxu0 %v1756_v21  ;;  %v1777_v20 = vld [vmem:[#allocation14 + $0x248] sm:$0xff]  ;;  %v1776_v21 = vld [vmem:[#allocation14 + $0x240] sm:$0xff] }
 0x2b7   :  { %2191 = vmatpush3.msra.mxu1 %v1126_v22  ;;  %1888 = vmatprep.subr.mxu0 %v1755_v23  ;;  %v1775_v22 = vld [vmem:[#allocation14 + $0x238] sm:$0xff]  ;;  %v1774_v23 = vld [vmem:[#allocation14 + $0x230] sm:$0xff] }
 0x2b8   :  { %2192 = vmatprep.subr.mxu1 %v1201_v24  ;;  %1889 = vmatpush2.msra.mxu0 %v1754_v27  ;;  %v1773_v24 = vld [vmem:[#allocation14 + $0x228] sm:$0xff]  ;;  %v1772_v27 = vld [vmem:[#allocation14 + $0x220] sm:$0xff] }
 0x2b9   :  { %2193 = vmatpush3.msra.mxu1 %v1121_v29  ;;  %1890 = vmatprep.subr.mxu0 %v1753_v30  ;;  %v1771_v29 = vld [vmem:[#allocation14 + $0x218] sm:$0xff]  ;;  %v1770_v30 = vld [vmem:[#allocation14 + $0x210] sm:$0xff] }
 0x2ba   :  { %2194 = vmatprep.subr.mxu1 %v1196_v31  ;;  %1891 = vmatpush2.msra.mxu0 %v1752_v33  ;;  %v1769_v31 = vld [vmem:[#allocation14 + $0x208] sm:$0xff]  ;;  %v1768_v33 = vld [vmem:[#allocation14 + $0x200] sm:$0xff] }
 0x2bb   :  { %2195 = vmatpush3.msra.mxu1 %v1116_v34  ;;  %1892 = vmatprep.subr.mxu0 %v1751_v36  ;;  %v1831_v34 = vld [vmem:[#allocation14 + $0x3f8] sm:$0xff]  ;;  %v1830_v36 = vld [vmem:[#allocation14 + $0x3f0] sm:$0xff] }
 0x2bc   :  { %2196 = vmatprep.subr.mxu1 %v1191_v39  ;;  %1893 = vmatpush2.msra.mxu0 %v1750_v40  ;;  %v1829_v39 = vld [vmem:[#allocation14 + $0x3e8] sm:$0xff]  ;;  %v1828_v40 = vld [vmem:[#allocation14 + $0x3e0] sm:$0xff] }
 0x2bd   :  { %2197 = vmatpush3.msra.mxu1 %v1111_v41  ;;  %1894 = vmatprep.subr.mxu0 %v1749_v42  ;;  %v1827_v41 = vld [vmem:[#allocation14 + $0x3d8] sm:$0xff]  ;;  %v1826_v42 = vld [vmem:[#allocation14 + $0x3d0] sm:$0xff] }
 0x2be   :  { %2198 = vmatprep.subr.mxu1 %v1186_v9  ;;  %1895 = vmatpush2.msra.mxu0 %v1748_v44  ;;  %v1825_v9 = vld [vmem:[#allocation14 + $0x3c8] sm:$0xff]  ;;  %v1824_v44 = vld [vmem:[#allocation14 + $0x3c0] sm:$0xff] }
 0x2bf   :  { %2199 = vmatpush3.msra.mxu1 %v1106_v46  ;;  %1896 = vmatprep.subr.mxu0 %v1747_v47  ;;  %v1823_v46 = vld [vmem:[#allocation14 + $0x3b8] sm:$0xff]  ;;  %v1822_v47 = vld [vmem:[#allocation14 + $0x3b0] sm:$0xff] }
 0x2c0   :  { %2200 = vmatprep.subr.mxu1 %v1181_v49  ;;  %1897 = vmatpush2.msra.mxu0 %v1746_v50  ;;  %v1821_v49 = vld [vmem:[#allocation14 + $0x3a8] sm:$0xff]  ;;  %v1820_v50 = vld [vmem:[#allocation14 + $0x3a0] sm:$0xff] }
 0x2c1   :  { %2201 = vmatpush3.msra.mxu1 %v1101_v51  ;;  %1898 = vmatprep.subr.mxu0 %v1745_v52  ;;  %v1819_v51 = vld [vmem:[#allocation14 + $0x398] sm:$0xff]  ;;  %v1818_v52 = vld [vmem:[#allocation14 + $0x390] sm:$0xff] }
 0x2c2   :  { %2202 = vmatprep.subr.mxu1 %v1176_v53  ;;  %1899 = vmatpush2.msra.mxu0 %v1744_v54  ;;  %v1817_v53 = vld [vmem:[#allocation14 + $0x388] sm:$0xff]  ;;  %v1816_v54 = vld [vmem:[#allocation14 + $0x380] sm:$0xff] }
 0x2c3   :  { %2203 = vmatpush3.msra.mxu1 %v1096_v55  ;;  %1900 = vmatprep.subr.mxu0 %v1743_v57  ;;  %v1815_v55 = vld [vmem:[#allocation14 + $0x378] sm:$0xff]  ;;  %v1814_v57 = vld [vmem:[#allocation14 + $0x370] sm:$0xff] }
 0x2c4   :  { %2204 = vmatprep.subr.mxu1 %v1171_v58  ;;  %1901 = vmatpush2.msra.mxu0 %v1742_v59  ;;  %v1813_v58 = vld [vmem:[#allocation14 + $0x368] sm:$0xff]  ;;  %v1812_v59 = vld [vmem:[#allocation14 + $0x360] sm:$0xff] }
 0x2c5   :  { %2205 = vmatpush3.msra.mxu1 %v1091_v60  ;;  %1902 = vmatprep.subr.mxu0 %v1741_v61  ;;  %v1811_v60 = vld [vmem:[#allocation14 + $0x358] sm:$0xff]  ;;  %v1810_v61 = vld [vmem:[#allocation14 + $0x350] sm:$0xff] }
 0x2c6   :  { %1693 = vmatmul.mubr.f32.vlgmr.msra.gmra.mxu1 %v2693_v45  ;;  %1903 = vmatpush2.msra.mxu0 %v1740_v62  ;;  %v1791_v45 = vld [vmem:[#allocation14 + $0x2b8] sm:$0xff]  ;;  %v1809_v62 = vld [vmem:[#allocation14 + $0x348] sm:$0xff] }
 0x2c7   :  { %1904 = vmatprep.subr.mxu0 %v1739_v63  ;;  %1915 = vmatprep.subr.mxu1 %v1799_v0  ;;  %v1808_v63 = vld [vmem:[#allocation14 + $0x340] sm:$0xff]  ;;  %v1807_v0 = vld [vmem:[#allocation14 + $0x338] sm:$0xff] }
 0x2c8   :  { %1905 = vmatpush2.msra.mxu0 %v1738_v1  ;;  %1916 = vmatpush1.msra.mxu1 %v1798_v56  ;;  %v1806_v1 = vld [vmem:[#allocation14 + $0x330] sm:$0xff]  ;;  %v1805_v56 = vld [vmem:[#allocation14 + $0x328] sm:$0xff] }
 0x2c9   :  { %1906 = vmatprep.subr.mxu0 %v1737_v2  ;;  %1917 = vmatprep.subr.mxu1 %v1797_v32  ;;  %v1804_v2 = vld [vmem:[#allocation14 + $0x320] sm:$0xff]  ;;  %v1803_v32 = vld [vmem:[#allocation14 + $0x318] sm:$0xff] }
 0x2ca   :  { %1907 = vmatpush2.msra.mxu0 %v1736_v38  ;;  %1918 = vmatpush1.msra.mxu1 %v1796_v3  ;;  %v1802_v38 = vld [vmem:[#allocation14 + $0x310] sm:$0xff]  ;;  %v1801_v3 = vld [vmem:[#allocation14 + $0x308] sm:$0xff] }
 0x2cb   :  { %1919 = vmatprep.subr.mxu1 %v1795_v19  ;;  %v1800_v19 = vld [vmem:[#allocation14 + $0x300] sm:$0xff] }
 0x2cc   :  { %1920 = vmatpush1.msra.mxu1 %v1794_v4  ;;  %v2704_v4 = vld [vmem:[#allocation13] sm:$0x1f] }
 0x2cd   :  { %1921 = vmatprep.subr.mxu1 %v1793_v5 }
 0x2ce   :  { %1922 = vmatpush1.msra.mxu1 %v1792_v43  ;;  %v1252_v43 = vrot.slane %v2704_v4, %v2645_v26 }
 0x2cf   :  { %1923 = vmatprep.subr.mxu1 %v1791_v45  ;;  %v1256_v45 = vrot.slane %v2704_v4, %v2648_v28 }
 0x2d0   :  { %1924 = vmatpush1.msra.mxu1 %v1790_v6 }
 0x2d1   :  { %1925 = vmatprep.subr.mxu1 %v1789_v7 }
 0x2d2   :  { %1926 = vmatpush1.msra.mxu1 %v1788_v8 }
 0x2d3   :  { %1927 = vmatprep.subr.mxu1 %v1787_v10 }
 0x2d4   :  { %1928 = vmatpush1.msra.mxu1 %v1786_v11 }
 0x2d5   :  { %1929 = vmatprep.subr.mxu1 %v1785_v12 }
 0x2d6   :  { %1930 = vmatpush1.msra.mxu1 %v1784_v13 }
 0x2d7   :  { %1931 = vmatprep.subr.mxu1 %v1783_v14 }
 0x2d8   :  { %1932 = vmatpush1.msra.mxu1 %v1782_v15 }
 0x2d9   :  { %1933 = vmatprep.subr.mxu1 %v1781_v16 }
 0x2da   :  { %1934 = vmatpush1.msra.mxu1 %v1780_v17  ;;  %v1260_v17 = vrot.slane %v2704_v4, %v2655_v35  ;;  %v2003_v35 = vld [vmem:[%s2837_s9 + $0x78] sm:$0xff] }
 0x2db   :  { %1935 = vmatprep.subr.mxu1 %v1779_v18  ;;  %v1264_v18 = vrot.slane %v2704_v4, %v2658_v37  ;;  %v2018_v37 = vld [vmem:[%s2837_s9 + $0xf0] sm:$0xff] }
 0x2dc   :  { %1936 = vmatpush1.msra.mxu1 %v1778_v48 }
 0x2dd   :  { %1937 = vmatprep.subr.mxu1 %v1777_v20 }
 0x2de   :  { %1938 = vmatpush1.msra.mxu1 %v1776_v21 }
 0x2df   :  { %1939 = vmatprep.subr.mxu1 %v1775_v22 }
 0x2e0   :  { %1940 = vmatpush1.msra.mxu1 %v1774_v23 }
 0x2e1   :  { %1941 = vmatprep.subr.mxu1 %v1773_v24 }
 0x2e2   :  { %1942 = vmatpush1.msra.mxu1 %v1772_v27 }
 0x2e3   :  { %1943 = vmatprep.subr.mxu1 %v1771_v29 }
 0x2e4   :  { %1944 = vmatpush1.msra.mxu1 %v1770_v30 }
 0x2e5   :  { %1945 = vmatprep.subr.mxu1 %v1769_v31  ;;  %v1340_v5 = vpop.f32.mrf.mxu0  ;;  %v2019_v31 = vld [vmem:[%s2837_s9 + $0xf8] sm:$0xff] }
 0x2e6   :  { %1946 = vmatpush1.msra.mxu1 %v1768_v33  ;;  %v1341_v7 = vadd.f32 %v1340_v5, %v1252_v43  ;;  %2209 = vmatprep.subr.mxu0 %v2019_v31  ;;  %v2002_v33 = vld [vmem:[%s2837_s9 + $0x70] sm:$0xff]  ;;  %v2005_v5 = vld [vmem:[%s2837_s9 + $0x88] sm:$0xff] }
 0x2e7   :  { %1947 = vmatprep.subr.mxu1 %v1831_v34  ;;  %v1342_v6 = vpop.f32.mrf.mxu0  ;;  %v2017_v34 = vld [vmem:[%s2837_s9 + $0xe8] sm:$0xff] }
 0x2e8   :  { %1948 = vmatpush2.msra.mxu1 %v1830_v36  ;;  %v1343_v10 = vadd.f32 %v1342_v6, %v1256_v45  ;;  %v2001_v36 = vld [vmem:[%s2837_s9 + $0x68] sm:$0xff]  ;;  %v2004_v45 = vld [vmem:[%s2837_s9 + $0x80] sm:$0xff] }
 0x2e9   :  { %1949 = vmatprep.subr.mxu1 %v1829_v39  ;;  %v2016_v39 = vld [vmem:[%s2837_s9 + $0xe0] sm:$0xff]  ;;  %v1989_v43 = vld [vmem:[%s2837_s9 + $0x8] sm:$0xff] }
 0x2ea   :  { %1950 = vmatpush2.msra.mxu1 %v1828_v40  ;;  %v2000_v40 = vld [vmem:[%s2837_s9 + $0x60] sm:$0xff] }
 0x2eb   :  { %1951 = vmatprep.subr.mxu1 %v1827_v41  ;;  %v2015_v41 = vld [vmem:[%s2837_s9 + $0xd8] sm:$0xff]  ;;  %v1988_v6 = vld [vmem:[%s2837_s9] sm:$0xff] }
 0x2ec   :  { %1952 = vmatpush2.msra.mxu1 %v1826_v42  ;;  %v1999_v42 = vld [vmem:[%s2837_s9 + $0x58] sm:$0xff] }
 0x2ed   :  { %1953 = vmatprep.subr.mxu1 %v1825_v9  ;;  %v2014_v9 = vld [vmem:[%s2837_s9 + $0xd0] sm:$0xff] }
 0x2ee   :  { %1954 = vmatpush2.msra.mxu1 %v1824_v44  ;;  %v1998_v44 = vld [vmem:[%s2837_s9 + $0x50] sm:$0xff] }
 0x2ef   :  { %1955 = vmatprep.subr.mxu1 %v1823_v46  ;;  %v2013_v46 = vld [vmem:[%s2837_s9 + $0xc8] sm:$0xff] }
 0x2f0   :  { %1956 = vmatpush2.msra.mxu1 %v1822_v47  ;;  %v1997_v47 = vld [vmem:[%s2837_s9 + $0x48] sm:$0xff] }
 0x2f1   :  { %1957 = vmatprep.subr.mxu1 %v1821_v49  ;;  %v2012_v49 = vld [vmem:[%s2837_s9 + $0xc0] sm:$0xff] }
 0x2f2   :  { %1958 = vmatpush2.msra.mxu1 %v1820_v50 }
 0x2f3   :  { %1959 = vmatprep.subr.mxu1 %v1819_v51  ;;  %v1996_v51 = vld [vmem:[%s2837_s9 + $0x40] sm:$0xff] }
 0x2f4   :  { %1960 = vmatpush2.msra.mxu1 %v1818_v52  ;;  %v2011_v52 = vld [vmem:[%s2837_s9 + $0xb8] sm:$0xff] }
 0x2f5   :  { %1961 = vmatprep.subr.mxu1 %v1817_v53  ;;  %v1995_v53 = vld [vmem:[%s2837_s9 + $0x38] sm:$0xff] }
 0x2f6   :  { %1962 = vmatpush2.msra.mxu1 %v1816_v54  ;;  %v1267_v54 = vsub.s32 4, %v2642_v25  ;;  %v1993_v25 = vld [vmem:[%s2837_s9 + $0x28] sm:$0xff] }
 0x2f7   :  { %1963 = vmatprep.subr.mxu1 %v1815_v55  ;;  %v2010_v55 = vld [vmem:[%s2837_s9 + $0xb0] sm:$0xff] }
 0x2f8   :  { %1964 = vmatpush2.msra.mxu1 %v1814_v57 }
 0x2f9   :  { %1965 = vmatprep.subr.mxu1 %v1813_v58  ;;  %v1994_v58 = vld [vmem:[%s2837_s9 + $0x30] sm:$0xff] }
 0x2fa   :  { %1966 = vmatpush2.msra.mxu1 %v1812_v59  ;;  %v2009_v59 = vld [vmem:[%s2837_s9 + $0xa8] sm:$0xff] }
 0x2fb   :  { %1967 = vmatprep.subr.mxu1 %v1811_v60  ;;  %v1268_v60 = vrot.slane %v2704_v4, %v1267_v54  ;;  %v1990_v4 = vld [vmem:[%s2837_s9 + $0x10] sm:$0xff] }
 0x2fc   :  { %1968 = vmatpush2.msra.mxu1 %v1810_v61 }
 0x2fd   :  { %1969 = vmatprep.subr.mxu1 %v1809_v62  ;;  %v2008_v62 = vld [vmem:[%s2837_s9 + $0xa0] sm:$0xff] }
 0x2fe   :  { %1970 = vmatpush2.msra.mxu1 %v1808_v63 }
 0x2ff   :  { %1971 = vmatprep.subr.mxu1 %v1807_v0  ;;  %v1992_v0 = vld [vmem:[%s2837_s9 + $0x20] sm:$0xff] }
 0x300   :  { %1972 = vmatpush2.msra.mxu1 %v1806_v1 }
 0x301   :  { %1973 = vmatprep.subr.mxu1 %v1805_v56 }
 0x302   :  { %1974 = vmatpush2.msra.mxu1 %v1804_v2 }
 0x303   :  { %1975 = vmatprep.subr.mxu1 %v1803_v32 }
 0x304   :  { %1976 = vmatpush2.msra.mxu1 %v1802_v38  ;;  %v2007_v38 = vld [vmem:[%s2837_s9 + $0x98] sm:$0xff] }
 0x305   :  { %1977 = vmatprep.subr.mxu1 %v1801_v3  ;;  %v1991_v3 = vld [vmem:[%s2837_s9 + $0x18] sm:$0xff] }
 0x306   :  { %1978 = vmatpush2.msra.mxu1 %v1800_v19  ;;  %v2006_v19 = vld [vmem:[%s2837_s9 + $0x90] sm:$0xff] }
 0x325   :  { %v1482_v16 = vpop.f32.mrf.mxu0 }
 0x326   :  { %v1411_v8 = vpop.f32.mrf.mxu1  ;;  %v1483_v20 = vadd.f32 %v1482_v16, %v1260_v17 }
 0x327   :  { %v1412_v11 = vadd.f32 %v1411_v8, %v1341_v7  ;;  %v1484_v48 = vpop.f32.mrf.mxu0  ;;  %v1832_v7 = vld [vmem:[#allocation16] sm:$0x3] }
 0x328   :  { %v1413_v12 = vpop.f32.mrf.mxu1  ;;  %v1485_v22 = vadd.f32 %v1484_v48, %v1264_v18 }
 0x329   :  { %v1414_v13 = vadd.f32 %v1413_v12, %v1343_v10  ;;  %v1700_v15 = vmax.f32 %v1412_v11, 0.0  ;;  %v1837_v10 = vrot.slane %v1832_v7, %v2645_v26  ;;  %v1841_v11 = vrot.slane %v1832_v7, %v2648_v28 }
 0x32b   :  { %v1701_v14 = vmax.f32 %v1414_v13, 0.0 }
 0x32d   :  { %1908 = vmatprep.mubr.f32.mxu0 %v1701_v14 }
 0x32e   :  { %1909 = vmatmul.mubr.f32.vlgmr.msra.gmra.mxu0 %v1700_v15 }
 0x32f   :  { %2210 = vmatpush3.msra.mxu0 %v2003_v35 }
 0x330   :  { %2211 = vmatprep.subr.mxu0 %v2018_v37 }
 0x331   :  { %2212 = vmatpush3.msra.mxu0 %v2002_v33 }
 0x332   :  { %2213 = vmatprep.subr.mxu0 %v2017_v34 }
 0x333   :  { %2214 = vmatpush3.msra.mxu0 %v2001_v36 }
 0x334   :  { %2215 = vmatprep.subr.mxu0 %v2016_v39 }
 0x335   :  { %2216 = vmatpush3.msra.mxu0 %v2000_v40 }
 0x336   :  { %2217 = vmatprep.subr.mxu0 %v2015_v41 }
 0x337   :  { %2218 = vmatpush3.msra.mxu0 %v1999_v42 }
 0x338   :  { %2219 = vmatprep.subr.mxu0 %v2014_v9 }
 0x339   :  { %2220 = vmatpush3.msra.mxu0 %v1998_v44 }
 0x33a   :  { %2221 = vmatprep.subr.mxu0 %v2013_v46 }
 0x33b   :  { %2222 = vmatpush3.msra.mxu0 %v1997_v47 }
 0x33c   :  { %2223 = vmatprep.subr.mxu0 %v2012_v49 }
 0x33d   :  { %2224 = vmatpush3.msra.mxu0 %v1996_v51 }
 0x33e   :  { %2225 = vmatprep.subr.mxu0 %v2011_v52 }
 0x33f   :  { %2226 = vmatpush3.msra.mxu0 %v1995_v53 }
 0x340   :  { %2227 = vmatprep.subr.mxu0 %v2010_v55 }
 0x341   :  { %2228 = vmatpush3.msra.mxu0 %v1994_v58 }
 0x342   :  { %2229 = vmatprep.subr.mxu0 %v2009_v59 }
 0x343   :  { %2230 = vmatpush3.msra.mxu0 %v1993_v25 }
 0x344   :  { %2231 = vmatprep.subr.mxu0 %v2008_v62 }
 0x345   :  { %2232 = vmatpush3.msra.mxu0 %v1992_v0 }
 0x346   :  { %2233 = vmatprep.subr.mxu0 %v2007_v38 }
 0x347   :  { %2234 = vmatpush3.msra.mxu0 %v1991_v3 }
 0x348   :  { %v2171_v50 = vpop.f32.mrf.mxu0  ;;  %2235 = vmatprep.subr.mxu0 %v2006_v19 }
 0x349   :  { %2236 = vmatpush3.msra.mxu0 %v1990_v4 }
 0x34a   :  { %v2172_v57 = vpop.f32.mrf.mxu0  ;;  %2237 = vmatprep.subr.mxu0 %v2005_v5 }
 0x34b   :  { %v2173_v61 = vadd.f32 %v2172_v57, %v2171_v50  ;;  %2238 = vmatpush3.msra.mxu0 %v1989_v43 }
 0x34c   :  { %2239 = vmatprep.subr.mxu0 %v2004_v45 }
 0x34d   :  { %v1625_v56 = vadd.f32 %v2173_v61, %v1268_v60  ;;  %2240 = vmatpush3.msra.mxu0 %v1988_v6 }
 0x366   :  { %v1553_v21 = vpop.f32.mrf.mxu1 }
 0x367   :  { %v1554_v23 = vadd.f32 %v1553_v21, %v1483_v20 }
 0x368   :  { %v1555_v24 = vpop.f32.mrf.mxu1 }
 0x369   :  { %v1556_v27 = vadd.f32 %v1555_v24, %v1485_v22  ;;  %v1702_v30 = vmax.f32 %v1554_v23, 0.0  ;;  %v2138_v22 = vld [vmem:[#allocation17] ss:$0 sm:$0xff] }
 0x36b   :  { %v1703_v29 = vmax.f32 %v1556_v27, 0.0 }
 0x36d   :  { %1979 = vmatprep.mubr.f32.mxu1 %v1703_v29 }
 0x36e   :  { %1980 = vmatmul.mubr.f32.vlgmr.msra.gmra.mxu1 %v1702_v30 }
 0x386   :  { %v2206_v63 = vpop.f32.mrf.mxu1 }
 0x388   :  { %v2207_v1 = vpop.f32.mrf.mxu1 }
 0x389   :  { %v2208_v2 = vadd.f32 %v2207_v1, %v2206_v63 }
 0x38b   :  { %v1695_v32 = vadd.f32 %v2208_v2, %v1625_v56 }
 0x38d   :  { %1699 = vst.msk [vmem:[#allocation19] sm:$0xff] %vm1698_vm1, %v1695_v32 }
 0x3ee   :  { %v1910_v8 = vpop.f32.mrf.mxu0 }
 0x3ef   :  { %v1911_v13 = vadd.f32 %v1910_v8, %v1837_v10 }
 0x3f0   :  { %v1912_v12 = vpop.f32.mrf.mxu0 }
 0x3f1   :  { %v1913_v15 = vadd.f32 %v1912_v12, %v1841_v11 }
 0x42e   :  { %v1981_v14 = vpop.f32.mrf.mxu1 }
 0x42f   :  { %v1982_v16 = vadd.f32 %v1981_v14, %v1911_v13 }
 0x430   :  { %v1983_v17 = vpop.f32.mrf.mxu1 }
 0x431   :  { %v1984_v18 = vadd.f32 %v1983_v17, %v1913_v15  ;;  %v1986_v20 = vmax.f32 %v1982_v16, 0.0 }
 0x433   :  { %v1987_v48 = vmax.f32 %v1984_v18, 0.0 }
 0x435   :  { %2091 = vmatprep.mubr.f32.mxu0 %v1987_v48 }
 0x436   :  { %2092 = vmatmul.mubr.f32.vlgmr.msra.gmra.mxu0 %v1986_v20 }
 0x4f6   :  { %v2241_v21 = vpop.f32.mrf.mxu0 }
 0x4f8   :  { %v2242_v23 = vpop.f32.mrf.mxu0 }
 0x4f9   :  { %v2243_v24 = vadd.f32 %v2242_v23, %v2241_v21 }
 0x4fb   :  { %v2094_v27 = vadd.f32 %v2243_v24, %v2138_v22 }
 0x4fd   :  { %2097 = vst.msk [vmem:[#allocation20] sm:$0xff] %vm1698_vm1, %v2094_v27 }
 0x4fe   :  { %2102 = vsyncadd [#allocation4], 96  ;;  %s2538_s9 = smov [#allocation19]  }
 0x4ff   :  { %s2103_s2 = sshll.u32 %s2538_s9, 4  ;;  %s2104_s2 = int_to_ptr.vmem [resolvable:$true] %s2103_s2 }
 0x500   :  { %s2464_s26 = scalar_lea.vmem %s2104_s2, 32  ;;  %s2468_s27 = scalar_lea.vmem %s2104_s2, 128 }
 0x501   :  { %p2465_p8 = scmp.ne.s32.totalorder %s2104_s2, %s2464_s26  ;;  %p2469_p9 = scmp.lt.s32.totalorder %s2104_s2, %s2104_s2 }
 0x502   :  { %p2470_p10 = scmp.lt.s32.totalorder %s2468_s27, %s2464_s26 }
 0x504   :  { %p2471_p11 = por %p2470_p10, %p2469_p9 }
 0x506   :  { %p2472_p12 = pnand %p2471_p11, %p2465_p8 }
 0x508   :  { %2475 = shalt.err (!%p2472_p12)
}
 0x509   :  { %2109 = dma.vmem_to_hbm [thread:$0]  %s2104_s2, 32, %s2839_s11, [#allocation4], %s2522_s25, %s2522_s25, %s2532_s15  }
 0x50a   :  { %2114 = vsyncadd [#allocation21], 96  ;;  %s2539_s5 = smov [#allocation20]  }
 0x50b   :  { %s2115_s30 = sshll.u32 %s2539_s5, 4  ;;  %s2116_s30 = int_to_ptr.vmem [resolvable:$true] %s2115_s30 }
 0x50c   :  { %s2484_s13 = scalar_lea.vmem %s2116_s30, 32  ;;  %s2488_s4 = scalar_lea.vmem %s2116_s30, 128 }
 0x50d   :  { %p2485_p13 = scmp.ne.s32.totalorder %s2116_s30, %s2484_s13  ;;  %p2489_p0 = scmp.lt.s32.totalorder %s2116_s30, %s2116_s30 }
 0x50e   :  { %p2490_p1 = scmp.lt.s32.totalorder %s2488_s4, %s2484_s13 }
 0x510   :  { %p2491_p2 = por %p2490_p1, %p2489_p0 }
 0x512   :  { %p2492_p3 = pnand %p2491_p2, %p2485_p13 }
 0x514   :  { %2495 = shalt.err (!%p2492_p3)
}
 0x515   :  { %2121 = dma.vmem_to_hbm [thread:$0]  %s2116_s30, 32, %s2840_s12, [#allocation21], %s2522_s25, %s2522_s25, %s2532_s15  }
 0x516   :  { %2516 = dma.done.wait [#allocation4], 128  }
 0x517   :  { %2517 = vsyncadd [#allocation4], 4294967168 }
 0x518   :  { %2518 = dma.done.wait [#allocation21], 128  }
 0x519   :  { %2519 = vsyncadd [#allocation21], 4294967168 }
 0x51a   :  { %2128 = vsyncpa [#allocation3], 1 }
 0x51b   :  { %2129 = vsyncpa [#allocation6], 1 }
 0x51c   :  { %2130 = vsyncpa [#allocation9], 1 }
 0x51d   :  { %2131 = vsyncpa [#allocation12], 1 }
 0x51e   :  { %2132 = vsyncpa [#allocation15], 1 }
 0x51f   :  { %2133 = vsyncpa [#allocation18], 1 }
 0x520   :  { %2134 = vsyncpa [#allocation4], 1 }
 0x521   :  { %2135 = vsyncpa [#allocation21], 1 }

</bundles_post_ra>
